<compile_context>
chip_gen: v7x
topology: tpu7x:2x2x1
jax: 0.10.0
libtpu: 0.0.40
codegen_flags: <defaults>
</compile_context>

<pallas_src>
import functools
import math

import jax
import jax.numpy as jnp
from jax.experimental import pallas as pl
from jax.experimental.pallas import tpu as pltpu

LANE = 128  # TPU lane width; channel/class dims are zero-padded to this


# ----------------------------------------------------------------------------
# Fused conv3x3 (pad=1) + 2x2 max-pool + bias + ReLU kernel
# ----------------------------------------------------------------------------
def _conv3x3_relu_pool_kernel(x_ref, w_ref, b_ref, o_ref, acc_ref, *, H, W):
    """One image per grid step.

    x_ref:   (H+2, W+2, Cin)  f32  spatially pre-padded input
    w_ref:   (9, Cin, Cp)     bf16 weights, tap-major (t = ky*3 + kx)
    b_ref:   (1, Cp)          f32  bias (zero in padded channels)
    o_ref:   (H//2, W//2, Cp) f32  pooled output
    acc_ref: (H, W, Cp)       f32  scratch conv accumulator
    """
    Ho, Wo = H // 2, W // 2
    cin = x_ref.shape[-1]
    cp = w_ref.shape[-1]

    # 9 shifted taps taken directly from the VMEM tile (no HBM im2col).
    for t in range(9):
        dy, dx = t // 3, t % 3
        patch = x_ref[dy:dy + H, dx:dx + W, :]                 # (H, W, Cin) f32
        patch = patch.reshape(H * W, cin).astype(jnp.bfloat16)
        contrib = jnp.dot(patch, w_ref[t],
                          preferred_element_type=jnp.float32)  # (H*W, Cp) f32
        contrib = contrib.reshape(H, W, cp)
        if t == 0:
            acc_ref[...] = contrib
        else:
            acc_ref[...] += contrib

    # 2x2/2 max-pool on the raw conv sums, then bias + ReLU (f32 epilogue).
    # relu(x + b) is monotone in x, so pool-then-(bias,ReLU) == PyTorch's
    # conv(+bias) -> ReLU -> pool, but on 4x fewer elements.
    hp = jnp.maximum(acc_ref[:, pl.ds(0, Wo, 2), :],            # horizontal 2->1
                     acc_ref[:, pl.ds(1, Wo, 2), :])            # (H, Wo, Cp)
    pooled = jnp.max(hp.reshape(Ho, 2, Wo, cp), axis=1)         # vertical 2->1
    o_ref[...] = jnp.maximum(pooled + b_ref[...], 0.0).astype(o_ref.dtype)


def conv3x3_relu_pool(x_nhwc, w_taps, b_pad):
    """x_nhwc: (N,H,W,Cin) f32; w_taps: (9,Cin,Cp) bf16; b_pad: (1,Cp) f32."""
    N, H, W, Cin = x_nhwc.shape
    Cp = w_taps.shape[-1]
    Ho, Wo = H // 2, W // 2
    xp = jnp.pad(x_nhwc, ((0, 0), (1, 1), (1, 1), (0, 0)))      # conv padding=1

    kern = functools.partial(_conv3x3_relu_pool_kernel, H=H, W=W)
    return pl.pallas_call(
        kern,
        out_shape=jax.ShapeDtypeStruct((N, Ho, Wo, Cp), jnp.float32),
        grid_spec=pltpu.PrefetchScalarGridSpec(
            num_scalar_prefetch=0,
            grid=(N,),
            in_specs=[
                pl.BlockSpec((None, H + 2, W + 2, Cin), lambda n: (n, 0, 0, 0)),
                pl.BlockSpec((9, Cin, Cp), lambda n: (0, 0, 0)),
                pl.BlockSpec((1, Cp), lambda n: (0, 0)),
            ],
            out_specs=pl.BlockSpec((None, Ho, Wo, Cp), lambda n: (n, 0, 0, 0)),
            scratch_shapes=[pltpu.VMEM((H, W, Cp), jnp.float32)],
        ),
        compiler_params=pltpu.CompilerParams(
            dimension_semantics=("parallel",)),
    )(xp, w_taps, b_pad)


# ----------------------------------------------------------------------------
# Fused classifier kernel: Linear+ReLU -> Linear+ReLU -> Linear
# ----------------------------------------------------------------------------
def _classifier_kernel(x_ref, w1_ref, b1_ref, w2_ref, b2_ref, w3_ref, b3_ref,
                       o_ref):
    # Dropout layers are identity at inference time.
    x = x_ref[...]                                              # (tm, 512) f32
    h = jnp.dot(x.astype(jnp.bfloat16), w1_ref[...],
                preferred_element_type=jnp.float32)
    h = jnp.maximum(h + b1_ref[...], 0.0)
    h = jnp.dot(h.astype(jnp.bfloat16), w2_ref[...],
                preferred_element_type=jnp.float32)
    h = jnp.maximum(h + b2_ref[...], 0.0)
    y = jnp.dot(h.astype(jnp.bfloat16), w3_ref[...],
                preferred_element_type=jnp.float32)
    o_ref[...] = (y + b3_ref[...]).astype(o_ref.dtype)


def pallas_classifier(feat, w1, b1, w2, b2, w3, b3, *, num_classes):
    """feat: (M, 512) f32; w*: bf16 (K, N); b*: f32 (1, N).  Returns (M, nc)."""
    M, K = feat.shape
    N1, N2, N3 = w1.shape[1], w2.shape[1], w3.shape[1]

    # Bounded row tiling: never load an unbounded full-M block; pad the tail.
    tm = ((M + 7) // 8) * 8 if M <= 128 else 128
    Mp = ((M + tm - 1) // tm) * tm
    if Mp != M:
        feat = jnp.pad(feat, ((0, Mp - M), (0, 0)))

    out = pl.pallas_call(
        _classifier_kernel,
        out_shape=jax.ShapeDtypeStruct((Mp, N3), jnp.float32),
        grid_spec=pltpu.PrefetchScalarGridSpec(
            num_scalar_prefetch=0,
            grid=(Mp // tm,),
            in_specs=[
                pl.BlockSpec((tm, K), lambda i: (i, 0)),
                pl.BlockSpec((K, N1), lambda i: (0, 0)),
                pl.BlockSpec((1, N1), lambda i: (0, 0)),
                pl.BlockSpec((N1, N2), lambda i: (0, 0)),
                pl.BlockSpec((1, N2), lambda i: (0, 0)),
                pl.BlockSpec((N2, N3), lambda i: (0, 0)),
                pl.BlockSpec((1, N3), lambda i: (0, 0)),
            ],
            out_specs=pl.BlockSpec((tm, N3), lambda i: (i, 0)),
        ),
        compiler_params=pltpu.CompilerParams(
            dimension_semantics=("parallel",)),
    )(feat, w1, b1, w2, b2, w3, b3)
    return out[:M, :num_classes]


# ----------------------------------------------------------------------------
# Parameter init (mirrors PyTorch init rules) and one-time layout preparation
# ----------------------------------------------------------------------------
def init_conv(key, cin, cout, kh=3, kw=3):
    # PyTorch: normal(0, sqrt(2 / (kh*kw*cout))), bias zero
    n = kh * kw * cout
    w = jax.random.normal(key, (kh, kw, cin, cout), jnp.float32) * math.sqrt(2.0 / n)
    b = jnp.zeros((cout,), jnp.float32)
    return w, b


def init_linear(key, fin, fout):
    # PyTorch default Linear init: U(-1/sqrt(fin), 1/sqrt(fin))
    k1, k2 = jax.random.split(key)
    bound = 1.0 / math.sqrt(fin)
    w = jax.random.uniform(k1, (fin, fout), jnp.float32, -bound, bound)
    b = jax.random.uniform(k2, (fout,), jnp.float32, -bound, bound)
    return w, b


def init_params(key):
    keys = jax.random.split(key, 5)
    p = {}
    p["conv1_w"], p["conv1_b"] = init_conv(keys[0], 3, 16)
    p["conv2_w"], p["conv2_b"] = init_conv(keys[1], 16, 32)
    p["fc1_w"], p["fc1_b"] = init_linear(keys[2], 512, 512)
    p["fc2_w"], p["fc2_b"] = init_linear(keys[3], 512, 512)
    p["fc3_w"], p["fc3_b"] = init_linear(keys[4], 512, 10)
    return p


def prepare_params(p, num_classes=10):
    """One-time layout prep: zero-pad channel / class dims to the 128-lane
    width, reorder conv weights tap-major, cast matmul weights to bf16
    (f32 accumulation and f32 bias/ReLU epilogues stay inside the kernels)."""
    q = {}
    # conv1: Cin=3 real, Cout 16 -> 128 (padded channels stay exactly 0)
    w = jnp.pad(p["conv1_w"], ((0, 0), (0, 0), (0, 0), (0, LANE - 16)))
    q["conv1_w"] = w.reshape(9, 3, LANE).astype(jnp.bfloat16)
    q["conv1_b"] = jnp.pad(p["conv1_b"], (0, LANE - 16)).reshape(1, LANE)
    # conv2: Cin 16 -> 128 (consumes conv1's padded output), Cout 32 -> 128
    w = jnp.pad(p["conv2_w"], ((0, 0), (0, 0), (0, LANE - 16), (0, LANE - 32)))
    q["conv2_w"] = w.reshape(9, LANE, LANE).astype(jnp.bfloat16)
    q["conv2_b"] = jnp.pad(p["conv2_b"], (0, LANE - 32)).reshape(1, LANE)
    # classifier: bf16 weights; fc3 output padded num_classes -> 128
    q["fc1_w"] = p["fc1_w"].astype(jnp.bfloat16)
    q["fc1_b"] = p["fc1_b"].reshape(1, -1)
    q["fc2_w"] = p["fc2_w"].astype(jnp.bfloat16)
    q["fc2_b"] = p["fc2_b"].reshape(1, -1)
    q["fc3_w"] = jnp.pad(p["fc3_w"],
                         ((0, 0), (0, LANE - num_classes))).astype(jnp.bfloat16)
    q["fc3_b"] = jnp.pad(p["fc3_b"], (0, LANE - num_classes)).reshape(1, LANE)
    return q


# ----------------------------------------------------------------------------
# Full forward
# ----------------------------------------------------------------------------
def vgg_forward(x_nchw, qp, num_classes=10):
    N = x_nchw.shape[0]
    x = jnp.transpose(x_nchw, (0, 2, 3, 1))                      # NCHW -> NHWC
    x = conv3x3_relu_pool(x, qp["conv1_w"], qp["conv1_b"])       # (N, 8, 8, 128)
    x = conv3x3_relu_pool(x, qp["conv2_w"], qp["conv2_b"])       # (N, 4, 4, 128)
    # drop lane padding; flatten exactly like PyTorch x.view(N, -1) on NCHW
    feat = jnp.transpose(x[..., :32], (0, 3, 1, 2)).reshape(N, 512)
    return pallas_classifier(feat, qp["fc1_w"], qp["fc1_b"],
                             qp["fc2_w"], qp["fc2_b"],
                             qp["fc3_w"], qp["fc3_b"],
                             num_classes=num_classes)


# ----------------------------------------------------------------------------
# Pure-JAX reference mirroring the kernel math (for an in-script sanity check)
# ----------------------------------------------------------------------------
def _reference_forward(x_nchw, qp, num_classes=10):
    def conv_block(x, w_taps, b):
        N, H, W, _ = x.shape
        cp = w_taps.shape[-1]
        xp = jnp.pad(x, ((0, 0), (1, 1), (1, 1), (0, 0)))
        acc = jnp.zeros((N, H, W, cp), jnp.float32)
        for t in range(9):
            dy, dx = t // 3, t % 3
            patch = xp[:, dy:dy + H, dx:dx + W, :].astype(jnp.bfloat16)
            acc = acc + jnp.dot(patch.reshape(-1, patch.shape[-1]), w_taps[t],
                                preferred_element_type=jnp.float32
                                ).reshape(N, H, W, cp)
        pooled = jnp.max(acc.reshape(N, H // 2, 2, W // 2, 2, cp), axis=(2, 4))
        return jnp.maximum(pooled + b.reshape(1, 1, 1, -1), 0.0)

    x = jnp.transpose(x_nchw, (0, 2, 3, 1))
    x = conv_block(x, qp["conv1_w"], qp["conv1_b"])
    x = conv_block(x, qp["conv2_w"], qp["conv2_b"])
    feat = jnp.transpose(x[..., :32], (0, 3, 1, 2)).reshape(x.shape[0], -1)
    h = jnp.maximum(jnp.dot(feat.astype(jnp.bfloat16), qp["fc1_w"],
                            preferred_element_type=jnp.float32) + qp["fc1_b"], 0.0)
    h = jnp.maximum(jnp.dot(h.astype(jnp.bfloat16), qp["fc2_w"],
                            preferred_element_type=jnp.float32) + qp["fc2_b"], 0.0)
    y = jnp.dot(h.astype(jnp.bfloat16), qp["fc3_w"],
                preferred_element_type=jnp.float32) + qp["fc3_b"]
    return y[:, :num_classes]


if __name__ == "__main__":
    key = jax.random.PRNGKey(0)
    k_params, k_x = jax.random.split(key)
    params = init_params(k_params)
    qparams = prepare_params(params)
    x = jax.random.normal(k_x, (2, 3, 16, 16), jnp.float32)      # NCHW input

    fwd = jax.jit(vgg_forward)
    out = jax.block_until_ready(fwd(x, qparams))

    assert out.shape == (2, 10), out.shape
    assert bool(jnp.all(jnp.isfinite(out)))
    ref = _reference_forward(x, qparams)
    assert bool(jnp.allclose(out, ref, atol=2e-2, rtol=2e-2)), (
        "max abs diff vs reference: %f" % float(jnp.max(jnp.abs(out - ref))))
    print("KERNEL_OK")
</pallas_src>

<mosaic_0001>
module attributes {stable_mosaic.version = 11 : i64} {
  func.func @_conv3x3_relu_pool_kernel(%arg0: i32, %arg1: memref<1x18x18x3xf32, #tpu.memory_space<vmem>>, %arg2: memref<9x3x128xbf16, #tpu.memory_space<vmem>>, %arg3: memref<1x128xf32, #tpu.memory_space<vmem>>, %arg4: memref<1x8x8x128xf32, #tpu.memory_space<vmem>>, %arg5: memref<16x16x128xf32, #tpu.memory_space<vmem>>) attributes {dimension_semantics = [#tpu.dimension_semantics<parallel>], iteration_bounds = array<i64: 2>, scalar_prefetch = 0 : i64, scratch_operands = 1 : i64, tpu.core_type = #tpu.core_type<tc>, window_params = [{transform_indices = @transform_0, window_bounds = array<i64: 1, 18, 18, 3>}, {pipeline_mode = #tpu.pipeline_mode<synchronous>, transform_indices = @transform_1, window_bounds = array<i64: 9, 3, 128>}, {pipeline_mode = #tpu.pipeline_mode<synchronous>, transform_indices = @transform_2, window_bounds = array<i64: 1, 128>}, {transform_indices = @transform_3, window_bounds = array<i64: 1, 8, 8, 128>}]} {
    %c0 = arith.constant 0 : index
    %c0_0 = arith.constant 0 : index
    %c0_1 = arith.constant 0 : index
    %c0_2 = arith.constant 0 : index
    %0 = vector.load %arg1[%c0, %c0_0, %c0_1, %c0_2] : memref<1x18x18x3xf32, #tpu.memory_space<vmem>>, vector<1x16x16x3xf32>
    %1 = vector.shape_cast %0 : vector<1x16x16x3xf32> to vector<16x16x3xf32>
    %2 = vector.shape_cast %1 : vector<16x16x3xf32> to vector<256x3xf32>
    %3 = arith.truncf %2 : vector<256x3xf32> to vector<256x3xbf16>
    %c0_3 = arith.constant 0 : index
    %c0_4 = arith.constant 0 : index
    %c0_5 = arith.constant 0 : index
    %4 = vector.load %arg2[%c0_3, %c0_4, %c0_5] : memref<9x3x128xbf16, #tpu.memory_space<vmem>>, vector<1x3x128xbf16>
    %5 = vector.shape_cast %4 : vector<1x3x128xbf16> to vector<3x128xbf16>
    %cst = arith.constant dense<0.000000e+00> : vector<256x128xf32>
    %6 = tpu.matmul %3, %5, %cst {dimension_numbers = #tpu.dot_dimension_numbers<[1], [0], [0], [1], [0, 0, 1, 1], [], []>} : vector<256x3xbf16>, vector<3x128xbf16>, vector<256x128xf32> -> vector<256x128xf32>
    %7 = vector.shape_cast %6 : vector<256x128xf32> to vector<16x16x128xf32>
    %c0_6 = arith.constant 0 : index
    %c0_7 = arith.constant 0 : index
    %c0_8 = arith.constant 0 : index
    %8 = vector.load %arg5[%c0_6, %c0_7, %c0_8] : memref<16x16x128xf32, #tpu.memory_space<vmem>>, vector<16x16x128xf32>
    tpu.vector_store %arg5[%c0_6, %c0_7, %c0_8], %7 {strides = array<i32>} : memref<16x16x128xf32, #tpu.memory_space<vmem>>, vector<16x16x128xf32>,
    %c0_9 = arith.constant 0 : index
    %c0_10 = arith.constant 0 : index
    %c1 = arith.constant 1 : index
    %c0_11 = arith.constant 0 : index
    %9 = vector.load %arg1[%c0_9, %c0_10, %c1, %c0_11] : memref<1x18x18x3xf32, #tpu.memory_space<vmem>>, vector<1x16x16x3xf32>
    %10 = vector.shape_cast %9 : vector<1x16x16x3xf32> to vector<16x16x3xf32>
    %11 = vector.shape_cast %10 : vector<16x16x3xf32> to vector<256x3xf32>
    %12 = arith.truncf %11 : vector<256x3xf32> to vector<256x3xbf16>
    %c1_12 = arith.constant 1 : index
    %c0_13 = arith.constant 0 : index
    %c0_14 = arith.constant 0 : index
    %13 = vector.load %arg2[%c1_12, %c0_13, %c0_14] : memref<9x3x128xbf16, #tpu.memory_space<vmem>>, vector<1x3x128xbf16>
    %14 = vector.shape_cast %13 : vector<1x3x128xbf16> to vector<3x128xbf16>
    %cst_15 = arith.constant dense<0.000000e+00> : vector<256x128xf32>
    %15 = tpu.matmul %12, %14, %cst_15 {dimension_numbers = #tpu.dot_dimension_numbers<[1], [0], [0], [1], [0, 0, 1, 1], [], []>} : vector<256x3xbf16>, vector<3x128xbf16>, vector<256x128xf32> -> vector<256x128xf32>
    %16 = vector.shape_cast %15 : vector<256x128xf32> to vector<16x16x128xf32>
    %c0_16 = arith.constant 0 : index
    %c0_17 = arith.constant 0 : index
    %c0_18 = arith.constant 0 : index
    %17 = vector.load %arg5[%c0_16, %c0_17, %c0_18] : memref<16x16x128xf32, #tpu.memory_space<vmem>>, vector<16x16x128xf32>
    %18 = arith.addf %17, %16 : vector<16x16x128xf32>
    %c0_19 = arith.constant 0 : index
    %c0_20 = arith.constant 0 : index
    %c0_21 = arith.constant 0 : index
    %19 = vector.load %arg5[%c0_19, %c0_20, %c0_21] : memref<16x16x128xf32, #tpu.memory_space<vmem>>, vector<16x16x128xf32>
    tpu.vector_store %arg5[%c0_19, %c0_20, %c0_21], %18 {strides = array<i32>} : memref<16x16x128xf32, #tpu.memory_space<vmem>>, vector<16x16x128xf32>,
    %c0_22 = arith.constant 0 : index
    %c0_23 = arith.constant 0 : index
    %c2 = arith.constant 2 : index
    %c0_24 = arith.constant 0 : index
    %20 = vector.load %arg1[%c0_22, %c0_23, %c2, %c0_24] : memref<1x18x18x3xf32, #tpu.memory_space<vmem>>, vector<1x16x16x3xf32>
    %21 = vector.shape_cast %20 : vector<1x16x16x3xf32> to vector<16x16x3xf32>
    %22 = vector.shape_cast %21 : vector<16x16x3xf32> to vector<256x3xf32>
    %23 = arith.truncf %22 : vector<256x3xf32> to vector<256x3xbf16>
    %c2_25 = arith.constant 2 : index
    %c0_26 = arith.constant 0 : index
    %c0_27 = arith.constant 0 : index
    %24 = vector.load %arg2[%c2_25, %c0_26, %c0_27] : memref<9x3x128xbf16, #tpu.memory_space<vmem>>, vector<1x3x128xbf16>
    %25 = vector.shape_cast %24 : vector<1x3x128xbf16> to vector<3x128xbf16>
    %cst_28 = arith.constant dense<0.000000e+00> : vector<256x128xf32>
    %26 = tpu.matmul %23, %25, %cst_28 {dimension_numbers = #tpu.dot_dimension_numbers<[1], [0], [0], [1], [0, 0, 1, 1], [], []>} : vector<256x3xbf16>, vector<3x128xbf16>, vector<256x128xf32> -> vector<256x128xf32>
    %27 = vector.shape_cast %26 : vector<256x128xf32> to vector<16x16x128xf32>
    %c0_29 = arith.constant 0 : index
    %c0_30 = arith.constant 0 : index
    %c0_31 = arith.constant 0 : index
    %28 = vector.load %arg5[%c0_29, %c0_30, %c0_31] : memref<16x16x128xf32, #tpu.memory_space<vmem>>, vector<16x16x128xf32>
    %29 = arith.addf %28, %27 : vector<16x16x128xf32>
    %c0_32 = arith.constant 0 : index
    %c0_33 = arith.constant 0 : index
    %c0_34 = arith.constant 0 : index
    %30 = vector.load %arg5[%c0_32, %c0_33, %c0_34] : memref<16x16x128xf32, #tpu.memory_space<vmem>>, vector<16x16x128xf32>
    tpu.vector_store %arg5[%c0_32, %c0_33, %c0_34], %29 {strides = array<i32>} : memref<16x16x128xf32, #tpu.memory_space<vmem>>, vector<16x16x128xf32>,
    %c0_35 = arith.constant 0 : index
    %c1_36 = arith.constant 1 : index
    %c0_37 = arith.constant 0 : index
    %c0_38 = arith.constant 0 : index
    %31 = vector.load %arg1[%c0_35, %c1_36, %c0_37, %c0_38] : memref<1x18x18x3xf32, #tpu.memory_space<vmem>>, vector<1x16x16x3xf32>
    %32 = vector.shape_cast %31 : vector<1x16x16x3xf32> to vector<16x16x3xf32>
    %33 = vector.shape_cast %32 : vector<16x16x3xf32> to vector<256x3xf32>
    %34 = arith.truncf %33 : vector<256x3xf32> to vector<256x3xbf16>
    %c3 = arith.constant 3 : index
    %c0_39 = arith.constant 0 : index
    %c0_40 = arith.constant 0 : index
    %35 = vector.load %arg2[%c3, %c0_39, %c0_40] : memref<9x3x128xbf16, #tpu.memory_space<vmem>>, vector<1x3x128xbf16>
    %36 = vector.shape_cast %35 : vector<1x3x128xbf16> to vector<3x128xbf16>
    %cst_41 = arith.constant dense<0.000000e+00> : vector<256x128xf32>
    %37 = tpu.matmul %34, %36, %cst_41 {dimension_numbers = #tpu.dot_dimension_numbers<[1], [0], [0], [1], [0, 0, 1, 1], [], []>} : vector<256x3xbf16>, vector<3x128xbf16>, vector<256x128xf32> -> vector<256x128xf32>
    %38 = vector.shape_cast %37 : vector<256x128xf32> to vector<16x16x128xf32>
    %c0_42 = arith.constant 0 : index
    %c0_43 = arith.constant 0 : index
    %c0_44 = arith.constant 0 : index
    %39 = vector.load %arg5[%c0_42, %c0_43, %c0_44] : memref<16x16x128xf32, #tpu.memory_space<vmem>>, vector<16x16x128xf32>
    %40 = arith.addf %39, %38 : vector<16x16x128xf32>
    %c0_45 = arith.constant 0 : index
    %c0_46 = arith.constant 0 : index
    %c0_47 = arith.constant 0 : index
    %41 = vector.load %arg5[%c0_45, %c0_46, %c0_47] : memref<16x16x128xf32, #tpu.memory_space<vmem>>, vector<16x16x128xf32>
    tpu.vector_store %arg5[%c0_45, %c0_46, %c0_47], %40 {strides = array<i32>} : memref<16x16x128xf32, #tpu.memory_space<vmem>>, vector<16x16x128xf32>,
    %c0_48 = arith.constant 0 : index
    %c1_49 = arith.constant 1 : index
    %c1_50 = arith.constant 1 : index
    %c0_51 = arith.constant 0 : index
    %42 = vector.load %arg1[%c0_48, %c1_49, %c1_50, %c0_51] : memref<1x18x18x3xf32, #tpu.memory_space<vmem>>, vector<1x16x16x3xf32>
    %43 = vector.shape_cast %42 : vector<1x16x16x3xf32> to vector<16x16x3xf32>
    %44 = vector.shape_cast %43 : vector<16x16x3xf32> to vector<256x3xf32>
    %45 = arith.truncf %44 : vector<256x3xf32> to vector<256x3xbf16>
    %c4 = arith.constant 4 : index
    %c0_52 = arith.constant 0 : index
    %c0_53 = arith.constant 0 : index
    %46 = vector.load %arg2[%c4, %c0_52, %c0_53] : memref<9x3x128xbf16, #tpu.memory_space<vmem>>, vector<1x3x128xbf16>
    %47 = vector.shape_cast %46 : vector<1x3x128xbf16> to vector<3x128xbf16>
    %cst_54 = arith.constant dense<0.000000e+00> : vector<256x128xf32>
    %48 = tpu.matmul %45, %47, %cst_54 {dimension_numbers = #tpu.dot_dimension_numbers<[1], [0], [0], [1], [0, 0, 1, 1], [], []>} : vector<256x3xbf16>, vector<3x128xbf16>, vector<256x128xf32> -> vector<256x128xf32>
    %49 = vector.shape_cast %48 : vector<256x128xf32> to vector<16x16x128xf32>
    %c0_55 = arith.constant 0 : index
    %c0_56 = arith.constant 0 : index
    %c0_57 = arith.constant 0 : index
    %50 = vector.load %arg5[%c0_55, %c0_56, %c0_57] : memref<16x16x128xf32, #tpu.memory_space<vmem>>, vector<16x16x128xf32>
    %51 = arith.addf %50, %49 : vector<16x16x128xf32>
    %c0_58 = arith.constant 0 : index
    %c0_59 = arith.constant 0 : index
    %c0_60 = arith.constant 0 : index
    %52 = vector.load %arg5[%c0_58, %c0_59, %c0_60] : memref<16x16x128xf32, #tpu.memory_space<vmem>>, vector<16x16x128xf32>
    tpu.vector_store %arg5[%c0_58, %c0_59, %c0_60], %51 {strides = array<i32>} : memref<16x16x128xf32, #tpu.memory_space<vmem>>, vector<16x16x128xf32>,
    %c0_61 = arith.constant 0 : index
    %c1_62 = arith.constant 1 : index
    %c2_63 = arith.constant 2 : index
    %c0_64 = arith.constant 0 : index
    %53 = vector.load %arg1[%c0_61, %c1_62, %c2_63, %c0_64] : memref<1x18x18x3xf32, #tpu.memory_space<vmem>>, vector<1x16x16x3xf32>
    %54 = vector.shape_cast %53 : vector<1x16x16x3xf32> to vector<16x16x3xf32>
    %55 = vector.shape_cast %54 : vector<16x16x3xf32> to vector<256x3xf32>
    %56 = arith.truncf %55 : vector<256x3xf32> to vector<256x3xbf16>
    %c5 = arith.constant 5 : index
    %c0_65 = arith.constant 0 : index
    %c0_66 = arith.constant 0 : index
    %57 = vector.load %arg2[%c5, %c0_65, %c0_66] : memref<9x3x128xbf16, #tpu.memory_space<vmem>>, vector<1x3x128xbf16>
    %58 = vector.shape_cast %57 : vector<1x3x128xbf16> to vector<3x128xbf16>
    %cst_67 = arith.constant dense<0.000000e+00> : vector<256x128xf32>
    %59 = tpu.matmul %56, %58, %cst_67 {dimension_numbers = #tpu.dot_dimension_numbers<[1], [0], [0], [1], [0, 0, 1, 1], [], []>} : vector<256x3xbf16>, vector<3x128xbf16>, vector<256x128xf32> -> vector<256x128xf32>
    %60 = vector.shape_cast %59 : vector<256x128xf32> to vector<16x16x128xf32>
    %c0_68 = arith.constant 0 : index
    %c0_69 = arith.constant 0 : index
    %c0_70 = arith.constant 0 : index
    %61 = vector.load %arg5[%c0_68, %c0_69, %c0_70] : memref<16x16x128xf32, #tpu.memory_space<vmem>>, vector<16x16x128xf32>
    %62 = arith.addf %61, %60 : vector<16x16x128xf32>
    %c0_71 = arith.constant 0 : index
    %c0_72 = arith.constant 0 : index
    %c0_73 = arith.constant 0 : index
    %63 = vector.load %arg5[%c0_71, %c0_72, %c0_73] : memref<16x16x128xf32, #tpu.memory_space<vmem>>, vector<16x16x128xf32>
    tpu.vector_store %arg5[%c0_71, %c0_72, %c0_73], %62 {strides = array<i32>} : memref<16x16x128xf32, #tpu.memory_space<vmem>>, vector<16x16x128xf32>,
    %c0_74 = arith.constant 0 : index
    %c2_75 = arith.constant 2 : index
    %c0_76 = arith.constant 0 : index
    %c0_77 = arith.constant 0 : index
    %64 = vector.load %arg1[%c0_74, %c2_75, %c0_76, %c0_77] : memref<1x18x18x3xf32, #tpu.memory_space<vmem>>, vector<1x16x16x3xf32>
    %65 = vector.shape_cast %64 : vector<1x16x16x3xf32> to vector<16x16x3xf32>
    %66 = vector.shape_cast %65 : vector<16x16x3xf32> to vector<256x3xf32>
    %67 = arith.truncf %66 : vector<256x3xf32> to vector<256x3xbf16>
    %c6 = arith.constant 6 : index
    %c0_78 = arith.constant 0 : index
    %c0_79 = arith.constant 0 : index
    %68 = vector.load %arg2[%c6, %c0_78, %c0_79] : memref<9x3x128xbf16, #tpu.memory_space<vmem>>, vector<1x3x128xbf16>
    %69 = vector.shape_cast %68 : vector<1x3x128xbf16> to vector<3x128xbf16>
    %cst_80 = arith.constant dense<0.000000e+00> : vector<256x128xf32>
    %70 = tpu.matmul %67, %69, %cst_80 {dimension_numbers = #tpu.dot_dimension_numbers<[1], [0], [0], [1], [0, 0, 1, 1], [], []>} : vector<256x3xbf16>, vector<3x128xbf16>, vector<256x128xf32> -> vector<256x128xf32>
    %71 = vector.shape_cast %70 : vector<256x128xf32> to vector<16x16x128xf32>
    %c0_81 = arith.constant 0 : index
    %c0_82 = arith.constant 0 : index
    %c0_83 = arith.constant 0 : index
    %72 = vector.load %arg5[%c0_81, %c0_82, %c0_83] : memref<16x16x128xf32, #tpu.memory_space<vmem>>, vector<16x16x128xf32>
    %73 = arith.addf %72, %71 : vector<16x16x128xf32>
    %c0_84 = arith.constant 0 : index
    %c0_85 = arith.constant 0 : index
    %c0_86 = arith.constant 0 : index
    %74 = vector.load %arg5[%c0_84, %c0_85, %c0_86] : memref<16x16x128xf32, #tpu.memory_space<vmem>>, vector<16x16x128xf32>
    tpu.vector_store %arg5[%c0_84, %c0_85, %c0_86], %73 {strides = array<i32>} : memref<16x16x128xf32, #tpu.memory_space<vmem>>, vector<16x16x128xf32>,
    %c0_87 = arith.constant 0 : index
    %c2_88 = arith.constant 2 : index
    %c1_89 = arith.constant 1 : index
    %c0_90 = arith.constant 0 : index
    %75 = vector.load %arg1[%c0_87, %c2_88, %c1_89, %c0_90] : memref<1x18x18x3xf32, #tpu.memory_space<vmem>>, vector<1x16x16x3xf32>
    %76 = vector.shape_cast %75 : vector<1x16x16x3xf32> to vector<16x16x3xf32>
    %77 = vector.shape_cast %76 : vector<16x16x3xf32> to vector<256x3xf32>
    %78 = arith.truncf %77 : vector<256x3xf32> to vector<256x3xbf16>
    %c7 = arith.constant 7 : index
    %c0_91 = arith.constant 0 : index
    %c0_92 = arith.constant 0 : index
    %79 = vector.load %arg2[%c7, %c0_91, %c0_92] : memref<9x3x128xbf16, #tpu.memory_space<vmem>>, vector<1x3x128xbf16>
    %80 = vector.shape_cast %79 : vector<1x3x128xbf16> to vector<3x128xbf16>
    %cst_93 = arith.constant dense<0.000000e+00> : vector<256x128xf32>
    %81 = tpu.matmul %78, %80, %cst_93 {dimension_numbers = #tpu.dot_dimension_numbers<[1], [0], [0], [1], [0, 0, 1, 1], [], []>} : vector<256x3xbf16>, vector<3x128xbf16>, vector<256x128xf32> -> vector<256x128xf32>
    %82 = vector.shape_cast %81 : vector<256x128xf32> to vector<16x16x128xf32>
    %c0_94 = arith.constant 0 : index
    %c0_95 = arith.constant 0 : index
    %c0_96 = arith.constant 0 : index
    %83 = vector.load %arg5[%c0_94, %c0_95, %c0_96] : memref<16x16x128xf32, #tpu.memory_space<vmem>>, vector<16x16x128xf32>
    %84 = arith.addf %83, %82 : vector<16x16x128xf32>
    %c0_97 = arith.constant 0 : index
    %c0_98 = arith.constant 0 : index
    %c0_99 = arith.constant 0 : index
    %85 = vector.load %arg5[%c0_97, %c0_98, %c0_99] : memref<16x16x128xf32, #tpu.memory_space<vmem>>, vector<16x16x128xf32>
    tpu.vector_store %arg5[%c0_97, %c0_98, %c0_99], %84 {strides = array<i32>} : memref<16x16x128xf32, #tpu.memory_space<vmem>>, vector<16x16x128xf32>,
    %c0_100 = arith.constant 0 : index
    %c2_101 = arith.constant 2 : index
    %c2_102 = arith.constant 2 : index
    %c0_103 = arith.constant 0 : index
    %86 = vector.load %arg1[%c0_100, %c2_101, %c2_102, %c0_103] : memref<1x18x18x3xf32, #tpu.memory_space<vmem>>, vector<1x16x16x3xf32>
    %87 = vector.shape_cast %86 : vector<1x16x16x3xf32> to vector<16x16x3xf32>
    %88 = vector.shape_cast %87 : vector<16x16x3xf32> to vector<256x3xf32>
    %89 = arith.truncf %88 : vector<256x3xf32> to vector<256x3xbf16>
    %c8 = arith.constant 8 : index
    %c0_104 = arith.constant 0 : index
    %c0_105 = arith.constant 0 : index
    %90 = vector.load %arg2[%c8, %c0_104, %c0_105] : memref<9x3x128xbf16, #tpu.memory_space<vmem>>, vector<1x3x128xbf16>
    %91 = vector.shape_cast %90 : vector<1x3x128xbf16> to vector<3x128xbf16>
    %cst_106 = arith.constant dense<0.000000e+00> : vector<256x128xf32>
    %92 = tpu.matmul %89, %91, %cst_106 {dimension_numbers = #tpu.dot_dimension_numbers<[1], [0], [0], [1], [0, 0, 1, 1], [], []>} : vector<256x3xbf16>, vector<3x128xbf16>, vector<256x128xf32> -> vector<256x128xf32>
    %93 = vector.shape_cast %92 : vector<256x128xf32> to vector<16x16x128xf32>
    %c0_107 = arith.constant 0 : index
    %c0_108 = arith.constant 0 : index
    %c0_109 = arith.constant 0 : index
    %94 = vector.load %arg5[%c0_107, %c0_108, %c0_109] : memref<16x16x128xf32, #tpu.memory_space<vmem>>, vector<16x16x128xf32>
    %95 = arith.addf %94, %93 : vector<16x16x128xf32>
    %c0_110 = arith.constant 0 : index
    %c0_111 = arith.constant 0 : index
    %c0_112 = arith.constant 0 : index
    %96 = vector.load %arg5[%c0_110, %c0_111, %c0_112] : memref<16x16x128xf32, #tpu.memory_space<vmem>>, vector<16x16x128xf32>
    tpu.vector_store %arg5[%c0_110, %c0_111, %c0_112], %95 {strides = array<i32>} : memref<16x16x128xf32, #tpu.memory_space<vmem>>, vector<16x16x128xf32>,
    %c0_113 = arith.constant 0 : index
    %c0_114 = arith.constant 0 : index
    %c0_115 = arith.constant 0 : index
    %97 = tpu.strided_load %arg5[%c0_113, %c0_114, %c0_115] {strides = array<i32: 1, 2, 1>} : memref<16x16x128xf32, #tpu.memory_space<vmem>>, vector<16x8x128xf32>
    %c0_116 = arith.constant 0 : index
    %c1_117 = arith.constant 1 : index
    %c0_118 = arith.constant 0 : index
    %98 = tpu.strided_load %arg5[%c0_116, %c1_117, %c0_118] {strides = array<i32: 1, 2, 1>} : memref<16x16x128xf32, #tpu.memory_space<vmem>>, vector<16x8x128xf32>
    %99 = arith.maximumf %97, %98 : vector<16x8x128xf32>
    %100 = vector.shape_cast %99 : vector<16x8x128xf32> to vector<8x2x8x128xf32>
    %cst_119 = arith.constant dense<0xFF800000> : vector<8x8x128xf32>
    %101 = vector.multi_reduction <maximumf>, %100, %cst_119 [1] : vector<8x2x8x128xf32> to vector<8x8x128xf32>
    %c0_120 = arith.constant 0 : index
    %c0_121 = arith.constant 0 : index
    %102 = vector.load %arg3[%c0_120, %c0_121] : memref<1x128xf32, #tpu.memory_space<vmem>>, vector<1x128xf32>
    %103 = vector.shape_cast %102 : vector<1x128xf32> to vector<1x1x128xf32>
    %104 = vector.broadcast %103 : vector<1x1x128xf32> to vector<8x8x128xf32>
    %105 = arith.addf %101, %104 : vector<8x8x128xf32>
    %cst_122 = arith.constant 0.000000e+00 : f32
    %106 = vector.broadcast %cst_122 : f32 to vector<8x8x128xf32>
    %107 = arith.maximumf %105, %106 : vector<8x8x128xf32>
    %c0_123 = arith.constant 0 : index
    %c0_124 = arith.constant 0 : index
    %c0_125 = arith.constant 0 : index
    %c0_126 = arith.constant 0 : index
    %108 = vector.load %arg4[%c0_123, %c0_124, %c0_125, %c0_126] : memref<1x8x8x128xf32, #tpu.memory_space<vmem>>, vector<1x8x8x128xf32>
    %109 = vector.shape_cast %108 : vector<1x8x8x128xf32> to vector<8x8x128xf32>
    %110 = vector.shape_cast %107 : vector<8x8x128xf32> to vector<1x8x8x128xf32>
    tpu.vector_store %arg4[%c0_123, %c0_124, %c0_125, %c0_126], %110 {strides = array<i32>} : memref<1x8x8x128xf32, #tpu.memory_space<vmem>>, vector<1x8x8x128xf32>,
    return
  }
  func.func @transform_0(%arg0: i32) -> (i32, i32, i32, i32) {
    %c0_i32 = arith.constant 0 : i32
    %c0_i32_0 = arith.constant 0 : i32
    %c0_i32_1 = arith.constant 0 : i32
    %c0_i32_2 = arith.constant 0 : i32
    return %arg0, %c0_i32, %c0_i32_0, %c0_i32_1 : i32, i32, i32, i32
  }
  func.func @transform_1(%arg0: i32) -> (i32, i32, i32) {
    %c0_i32 = arith.constant 0 : i32
    %c0_i32_0 = arith.constant 0 : i32
    %c0_i32_1 = arith.constant 0 : i32
    %c0_i32_2 = arith.constant 0 : i32
    return %c0_i32, %c0_i32_0, %c0_i32_1 : i32, i32, i32
  }
  func.func @transform_2(%arg0: i32) -> (i32, i32) {
    %c0_i32 = arith.constant 0 : i32
    %c0_i32_0 = arith.constant 0 : i32
    %c0_i32_1 = arith.constant 0 : i32
    return %c0_i32, %c0_i32_0 : i32, i32
  }
  func.func @transform_3(%arg0: i32) -> (i32, i32, i32, i32) {
    %c0_i32 = arith.constant 0 : i32
    %c0_i32_0 = arith.constant 0 : i32
    %c0_i32_1 = arith.constant 0 : i32
    %c0_i32_2 = arith.constant 0 : i32
    return %arg0, %c0_i32, %c0_i32_0, %c0_i32_1 : i32, i32, i32, i32
  }
}

module attributes {stable_mosaic.version = 11 : i64} {
  func.func @_conv3x3_relu_pool_kernel(%arg0: i32, %arg1: memref<1x10x10x128xf32, #tpu.memory_space<vmem>>, %arg2: memref<9x128x128xbf16, #tpu.memory_space<vmem>>, %arg3: memref<1x128xf32, #tpu.memory_space<vmem>>, %arg4: memref<1x4x4x128xf32, #tpu.memory_space<vmem>>, %arg5: memref<8x8x128xf32, #tpu.memory_space<vmem>>) attributes {dimension_semantics = [#tpu.dimension_semantics<parallel>], iteration_bounds = array<i64: 2>, scalar_prefetch = 0 : i64, scratch_operands = 1 : i64, tpu.core_type = #tpu.core_type<tc>, window_params = [{transform_indices = @transform_0, window_bounds = array<i64: 1, 10, 10, 128>}, {pipeline_mode = #tpu.pipeline_mode<synchronous>, transform_indices = @transform_1, window_bounds = array<i64: 9, 128, 128>}, {pipeline_mode = #tpu.pipeline_mode<synchronous>, transform_indices = @transform_2, window_bounds = array<i64: 1, 128>}, {transform_indices = @transform_3, window_bounds = array<i64: 1, 4, 4, 128>}]} {
    %c0 = arith.constant 0 : index
    %c0_0 = arith.constant 0 : index
    %c0_1 = arith.constant 0 : index
    %c0_2 = arith.constant 0 : index
    %0 = vector.load %arg1[%c0, %c0_0, %c0_1, %c0_2] : memref<1x10x10x128xf32, #tpu.memory_space<vmem>>, vector<1x8x8x128xf32>
    %1 = vector.shape_cast %0 : vector<1x8x8x128xf32> to vector<8x8x128xf32>
    %2 = vector.shape_cast %1 : vector<8x8x128xf32> to vector<64x128xf32>
    %3 = arith.truncf %2 : vector<64x128xf32> to vector<64x128xbf16>
    %c0_3 = arith.constant 0 : index
    %c0_4 = arith.constant 0 : index
    %c0_5 = arith.constant 0 : index
    %4 = vector.load %arg2[%c0_3, %c0_4, %c0_5] : memref<9x128x128xbf16, #tpu.memory_space<vmem>>, vector<1x128x128xbf16>
    %5 = vector.shape_cast %4 : vector<1x128x128xbf16> to vector<128x128xbf16>
    %cst = arith.constant dense<0.000000e+00> : vector<64x128xf32>
    %6 = tpu.matmul %3, %5, %cst {dimension_numbers = #tpu.dot_dimension_numbers<[1], [0], [0], [1], [0, 0, 1, 1], [], []>} : vector<64x128xbf16>, vector<128x128xbf16>, vector<64x128xf32> -> vector<64x128xf32>
    %7 = vector.shape_cast %6 : vector<64x128xf32> to vector<8x8x128xf32>
    %c0_6 = arith.constant 0 : index
    %c0_7 = arith.constant 0 : index
    %c0_8 = arith.constant 0 : index
    %8 = vector.load %arg5[%c0_6, %c0_7, %c0_8] : memref<8x8x128xf32, #tpu.memory_space<vmem>>, vector<8x8x128xf32>
    tpu.vector_store %arg5[%c0_6, %c0_7, %c0_8], %7 {strides = array<i32>} : memref<8x8x128xf32, #tpu.memory_space<vmem>>, vector<8x8x128xf32>,
    %c0_9 = arith.constant 0 : index
    %c0_10 = arith.constant 0 : index
    %c1 = arith.constant 1 : index
    %c0_11 = arith.constant 0 : index
    %9 = vector.load %arg1[%c0_9, %c0_10, %c1, %c0_11] : memref<1x10x10x128xf32, #tpu.memory_space<vmem>>, vector<1x8x8x128xf32>
    %10 = vector.shape_cast %9 : vector<1x8x8x128xf32> to vector<8x8x128xf32>
    %11 = vector.shape_cast %10 : vector<8x8x128xf32> to vector<64x128xf32>
    %12 = arith.truncf %11 : vector<64x128xf32> to vector<64x128xbf16>
    %c1_12 = arith.constant 1 : index
    %c0_13 = arith.constant 0 : index
    %c0_14 = arith.constant 0 : index
    %13 = vector.load %arg2[%c1_12, %c0_13, %c0_14] : memref<9x128x128xbf16, #tpu.memory_space<vmem>>, vector<1x128x128xbf16>
    %14 = vector.shape_cast %13 : vector<1x128x128xbf16> to vector<128x128xbf16>
    %cst_15 = arith.constant dense<0.000000e+00> : vector<64x128xf32>
    %15 = tpu.matmul %12, %14, %cst_15 {dimension_numbers = #tpu.dot_dimension_numbers<[1], [0], [0], [1], [0, 0, 1, 1], [], []>} : vector<64x128xbf16>, vector<128x128xbf16>, vector<64x128xf32> -> vector<64x128xf32>
    %16 = vector.shape_cast %15 : vector<64x128xf32> to vector<8x8x128xf32>
    %c0_16 = arith.constant 0 : index
    %c0_17 = arith.constant 0 : index
    %c0_18 = arith.constant 0 : index
    %17 = vector.load %arg5[%c0_16, %c0_17, %c0_18] : memref<8x8x128xf32, #tpu.memory_space<vmem>>, vector<8x8x128xf32>
    %18 = arith.addf %17, %16 : vector<8x8x128xf32>
    %c0_19 = arith.constant 0 : index
    %c0_20 = arith.constant 0 : index
    %c0_21 = arith.constant 0 : index
    %19 = vector.load %arg5[%c0_19, %c0_20, %c0_21] : memref<8x8x128xf32, #tpu.memory_space<vmem>>, vector<8x8x128xf32>
    tpu.vector_store %arg5[%c0_19, %c0_20, %c0_21], %18 {strides = array<i32>} : memref<8x8x128xf32, #tpu.memory_space<vmem>>, vector<8x8x128xf32>,
    %c0_22 = arith.constant 0 : index
    %c0_23 = arith.constant 0 : index
    %c2 = arith.constant 2 : index
    %c0_24 = arith.constant 0 : index
    %20 = vector.load %arg1[%c0_22, %c0_23, %c2, %c0_24] : memref<1x10x10x128xf32, #tpu.memory_space<vmem>>, vector<1x8x8x128xf32>
    %21 = vector.shape_cast %20 : vector<1x8x8x128xf32> to vector<8x8x128xf32>
    %22 = vector.shape_cast %21 : vector<8x8x128xf32> to vector<64x128xf32>
    %23 = arith.truncf %22 : vector<64x128xf32> to vector<64x128xbf16>
    %c2_25 = arith.constant 2 : index
    %c0_26 = arith.constant 0 : index
    %c0_27 = arith.constant 0 : index
    %24 = vector.load %arg2[%c2_25, %c0_26, %c0_27] : memref<9x128x128xbf16, #tpu.memory_space<vmem>>, vector<1x128x128xbf16>
    %25 = vector.shape_cast %24 : vector<1x128x128xbf16> to vector<128x128xbf16>
    %cst_28 = arith.constant dense<0.000000e+00> : vector<64x128xf32>
    %26 = tpu.matmul %23, %25, %cst_28 {dimension_numbers = #tpu.dot_dimension_numbers<[1], [0], [0], [1], [0, 0, 1, 1], [], []>} : vector<64x128xbf16>, vector<128x128xbf16>, vector<64x128xf32> -> vector<64x128xf32>
    %27 = vector.shape_cast %26 : vector<64x128xf32> to vector<8x8x128xf32>
    %c0_29 = arith.constant 0 : index
    %c0_30 = arith.constant 0 : index
    %c0_31 = arith.constant 0 : index
    %28 = vector.load %arg5[%c0_29, %c0_30, %c0_31] : memref<8x8x128xf32, #tpu.memory_space<vmem>>, vector<8x8x128xf32>
    %29 = arith.addf %28, %27 : vector<8x8x128xf32>
    %c0_32 = arith.constant 0 : index
    %c0_33 = arith.constant 0 : index
    %c0_34 = arith.constant 0 : index
    %30 = vector.load %arg5[%c0_32, %c0_33, %c0_34] : memref<8x8x128xf32, #tpu.memory_space<vmem>>, vector<8x8x128xf32>
    tpu.vector_store %arg5[%c0_32, %c0_33, %c0_34], %29 {strides = array<i32>} : memref<8x8x128xf32, #tpu.memory_space<vmem>>, vector<8x8x128xf32>,
    %c0_35 = arith.constant 0 : index
    %c1_36 = arith.constant 1 : index
    %c0_37 = arith.constant 0 : index
    %c0_38 = arith.constant 0 : index
    %31 = vector.load %arg1[%c0_35, %c1_36, %c0_37, %c0_38] : memref<1x10x10x128xf32, #tpu.memory_space<vmem>>, vector<1x8x8x128xf32>
    %32 = vector.shape_cast %31 : vector<1x8x8x128xf32> to vector<8x8x128xf32>
    %33 = vector.shape_cast %32 : vector<8x8x128xf32> to vector<64x128xf32>
    %34 = arith.truncf %33 : vector<64x128xf32> to vector<64x128xbf16>
    %c3 = arith.constant 3 : index
    %c0_39 = arith.constant 0 : index
    %c0_40 = arith.constant 0 : index
    %35 = vector.load %arg2[%c3, %c0_39, %c0_40] : memref<9x128x128xbf16, #tpu.memory_space<vmem>>, vector<1x128x128xbf16>
    %36 = vector.shape_cast %35 : vector<1x128x128xbf16> to vector<128x128xbf16>
    %cst_41 = arith.constant dense<0.000000e+00> : vector<64x128xf32>
    %37 = tpu.matmul %34, %36, %cst_41 {dimension_numbers = #tpu.dot_dimension_numbers<[1], [0], [0], [1], [0, 0, 1, 1], [], []>} : vector<64x128xbf16>, vector<128x128xbf16>, vector<64x128xf32> -> vector<64x128xf32>
    %38 = vector.shape_cast %37 : vector<64x128xf32> to vector<8x8x128xf32>
    %c0_42 = arith.constant 0 : index
    %c0_43 = arith.constant 0 : index
    %c0_44 = arith.constant 0 : index
    %39 = vector.load %arg5[%c0_42, %c0_43, %c0_44] : memref<8x8x128xf32, #tpu.memory_space<vmem>>, vector<8x8x128xf32>
    %40 = arith.addf %39, %38 : vector<8x8x128xf32>
    %c0_45 = arith.constant 0 : index
    %c0_46 = arith.constant 0 : index
    %c0_47 = arith.constant 0 : index
    %41 = vector.load %arg5[%c0_45, %c0_46, %c0_47] : memref<8x8x128xf32, #tpu.memory_space<vmem>>, vector<8x8x128xf32>
    tpu.vector_store %arg5[%c0_45, %c0_46, %c0_47], %40 {strides = array<i32>} : memref<8x8x128xf32, #tpu.memory_space<vmem>>, vector<8x8x128xf32>,
    %c0_48 = arith.constant 0 : index
    %c1_49 = arith.constant 1 : index
    %c1_50 = arith.constant 1 : index
    %c0_51 = arith.constant 0 : index
    %42 = vector.load %arg1[%c0_48, %c1_49, %c1_50, %c0_51] : memref<1x10x10x128xf32, #tpu.memory_space<vmem>>, vector<1x8x8x128xf32>
    %43 = vector.shape_cast %42 : vector<1x8x8x128xf32> to vector<8x8x128xf32>
    %44 = vector.shape_cast %43 : vector<8x8x128xf32> to vector<64x128xf32>
    %45 = arith.truncf %44 : vector<64x128xf32> to vector<64x128xbf16>
    %c4 = arith.constant 4 : index
    %c0_52 = arith.constant 0 : index
    %c0_53 = arith.constant 0 : index
    %46 = vector.load %arg2[%c4, %c0_52, %c0_53] : memref<9x128x128xbf16, #tpu.memory_space<vmem>>, vector<1x128x128xbf16>
    %47 = vector.shape_cast %46 : vector<1x128x128xbf16> to vector<128x128xbf16>
    %cst_54 = arith.constant dense<0.000000e+00> : vector<64x128xf32>
    %48 = tpu.matmul %45, %47, %cst_54 {dimension_numbers = #tpu.dot_dimension_numbers<[1], [0], [0], [1], [0, 0, 1, 1], [], []>} : vector<64x128xbf16>, vector<128x128xbf16>, vector<64x128xf32> -> vector<64x128xf32>
    %49 = vector.shape_cast %48 : vector<64x128xf32> to vector<8x8x128xf32>
    %c0_55 = arith.constant 0 : index
    %c0_56 = arith.constant 0 : index
    %c0_57 = arith.constant 0 : index
    %50 = vector.load %arg5[%c0_55, %c0_56, %c0_57] : memref<8x8x128xf32, #tpu.memory_space<vmem>>, vector<8x8x128xf32>
    %51 = arith.addf %50, %49 : vector<8x8x128xf32>
    %c0_58 = arith.constant 0 : index
    %c0_59 = arith.constant 0 : index
    %c0_60 = arith.constant 0 : index
    %52 = vector.load %arg5[%c0_58, %c0_59, %c0_60] : memref<8x8x128xf32, #tpu.memory_space<vmem>>, vector<8x8x128xf32>
    tpu.vector_store %arg5[%c0_58, %c0_59, %c0_60], %51 {strides = array<i32>} : memref<8x8x128xf32, #tpu.memory_space<vmem>>, vector<8x8x128xf32>,
    %c0_61 = arith.constant 0 : index
    %c1_62 = arith.constant 1 : index
    %c2_63 = arith.constant 2 : index
    %c0_64 = arith.constant 0 : index
    %53 = vector.load %arg1[%c0_61, %c1_62, %c2_63, %c0_64] : memref<1x10x10x128xf32, #tpu.memory_space<vmem>>, vector<1x8x8x128xf32>
    %54 = vector.shape_cast %53 : vector<1x8x8x128xf32> to vector<8x8x128xf32>
    %55 = vector.shape_cast %54 : vector<8x8x128xf32> to vector<64x128xf32>
    %56 = arith.truncf %55 : vector<64x128xf32> to vector<64x128xbf16>
    %c5 = arith.constant 5 : index
    %c0_65 = arith.constant 0 : index
    %c0_66 = arith.constant 0 : index
    %57 = vector.load %arg2[%c5, %c0_65, %c0_66] : memref<9x128x128xbf16, #tpu.memory_space<vmem>>, vector<1x128x128xbf16>
    %58 = vector.shape_cast %57 : vector<1x128x128xbf16> to vector<128x128xbf16>
    %cst_67 = arith.constant dense<0.000000e+00> : vector<64x128xf32>
    %59 = tpu.matmul %56, %58, %cst_67 {dimension_numbers = #tpu.dot_dimension_numbers<[1], [0], [0], [1], [0, 0, 1, 1], [], []>} : vector<64x128xbf16>, vector<128x128xbf16>, vector<64x128xf32> -> vector<64x128xf32>
    %60 = vector.shape_cast %59 : vector<64x128xf32> to vector<8x8x128xf32>
    %c0_68 = arith.constant 0 : index
    %c0_69 = arith.constant 0 : index
    %c0_70 = arith.constant 0 : index
    %61 = vector.load %arg5[%c0_68, %c0_69, %c0_70] : memref<8x8x128xf32, #tpu.memory_space<vmem>>, vector<8x8x128xf32>
    %62 = arith.addf %61, %60 : vector<8x8x128xf32>
    %c0_71 = arith.constant 0 : index
    %c0_72 = arith.constant 0 : index
    %c0_73 = arith.constant 0 : index
    %63 = vector.load %arg5[%c0_71, %c0_72, %c0_73] : memref<8x8x128xf32, #tpu.memory_space<vmem>>, vector<8x8x128xf32>
    tpu.vector_store %arg5[%c0_71, %c0_72, %c0_73], %62 {strides = array<i32>} : memref<8x8x128xf32, #tpu.memory_space<vmem>>, vector<8x8x128xf32>,
    %c0_74 = arith.constant 0 : index
    %c2_75 = arith.constant 2 : index
    %c0_76 = arith.constant 0 : index
    %c0_77 = arith.constant 0 : index
    %64 = vector.load %arg1[%c0_74, %c2_75, %c0_76, %c0_77] : memref<1x10x10x128xf32, #tpu.memory_space<vmem>>, vector<1x8x8x128xf32>
    %65 = vector.shape_cast %64 : vector<1x8x8x128xf32> to vector<8x8x128xf32>
    %66 = vector.shape_cast %65 : vector<8x8x128xf32> to vector<64x128xf32>
    %67 = arith.truncf %66 : vector<64x128xf32> to vector<64x128xbf16>
    %c6 = arith.constant 6 : index
    %c0_78 = arith.constant 0 : index
    %c0_79 = arith.constant 0 : index
    %68 = vector.load %arg2[%c6, %c0_78, %c0_79] : memref<9x128x128xbf16, #tpu.memory_space<vmem>>, vector<1x128x128xbf16>
    %69 = vector.shape_cast %68 : vector<1x128x128xbf16> to vector<128x128xbf16>
    %cst_80 = arith.constant dense<0.000000e+00> : vector<64x128xf32>
    %70 = tpu.matmul %67, %69, %cst_80 {dimension_numbers = #tpu.dot_dimension_numbers<[1], [0], [0], [1], [0, 0, 1, 1], [], []>} : vector<64x128xbf16>, vector<128x128xbf16>, vector<64x128xf32> -> vector<64x128xf32>
    %71 = vector.shape_cast %70 : vector<64x128xf32> to vector<8x8x128xf32>
    %c0_81 = arith.constant 0 : index
    %c0_82 = arith.constant 0 : index
    %c0_83 = arith.constant 0 : index
    %72 = vector.load %arg5[%c0_81, %c0_82, %c0_83] : memref<8x8x128xf32, #tpu.memory_space<vmem>>, vector<8x8x128xf32>
    %73 = arith.addf %72, %71 : vector<8x8x128xf32>
    %c0_84 = arith.constant 0 : index
    %c0_85 = arith.constant 0 : index
    %c0_86 = arith.constant 0 : index
    %74 = vector.load %arg5[%c0_84, %c0_85, %c0_86] : memref<8x8x128xf32, #tpu.memory_space<vmem>>, vector<8x8x128xf32>
    tpu.vector_store %arg5[%c0_84, %c0_85, %c0_86], %73 {strides = array<i32>} : memref<8x8x128xf32, #tpu.memory_space<vmem>>, vector<8x8x128xf32>,
    %c0_87 = arith.constant 0 : index
    %c2_88 = arith.constant 2 : index
    %c1_89 = arith.constant 1 : index
    %c0_90 = arith.constant 0 : index
    %75 = vector.load %arg1[%c0_87, %c2_88, %c1_89, %c0_90] : memref<1x10x10x128xf32, #tpu.memory_space<vmem>>, vector<1x8x8x128xf32>
    %76 = vector.shape_cast %75 : vector<1x8x8x128xf32> to vector<8x8x128xf32>
    %77 = vector.shape_cast %76 : vector<8x8x128xf32> to vector<64x128xf32>
    %78 = arith.truncf %77 : vector<64x128xf32> to vector<64x128xbf16>
    %c7 = arith.constant 7 : index
    %c0_91 = arith.constant 0 : index
    %c0_92 = arith.constant 0 : index
    %79 = vector.load %arg2[%c7, %c0_91, %c0_92] : memref<9x128x128xbf16, #tpu.memory_space<vmem>>, vector<1x128x128xbf16>
    %80 = vector.shape_cast %79 : vector<1x128x128xbf16> to vector<128x128xbf16>
    %cst_93 = arith.constant dense<0.000000e+00> : vector<64x128xf32>
    %81 = tpu.matmul %78, %80, %cst_93 {dimension_numbers = #tpu.dot_dimension_numbers<[1], [0], [0], [1], [0, 0, 1, 1], [], []>} : vector<64x128xbf16>, vector<128x128xbf16>, vector<64x128xf32> -> vector<64x128xf32>
    %82 = vector.shape_cast %81 : vector<64x128xf32> to vector<8x8x128xf32>
    %c0_94 = arith.constant 0 : index
    %c0_95 = arith.constant 0 : index
    %c0_96 = arith.constant 0 : index
    %83 = vector.load %arg5[%c0_94, %c0_95, %c0_96] : memref<8x8x128xf32, #tpu.memory_space<vmem>>, vector<8x8x128xf32>
    %84 = arith.addf %83, %82 : vector<8x8x128xf32>
    %c0_97 = arith.constant 0 : index
    %c0_98 = arith.constant 0 : index
    %c0_99 = arith.constant 0 : index
    %85 = vector.load %arg5[%c0_97, %c0_98, %c0_99] : memref<8x8x128xf32, #tpu.memory_space<vmem>>, vector<8x8x128xf32>
    tpu.vector_store %arg5[%c0_97, %c0_98, %c0_99], %84 {strides = array<i32>} : memref<8x8x128xf32, #tpu.memory_space<vmem>>, vector<8x8x128xf32>,
    %c0_100 = arith.constant 0 : index
    %c2_101 = arith.constant 2 : index
    %c2_102 = arith.constant 2 : index
    %c0_103 = arith.constant 0 : index
    %86 = vector.load %arg1[%c0_100, %c2_101, %c2_102, %c0_103] : memref<1x10x10x128xf32, #tpu.memory_space<vmem>>, vector<1x8x8x128xf32>
    %87 = vector.shape_cast %86 : vector<1x8x8x128xf32> to vector<8x8x128xf32>
    %88 = vector.shape_cast %87 : vector<8x8x128xf32> to vector<64x128xf32>
    %89 = arith.truncf %88 : vector<64x128xf32> to vector<64x128xbf16>
    %c8 = arith.constant 8 : index
    %c0_104 = arith.constant 0 : index
    %c0_105 = arith.constant 0 : index
    %90 = vector.load %arg2[%c8, %c0_104, %c0_105] : memref<9x128x128xbf16, #tpu.memory_space<vmem>>, vector<1x128x128xbf16>
    %91 = vector.shape_cast %90 : vector<1x128x128xbf16> to vector<128x128xbf16>
    %cst_106 = arith.constant dense<0.000000e+00> : vector<64x128xf32>
    %92 = tpu.matmul %89, %91, %cst_106 {dimension_numbers = #tpu.dot_dimension_numbers<[1], [0], [0], [1], [0, 0, 1, 1], [], []>} : vector<64x128xbf16>, vector<128x128xbf16>, vector<64x128xf32> -> vector<64x128xf32>
    %93 = vector.shape_cast %92 : vector<64x128xf32> to vector<8x8x128xf32>
    %c0_107 = arith.constant 0 : index
    %c0_108 = arith.constant 0 : index
    %c0_109 = arith.constant 0 : index
    %94 = vector.load %arg5[%c0_107, %c0_108, %c0_109] : memref<8x8x128xf32, #tpu.memory_space<vmem>>, vector<8x8x128xf32>
    %95 = arith.addf %94, %93 : vector<8x8x128xf32>
    %c0_110 = arith.constant 0 : index
    %c0_111 = arith.constant 0 : index
    %c0_112 = arith.constant 0 : index
    %96 = vector.load %arg5[%c0_110, %c0_111, %c0_112] : memref<8x8x128xf32, #tpu.memory_space<vmem>>, vector<8x8x128xf32>
    tpu.vector_store %arg5[%c0_110, %c0_111, %c0_112], %95 {strides = array<i32>} : memref<8x8x128xf32, #tpu.memory_space<vmem>>, vector<8x8x128xf32>,
    %c0_113 = arith.constant 0 : index
    %c0_114 = arith.constant 0 : index
    %c0_115 = arith.constant 0 : index
    %97 = tpu.strided_load %arg5[%c0_113, %c0_114, %c0_115] {strides = array<i32: 1, 2, 1>} : memref<8x8x128xf32, #tpu.memory_space<vmem>>, vector<8x4x128xf32>
    %c0_116 = arith.constant 0 : index
    %c1_117 = arith.constant 1 : index
    %c0_118 = arith.constant 0 : index
    %98 = tpu.strided_load %arg5[%c0_116, %c1_117, %c0_118] {strides = array<i32: 1, 2, 1>} : memref<8x8x128xf32, #tpu.memory_space<vmem>>, vector<8x4x128xf32>
    %99 = arith.maximumf %97, %98 : vector<8x4x128xf32>
    %100 = vector.shape_cast %99 : vector<8x4x128xf32> to vector<4x2x4x128xf32>
    %cst_119 = arith.constant dense<0xFF800000> : vector<4x4x128xf32>
    %101 = vector.multi_reduction <maximumf>, %100, %cst_119 [1] : vector<4x2x4x128xf32> to vector<4x4x128xf32>
    %c0_120 = arith.constant 0 : index
    %c0_121 = arith.constant 0 : index
    %102 = vector.load %arg3[%c0_120, %c0_121] : memref<1x128xf32, #tpu.memory_space<vmem>>, vector<1x128xf32>
    %103 = vector.shape_cast %102 : vector<1x128xf32> to vector<1x1x128xf32>
    %104 = vector.broadcast %103 : vector<1x1x128xf32> to vector<4x4x128xf32>
    %105 = arith.addf %101, %104 : vector<4x4x128xf32>
    %cst_122 = arith.constant 0.000000e+00 : f32
    %106 = vector.broadcast %cst_122 : f32 to vector<4x4x128xf32>
    %107 = arith.maximumf %105, %106 : vector<4x4x128xf32>
    %c0_123 = arith.constant 0 : index
    %c0_124 = arith.constant 0 : index
    %c0_125 = arith.constant 0 : index
    %c0_126 = arith.constant 0 : index
    %108 = vector.load %arg4[%c0_123, %c0_124, %c0_125, %c0_126] : memref<1x4x4x128xf32, #tpu.memory_space<vmem>>, vector<1x4x4x128xf32>
    %109 = vector.shape_cast %108 : vector<1x4x4x128xf32> to vector<4x4x128xf32>
    %110 = vector.shape_cast %107 : vector<4x4x128xf32> to vector<1x4x4x128xf32>
    tpu.vector_store %arg4[%c0_123, %c0_124, %c0_125, %c0_126], %110 {strides = array<i32>} : memref<1x4x4x128xf32, #tpu.memory_space<vmem>>, vector<1x4x4x128xf32>,
    return
  }
  func.func @transform_0(%arg0: i32) -> (i32, i32, i32, i32) {
    %c0_i32 = arith.constant 0 : i32
    %c0_i32_0 = arith.constant 0 : i32
    %c0_i32_1 = arith.constant 0 : i32
    %c0_i32_2 = arith.constant 0 : i32
    return %arg0, %c0_i32, %c0_i32_0, %c0_i32_1 : i32, i32, i32, i32
  }
  func.func @transform_1(%arg0: i32) -> (i32, i32, i32) {
    %c0_i32 = arith.constant 0 : i32
    %c0_i32_0 = arith.constant 0 : i32
    %c0_i32_1 = arith.constant 0 : i32
    %c0_i32_2 = arith.constant 0 : i32
    return %c0_i32, %c0_i32_0, %c0_i32_1 : i32, i32, i32
  }
  func.func @transform_2(%arg0: i32) -> (i32, i32) {
    %c0_i32 = arith.constant 0 : i32
    %c0_i32_0 = arith.constant 0 : i32
    %c0_i32_1 = arith.constant 0 : i32
    return %c0_i32, %c0_i32_0 : i32, i32
  }
  func.func @transform_3(%arg0: i32) -> (i32, i32, i32, i32) {
    %c0_i32 = arith.constant 0 : i32
    %c0_i32_0 = arith.constant 0 : i32
    %c0_i32_1 = arith.constant 0 : i32
    %c0_i32_2 = arith.constant 0 : i32
    return %arg0, %c0_i32, %c0_i32_0, %c0_i32_1 : i32, i32, i32, i32
  }
}

module attributes {stable_mosaic.version = 11 : i64} {
  func.func @_classifier_kernel(%arg0: i32, %arg1: memref<8x512xf32, #tpu.memory_space<vmem>>, %arg2: memref<512x512xbf16, #tpu.memory_space<vmem>>, %arg3: memref<1x512xf32, #tpu.memory_space<vmem>>, %arg4: memref<512x512xbf16, #tpu.memory_space<vmem>>, %arg5: memref<1x512xf32, #tpu.memory_space<vmem>>, %arg6: memref<512x128xbf16, #tpu.memory_space<vmem>>, %arg7: memref<1x128xf32, #tpu.memory_space<vmem>>, %arg8: memref<8x128xf32, #tpu.memory_space<vmem>>) attributes {dimension_semantics = [#tpu.dimension_semantics<parallel>], iteration_bounds = array<i64: 1>, scalar_prefetch = 0 : i64, scratch_operands = 0 : i64, tpu.core_type = #tpu.core_type<tc>, window_params = [{transform_indices = @transform_0, window_bounds = array<i64: 8, 512>}, {pipeline_mode = #tpu.pipeline_mode<synchronous>, transform_indices = @transform_1, window_bounds = array<i64: 512, 512>}, {pipeline_mode = #tpu.pipeline_mode<synchronous>, transform_indices = @transform_2, window_bounds = array<i64: 1, 512>}, {pipeline_mode = #tpu.pipeline_mode<synchronous>, transform_indices = @transform_3, window_bounds = array<i64: 512, 512>}, {pipeline_mode = #tpu.pipeline_mode<synchronous>, transform_indices = @transform_4, window_bounds = array<i64: 1, 512>}, {pipeline_mode = #tpu.pipeline_mode<synchronous>, transform_indices = @transform_5, window_bounds = array<i64: 512, 128>}, {pipeline_mode = #tpu.pipeline_mode<synchronous>, transform_indices = @transform_6, window_bounds = array<i64: 1, 128>}, {transform_indices = @transform_7, window_bounds = array<i64: 8, 128>}]} {
    %c0 = arith.constant 0 : index
    %c0_0 = arith.constant 0 : index
    %0 = vector.load %arg1[%c0, %c0_0] : memref<8x512xf32, #tpu.memory_space<vmem>>, vector<8x512xf32>
    %1 = arith.truncf %0 : vector<8x512xf32> to vector<8x512xbf16>
    %c0_1 = arith.constant 0 : index
    %c0_2 = arith.constant 0 : index
    %2 = vector.load %arg2[%c0_1, %c0_2] : memref<512x512xbf16, #tpu.memory_space<vmem>>, vector<512x512xbf16>
    %cst = arith.constant dense<0.000000e+00> : vector<8x512xf32>
    %3 = tpu.matmul %1, %2, %cst {dimension_numbers = #tpu.dot_dimension_numbers<[1], [0], [0], [1], [0, 0, 1, 1], [], []>} : vector<8x512xbf16>, vector<512x512xbf16>, vector<8x512xf32> -> vector<8x512xf32>
    %c0_3 = arith.constant 0 : index
    %c0_4 = arith.constant 0 : index
    %4 = vector.load %arg3[%c0_3, %c0_4] : memref<1x512xf32, #tpu.memory_space<vmem>>, vector<1x512xf32>
    %5 = vector.broadcast %4 : vector<1x512xf32> to vector<8x512xf32>
    %6 = arith.addf %3, %5 : vector<8x512xf32>
    %cst_5 = arith.constant 0.000000e+00 : f32
    %7 = vector.broadcast %cst_5 : f32 to vector<8x512xf32>
    %8 = arith.maximumf %6, %7 : vector<8x512xf32>
    %9 = arith.truncf %8 : vector<8x512xf32> to vector<8x512xbf16>
    %c0_6 = arith.constant 0 : index
    %c0_7 = arith.constant 0 : index
    %10 = vector.load %arg4[%c0_6, %c0_7] : memref<512x512xbf16, #tpu.memory_space<vmem>>, vector<512x512xbf16>
    %cst_8 = arith.constant dense<0.000000e+00> : vector<8x512xf32>
    %11 = tpu.matmul %9, %10, %cst_8 {dimension_numbers = #tpu.dot_dimension_numbers<[1], [0], [0], [1], [0, 0, 1, 1], [], []>} : vector<8x512xbf16>, vector<512x512xbf16>, vector<8x512xf32> -> vector<8x512xf32>
    %c0_9 = arith.constant 0 : index
    %c0_10 = arith.constant 0 : index
    %12 = vector.load %arg5[%c0_9, %c0_10] : memref<1x512xf32, #tpu.memory_space<vmem>>, vector<1x512xf32>
    %13 = vector.broadcast %12 : vector<1x512xf32> to vector<8x512xf32>
    %14 = arith.addf %11, %13 : vector<8x512xf32>
    %cst_11 = arith.constant 0.000000e+00 : f32
    %15 = vector.broadcast %cst_11 : f32 to vector<8x512xf32>
    %16 = arith.maximumf %14, %15 : vector<8x512xf32>
    %17 = arith.truncf %16 : vector<8x512xf32> to vector<8x512xbf16>
    %c0_12 = arith.constant 0 : index
    %c0_13 = arith.constant 0 : index
    %18 = vector.load %arg6[%c0_12, %c0_13] : memref<512x128xbf16, #tpu.memory_space<vmem>>, vector<512x128xbf16>
    %cst_14 = arith.constant dense<0.000000e+00> : vector<8x128xf32>
    %19 = tpu.matmul %17, %18, %cst_14 {dimension_numbers = #tpu.dot_dimension_numbers<[1], [0], [0], [1], [0, 0, 1, 1], [], []>} : vector<8x512xbf16>, vector<512x128xbf16>, vector<8x128xf32> -> vector<8x128xf32>
    %c0_15 = arith.constant 0 : index
    %c0_16 = arith.constant 0 : index
    %20 = vector.load %arg7[%c0_15, %c0_16] : memref<1x128xf32, #tpu.memory_space<vmem>>, vector<1x128xf32>
    %21 = vector.broadcast %20 : vector<1x128xf32> to vector<8x128xf32>
    %22 = arith.addf %19, %21 : vector<8x128xf32>
    %c0_17 = arith.constant 0 : index
    %c0_18 = arith.constant 0 : index
    %23 = vector.load %arg8[%c0_17, %c0_18] : memref<8x128xf32, #tpu.memory_space<vmem>>, vector<8x128xf32>
    tpu.vector_store %arg8[%c0_17, %c0_18], %22 {strides = array<i32>} : memref<8x128xf32, #tpu.memory_space<vmem>>, vector<8x128xf32>,
    return
  }
  func.func @transform_0(%arg0: i32) -> (i32, i32) {
    %c0_i32 = arith.constant 0 : i32
    %c0_i32_0 = arith.constant 0 : i32
    return %arg0, %c0_i32 : i32, i32
  }
  func.func @transform_1(%arg0: i32) -> (i32, i32) {
    %c0_i32 = arith.constant 0 : i32
    %c0_i32_0 = arith.constant 0 : i32
    %c0_i32_1 = arith.constant 0 : i32
    return %c0_i32, %c0_i32_0 : i32, i32
  }
  func.func @transform_2(%arg0: i32) -> (i32, i32) {
    %c0_i32 = arith.constant 0 : i32
    %c0_i32_0 = arith.constant 0 : i32
    %c0_i32_1 = arith.constant 0 : i32
    return %c0_i32, %c0_i32_0 : i32, i32
  }
  func.func @transform_3(%arg0: i32) -> (i32, i32) {
    %c0_i32 = arith.constant 0 : i32
    %c0_i32_0 = arith.constant 0 : i32
    %c0_i32_1 = arith.constant 0 : i32
    return %c0_i32, %c0_i32_0 : i32, i32
  }
  func.func @transform_4(%arg0: i32) -> (i32, i32) {
    %c0_i32 = arith.constant 0 : i32
    %c0_i32_0 = arith.constant 0 : i32
    %c0_i32_1 = arith.constant 0 : i32
    return %c0_i32, %c0_i32_0 : i32, i32
  }
  func.func @transform_5(%arg0: i32) -> (i32, i32) {
    %c0_i32 = arith.constant 0 : i32
    %c0_i32_0 = arith.constant 0 : i32
    %c0_i32_1 = arith.constant 0 : i32
    return %c0_i32, %c0_i32_0 : i32, i32
  }
  func.func @transform_6(%arg0: i32) -> (i32, i32) {
    %c0_i32 = arith.constant 0 : i32
    %c0_i32_0 = arith.constant 0 : i32
    %c0_i32_1 = arith.constant 0 : i32
    return %c0_i32, %c0_i32_0 : i32, i32
  }
  func.func @transform_7(%arg0: i32) -> (i32, i32) {
    %c0_i32 = arith.constant 0 : i32
    %c0_i32_0 = arith.constant 0 : i32
    return %arg0, %c0_i32 : i32, i32
  }
}

</mosaic_0001>

<bundles_post_ra>
// kernel: vgg_forward.4
= control target key start
LH: loop header
LB: loop body
LE: loop exit
PB: predicated region body
PF: predicated region fallthrough
CT: control target
= control target key end

     0   :  { %s2574_s12 = smov 0   ;;  %s2995_s0 = inlined_call_operand.vmem [shape: f32[2,10,10,128], index: 0, kind: input, shape index: {}]   ;;  %s2996_s1 = inlined_call_operand.vmem [shape: bf16[9,128,128], index: 1, kind: input, shape index: {}]   ;;  %s2997_s2 = inlined_call_operand.vmem [shape: f32[1,128], index: 2, kind: input, shape index: {}]   ;;  %s2998_s3 = inlined_call_operand.vmem [shape: f32[2,4,4,128], index: 3, kind: output, shape index: {}]  }
   0x1 LB: > { %s1777_s13 = sadd.s32 4294967295, %s2552_s12   ;;  %p1781_p0 = scmp.ge.s32.totalorder %s2552_s12, 1  ;;  %s2552_s12 = sphi %s2574_s12, %s13_s12  }
   0x2   : > { %p137_p1 = scmp.lt.s32.totalorder %s2552_s12, 3 }
   0x4   : > { %p138_p2 = pnand %p1781_p0, %p137_p1 }
   0x5   : > { %v2474_v0 = vld [vmem:[%s2996_s1] sm:$0xff] (!%p138_p2)   ;;  %p161_p3 = scmp.lt.s32.totalorder (!%p138_p2), %s1777_s13, 1  ;;  %v2476_v2 = vld [vmem:[%s2996_s1 + $0x8] sm:$0xff] (!%p138_p2)   ;;  %v2478_v4 = vld [vmem:[%s2996_s1 + $0x10] sm:$0xff] (!%p138_p2)   ;;  %vm1690_vm0 = vcmask (!%p138_p2), 1043456  }
   0x6   : > { %141 = sbr.rel (%p138_p2) target bundleno = 406 (0x196), region = 32  ;;  %v2475_v1 = vld [vmem:[%s2996_s1 + $0x100] sm:$0xff] (!%p138_p2)   ;;  %2145 = vmatprep.subr.bf16.mxu1 (!%p138_p2), %v2474_v0  ;;  %v2477_v3 = vld [vmem:[%s2996_s1 + $0x108] sm:$0xff] (!%p138_p2)   ;;  %v2479_v5 = vld [vmem:[%s2996_s1 + $0x110] sm:$0xff] (!%p138_p2)  }
   0x7   : > { %2241 = vmatprep.subr.bf16.mxu0 (!%p138_p2), %v2475_v1  ;;  %2146 = vmatpush3.bf16.msra.mxu1 (!%p138_p2), %v2474_v0  ;;  %v2480_v6 = vld [vmem:[%s2996_s1 + $0x18] sm:$0xff] (!%p138_p2)   ;;  %v2482_v8 = vld [vmem:[%s2996_s1 + $0x20] sm:$0xff] (!%p138_p2)   ;;  %v2484_v10 = vld [vmem:[%s2996_s1 + $0x28] sm:$0xff] (!%p138_p2)  }
   0x8   : > { %2242 = vmatpush3.bf16.msra.mxu0 (!%p138_p2), %v2475_v1  ;;  %2147 = vmatprep.subr.bf16.mxu1 (!%p138_p2), %v2476_v2  ;;  %v2481_v7 = vld [vmem:[%s2996_s1 + $0x118] sm:$0xff] (!%p138_p2)   ;;  %v2483_v9 = vld [vmem:[%s2996_s1 + $0x120] sm:$0xff] (!%p138_p2)   ;;  %v2485_v13 = vld [vmem:[%s2996_s1 + $0x128] sm:$0xff] (!%p138_p2)  }
   0x9   : > { %2243 = vmatprep.subr.bf16.mxu0 (!%p138_p2), %v2477_v3  ;;  %v2486_v19 = vld [vmem:[%s2996_s1 + $0x30] sm:$0xff] (!%p138_p2)   ;;  %v2488_v22 = vld [vmem:[%s2996_s1 + $0x38] sm:$0xff] (!%p138_p2)   ;;  %v2490_v24 = vld [vmem:[%s2996_s1 + $0x40] sm:$0xff] (!%p138_p2)  }
   0xa   : > { %v2487_v21 = vld [vmem:[%s2996_s1 + $0x130] sm:$0xff] (!%p138_p2)   ;;  %v2489_v23 = vld [vmem:[%s2996_s1 + $0x138] sm:$0xff] (!%p138_p2)   ;;  %v2491_v28 = vld [vmem:[%s2996_s1 + $0x140] sm:$0xff] (!%p138_p2)  }
   0xb   : > { %2148 = vmatpush3.bf16.msra.mxu1 (!%p138_p2), %v2476_v2  ;;  %v2492_v34 = vld [vmem:[%s2996_s1 + $0x48] sm:$0xff] (!%p138_p2)   ;;  %v2494_v39 = vld [vmem:[%s2996_s1 + $0x50] sm:$0xff] (!%p138_p2)   ;;  %v2496_v52 = vld [vmem:[%s2996_s1 + $0x58] sm:$0xff] (!%p138_p2)  }
   0xc   : > { %2244 = vmatpush3.bf16.msra.mxu0 (!%p138_p2), %v2477_v3  ;;  %2149 = vmatprep.subr.bf16.mxu1 (!%p138_p2), %v2478_v4  ;;  %v2493_v37 = vld [vmem:[%s2996_s1 + $0x148] sm:$0xff] (!%p138_p2)   ;;  %v2495_v46 = vld [vmem:[%s2996_s1 + $0x150] sm:$0xff] (!%p138_p2)   ;;  %v2497_v53 = vld [vmem:[%s2996_s1 + $0x158] sm:$0xff] (!%p138_p2)  }
   0xd   : > { %s3000_s13 = smov (!%p161_p3, %s1777_s13), 1  ;;  %2245 = vmatprep.subr.bf16.mxu0 %v2479_v5  ;;  %v2498_v56 = vld [vmem:[%s2996_s1 + $0x60] sm:$0xff]   ;;  %v2500_v58 = vld [vmem:[%s2996_s1 + $0x68] sm:$0xff]   ;;  %v2502_v60 = vld [vmem:[%s2996_s1 + $0x70] sm:$0xff]  }
   0xe   : > { %s2465_s30 = smul.u32 160, %s3000_s13  ;;  %v2499_v57 = vld [vmem:[%s2996_s1 + $0x160] sm:$0xff]   ;;  %v2501_v59 = vld [vmem:[%s2996_s1 + $0x168] sm:$0xff]   ;;  %v2503_v61 = vld [vmem:[%s2996_s1 + $0x170] sm:$0xff]   ;;  %s2036_s18 = sshll.u32 %s3000_s13, 4 }
   0xf   : > { %2150 = vmatpush3.bf16.msra.mxu1 %v2478_v4  ;;  %v2504_v62 = vld [vmem:[%s2996_s1 + $0x78] sm:$0xff]   ;;  %v2506_v0 = vld [vmem:[%s2996_s1 + $0x80] sm:$0xff]   ;;  %s170_s21 = scalar_lea.vmem %s2998_s3, %s2036_s18 }
  0x10   : > { %2246 = vmatpush3.bf16.msra.mxu0 %v2479_v5  ;;  %2151 = vmatprep.subr.bf16.mxu1 %v2480_v6  ;;  %s2618_s10 = scalar_lea.vmem %s2995_s0, %s2465_s30  ;;  %v2505_v63 = vld [vmem:[%s2996_s1 + $0x178] sm:$0xff]   ;;  %v2507_v3 = vld [vmem:[%s2996_s1 + $0x180] sm:$0xff]  }
  0x11   : > { %2247 = vmatprep.subr.bf16.mxu0 %v2481_v7  ;;  %v172_v11 = vld [vmem:[%s2618_s10] sm:$0xff]  ;;  %v2625_v12 = vld [vmem:[%s2618_s10 + $0x10] sm:$0xff] }
  0x12   : > { %v180_v14 = vpack.c.bf16 %v2625_v12, %v172_v11  ;;  %v2632_v15 = vld [vmem:[%s2618_s10 + $0x11] sm:$0xff]  ;;  %v2635_v16 = vld [vmem:[%s2618_s10 + $0x21] sm:$0xff] }
  0x13   : > { %2152 = vmatpush3.bf16.msra.mxu1 %v2480_v6  ;;  %v828_v17 = vpack.c.bf16 %v2635_v16, %v2632_v15  ;;  %v2640_v18 = vld [vmem:[%s2618_s10 + $0x20] sm:$0xff]  ;;  %v2660_v25 = vld [vmem:[%s2618_s10 + $0x30] sm:$0xff] }
  0x14   : > { %2248 = vmatpush3.bf16.msra.mxu0 %v2481_v7  ;;  %2153 = vmatprep.subr.bf16.mxu1 %v2482_v8  ;;  %v662_v20 = vpack.c.bf16 %v2640_v18, %v2625_v12  ;;  %v2663_v26 = vld [vmem:[%s2618_s10 + $0x31] sm:$0xff]  ;;  %v2666_v27 = vld [vmem:[%s2618_s10 + $0x41] sm:$0xff]  ;;  %v2673_v29 = vpack.c.bf16 %v2660_v25, %v2640_v18 }
  0x15   : > { %2249 = vmatprep.subr.bf16.mxu0 %v2483_v9  ;;  %2161 = vmatprep.mubr.bf16.mxu1 %v180_v14  ;;  %v2676_v30 = vld [vmem:[%s2618_s10 + $0x40] sm:$0xff]  ;;  %v829_v31 = vpack.c.bf16 %v2666_v27, %v2663_v26  ;;  %v2681_v32 = vld [vmem:[%s2618_s10 + $0x50] sm:$0xff]  ;;  %v2786_v4 = vpack.c.bf16 %v2663_v26, %v2635_v16 }
  0x16   : > { %2257 = vmatprep.mubr.bf16.mxu0 %v828_v17  ;;  %v663_v33 = vpack.c.bf16 %v2676_v30, %v2660_v25  ;;  %v2689_v35 = vld [vmem:[%s2618_s10 + $0x51] sm:$0xff]  ;;  %v2692_v36 = vld [vmem:[%s2618_s10 + $0x61] sm:$0xff]  ;;  %v2699_v38 = vpack.c.bf16 %v2681_v32, %v2676_v30 }
  0x17   : > { %2154 = vmatpush3.bf16.msra.mxu1 %v2482_v8  ;;  %v830_v40 = vpack.c.bf16 %v2692_v36, %v2689_v35  ;;  %v2708_v41 = vld [vmem:[%s2618_s10 + $0x60] sm:$0xff]  ;;  %v2711_v42 = vld [vmem:[%s2618_s10 + $0x70] sm:$0xff]  ;;  %v2508_v8 = vld [vmem:[%s2996_s1 + $0x88] sm:$0xff]  }
  0x18   : > { %2250 = vmatpush3.bf16.msra.mxu0 %v2483_v9  ;;  %2155 = vmatprep.subr.bf16.mxu1 %v2484_v10  ;;  %v2714_v43 = vld [vmem:[%s2618_s10 + $0x71] sm:$0xff]  ;;  %v664_v44 = vpack.c.bf16 %v2708_v41, %v2681_v32  ;;  %v2719_v45 = vld [vmem:[%s2618_s10 + $0x81] sm:$0xff]  ;;  %v2727_v47 = vpack.c.bf16 %v2711_v42, %v2708_v41 }
  0x19   : > { %2251 = vmatprep.subr.bf16.mxu0 %v2485_v13  ;;  %v321_v48 = vld [vmem:[%s2618_s10 + $0x1] sm:$0xff]  ;;  %v2731_v49 = vld [vmem:[%s2618_s10 + $0x12] sm:$0xff]  ;;  %v831_v50 = vpack.c.bf16 %v2719_v45, %v2714_v43  ;;  %v2824_v17 = vpack.c.bf16 %v2714_v43, %v2692_v36 }
  0x1a   : > { %v2736_v51 = vld [vmem:[%s2618_s10 + $0x22] sm:$0xff]  ;;  %v329_v54 = vpack.c.bf16 %v2632_v15, %v321_v48  ;;  %v2776_v1 = vld [vmem:[%s2618_s10 + $0x32] sm:$0xff] }
  0x1b   : > { %2156 = vmatpush3.bf16.msra.mxu1 %v2484_v10  ;;  %v994_v55 = vpack.c.bf16 %v2736_v51, %v2731_v49  ;;  %v2779_v2 = vld [vmem:[%s2618_s10 + $0x42] sm:$0xff]  ;;  %v2789_v5 = vld [vmem:[%s2618_s10 + $0x52] sm:$0xff]  ;;  %v2804_v10 = vpack.c.bf16 %v2689_v35, %v2666_v27 }
  0x1c   : > { %2252 = vmatpush3.bf16.msra.mxu0 %v2485_v13  ;;  %2157 = vmatprep.subr.bf16.mxu1 %v2486_v19  ;;  %v995_v6 = vpack.c.bf16 %v2779_v2, %v2776_v1  ;;  %v2794_v7 = vld [vmem:[%s2618_s10 + $0x62] sm:$0xff]  ;;  %v2510_v11 = vld [vmem:[%s2996_s1 + $0x90] sm:$0xff]   ;;  %v2520_v35 = vld [vmem:[%s2996_s1 + $0xb8] sm:$0xff]   ;;  %v2880_v48 = vpack.c.bf16 %v2789_v5, %v2779_v2 }
  0x1d   : > { %2253 = vmatprep.subr.bf16.mxu0 %v2487_v21  ;;  %v2509_v9 = vld [vmem:[%s2996_s1 + $0x188] sm:$0xff]   ;;  %v996_v13 = vpack.c.bf16 %v2794_v7, %v2789_v5  ;;  %v2813_v14 = vld [vmem:[%s2618_s10 + $0x72] sm:$0xff]  ;;  %v2514_v26 = vld [vmem:[%s2996_s1 + $0xa0] sm:$0xff]  }
  0x1e   : > { %v2816_v15 = vld [vmem:[%s2618_s10 + $0x82] sm:$0xff]  ;;  %v2511_v16 = vld [vmem:[%s2996_s1 + $0x190] sm:$0xff]   ;;  %v2521_v36 = vld [vmem:[%s2996_s1 + $0x1b8] sm:$0xff]  }
  0x1f   : > { %2158 = vmatpush3.bf16.msra.mxu1 %v2486_v19  ;;  %v487_v19 = vld [vmem:[%s2618_s10 + $0x2] sm:$0xff]  ;;  %v2534_v12 = vld [vmem:[%s2996_s1 + $0xf0] sm:$0xff]  }
  0x20   : > { %2254 = vmatpush3.bf16.msra.mxu0 %v2487_v21  ;;  %2159 = vmatprep.subr.bf16.mxu1 %v2488_v22  ;;  %v997_v21 = vpack.c.bf16 %v2816_v15, %v2813_v14  ;;  %v2515_v27 = vld [vmem:[%s2996_s1 + $0x1a0] sm:$0xff]   ;;  %v2524_v43 = vld [vmem:[%s2996_s1 + $0xc8] sm:$0xff]   ;;  %v2535_v18 = vld [vmem:[%s2996_s1 + $0x1f0] sm:$0xff]  }
  0x21   : > { %2255 = vmatprep.subr.bf16.mxu0 %v2489_v23  ;;  %v2542_v32 = vld [vmem:[%s2996_s1 + $0x220] sm:$0xff]   ;;  %v2543_v41 = vld [vmem:[%s2996_s1 + $0x228] sm:$0xff]  }
  0x23   : > { %2160 = vmatpush3.bf16.msra.mxu1 %v2488_v22  ;;  %v2512_v22 = vld [vmem:[%s2996_s1 + $0x98] sm:$0xff]  }
  0x24   : > { %2256 = vmatpush3.bf16.msra.mxu0 %v2489_v23  ;;  %2169 = vmatprep.subr.bf16.mxu1 %v2490_v24  ;;  %v2513_v23 = vld [vmem:[%s2996_s1 + $0x198] sm:$0xff]  }
  0x25   : > { %2265 = vmatprep.subr.bf16.mxu0 %v2491_v28 }
  0x26   : > { %2162 = vmatmul.mubr.bf16.vlgmr.msra.gmra.mrb[0].mxu1 %v2673_v29 }
  0x27   : > { %2170 = vmatpush3.bf16.msra.mxu1 %v2490_v24  ;;  %2258 = vmatmul.mubr.bf16.vlgmr.msra.gmra.mrb[0].mxu0 %v829_v31  ;;  %v495_v24 = vpack.c.bf16 %v2731_v49, %v487_v19  ;;  %v2517_v31 = vld [vmem:[%s2996_s1 + $0x1a8] sm:$0xff]   ;;  %v2526_v49 = vld [vmem:[%s2996_s1 + $0xd0] sm:$0xff]  }
  0x28   : > { %2266 = vmatpush3.bf16.msra.mxu0 %v2491_v28  ;;  %2171 = vmatprep.subr.bf16.mxu1 %v2492_v34  ;;  %v2516_v28 = vld [vmem:[%s2996_s1 + $0xa8] sm:$0xff]  }
  0x29   : > { %2267 = vmatprep.subr.bf16.mxu0 %v2493_v37  ;;  %2165 = vmatprep.mubr.bf16.mxu1 %v2699_v38 }
  0x2a   : > { %2261 = vmatprep.mubr.bf16.mxu0 %v830_v40  ;;  %v2870_v40 = vpack.c.bf16 %v2776_v1, %v2736_v51  ;;  %v1944_v51 = vld [vmem:[%s2618_s10 + $0x90] sm:$0xff] }
  0x2b   : > { %2172 = vmatpush3.bf16.msra.mxu1 %v2492_v34  ;;  %v2518_v34 = vld [vmem:[%s2996_s1 + $0xb0] sm:$0xff]  }
  0x2c   : > { %2268 = vmatpush3.bf16.msra.mxu0 %v2493_v37  ;;  %2173 = vmatprep.subr.bf16.mxu1 %v2494_v39  ;;  %v2522_v37 = vld [vmem:[%s2996_s1 + $0xc0] sm:$0xff]  }
  0x2d   : > { %2269 = vmatprep.subr.bf16.mxu0 %v2495_v46 }
  0x2e   : > { %2166 = vmatmul.mubr.bf16.gmra.mrb[4].mxu1 %v2727_v47 }
  0x2f   : > { %2174 = vmatpush3.bf16.msra.mxu1 %v2494_v39  ;;  %2262 = vmatmul.mubr.bf16.gmra.mrb[4].mxu0 %v831_v50  ;;  %v2523_v39 = vld [vmem:[%s2996_s1 + $0x1c0] sm:$0xff]  }
  0x30   : > { %2270 = vmatpush3.bf16.msra.mxu0 %v2495_v46  ;;  %2175 = vmatprep.subr.bf16.mxu1 %v2496_v52  ;;  %v2525_v46 = vld [vmem:[%s2996_s1 + $0x1c8] sm:$0xff]   ;;  %v2888_v50 = vld [vmem:[%s2618_s10 + $0x80] sm:$0xff] }
  0x31   : > { %2271 = vmatprep.subr.bf16.mxu0 %v2497_v53  ;;  %2185 = vmatprep.mubr.bf16.mxu1 %v329_v54  ;;  %v2528_v54 = vld [vmem:[%s2996_s1 + $0xd8] sm:$0xff]   ;;  %v665_v25 = vpack.c.bf16 %v2888_v50, %v2711_v42  ;;  %v2544_v42 = vld [vmem:[%s2996_s1 + $0x230] sm:$0xff]  }
  0x32   : > { %2281 = vmatprep.mubr.bf16.mxu0 %v994_v55  ;;  %v2529_v55 = vld [vmem:[%s2996_s1 + $0x1d8] sm:$0xff]  }
  0x33   : > { %2176 = vmatpush3.bf16.msra.mxu1 %v2496_v52  ;;  %v2527_v52 = vld [vmem:[%s2996_s1 + $0x1d0] sm:$0xff]  }
  0x34   : > { %2272 = vmatpush3.bf16.msra.mxu0 %v2497_v53  ;;  %2177 = vmatprep.subr.bf16.mxu1 %v2498_v56  ;;  %v1164_v53 = vpack.c.bf16 %v1944_v51, %v2888_v50 }
  0x35   : > { %2273 = vmatprep.subr.bf16.mxu0 %v2499_v57 }
  0x37   : > { %2178 = vmatpush3.bf16.msra.mxu1 %v2498_v56  ;;  %v2531_v56 = vld [vmem:[%s2996_s1 + $0x1e0] sm:$0xff]  }
  0x38   : > { %2274 = vmatpush3.bf16.msra.mxu0 %v2499_v57  ;;  %2179 = vmatprep.subr.bf16.mxu1 %v2500_v58  ;;  %v2532_v57 = vld [vmem:[%s2996_s1 + $0xe8] sm:$0xff]  }
  0x39   : > { %2275 = vmatprep.subr.bf16.mxu0 %v2501_v59 }
  0x3b   : > { %2180 = vmatpush3.bf16.msra.mxu1 %v2500_v58  ;;  %v2533_v58 = vld [vmem:[%s2996_s1 + $0x1e8] sm:$0xff]  }
  0x3c   : > { %2276 = vmatpush3.bf16.msra.mxu0 %v2501_v59  ;;  %2181 = vmatprep.subr.bf16.mxu1 %v2502_v60  ;;  %v2537_v59 = vld [vmem:[%s2996_s1 + $0x1f8] sm:$0xff]  }
  0x3d   : > { %2277 = vmatprep.subr.bf16.mxu0 %v2503_v61 }
  0x3f   : > { %2182 = vmatpush3.bf16.msra.mxu1 %v2502_v60  ;;  %v2538_v60 = vld [vmem:[%s2996_s1 + $0x200] sm:$0xff]  }
  0x40   : > { %2278 = vmatpush3.bf16.msra.mxu0 %v2503_v61  ;;  %2183 = vmatprep.subr.bf16.mxu1 %v2504_v62  ;;  %v2539_v61 = vld [vmem:[%s2996_s1 + $0x208] sm:$0xff]  }
  0x41   : > { %2279 = vmatprep.subr.bf16.mxu0 %v2505_v63 }
  0x43   : > { %2184 = vmatpush3.bf16.msra.mxu1 %v2504_v62  ;;  %v1976_v62 = vld [vmem:[%s2618_s10 + $0x91] sm:$0xff] }
  0x44   : > { %2280 = vmatpush3.bf16.msra.mxu0 %v2505_v63  ;;  %2193 = vmatprep.subr.bf16.mxu1 %v2506_v0  ;;  %v2540_v63 = vld [vmem:[%s2996_s1 + $0x210] sm:$0xff]   ;;  %v1330_v30 = vpack.c.bf16 %v1976_v62, %v2719_v45 }
  0x45   : > { %2289 = vmatprep.subr.bf16.mxu0 %v2507_v3  ;;  %v2008_v45 = vld [vmem:[%s2618_s10 + $0x92] sm:$0xff] }
  0x46   : > { %2186 = vmatmul.mubr.bf16.vlgmr.msra.gmra.mrb[0].mxu1 %v2786_v4 }
  0x47   : > { %2194 = vmatpush3.bf16.msra.mxu1 %v2506_v0  ;;  %2282 = vmatmul.mubr.bf16.vlgmr.msra.gmra.mrb[0].mxu0 %v995_v6  ;;  %v1496_v0 = vpack.c.bf16 %v2008_v45, %v2816_v15 }
  0x48   : > { %2290 = vmatpush3.bf16.msra.mxu0 %v2507_v3  ;;  %2195 = vmatprep.subr.bf16.mxu1 %v2508_v8 }
  0x49   : > { %2291 = vmatprep.subr.bf16.mxu0 %v2509_v9  ;;  %2189 = vmatprep.mubr.bf16.mxu1 %v2804_v10 }
  0x4a   : > { %2285 = vmatprep.mubr.bf16.mxu0 %v996_v13 }
  0x4b   : > { %2196 = vmatpush3.bf16.msra.mxu1 %v2508_v8 }
  0x4c   : > { %2292 = vmatpush3.bf16.msra.mxu0 %v2509_v9  ;;  %2197 = vmatprep.subr.bf16.mxu1 %v2510_v11 }
  0x4d   : > { %2293 = vmatprep.subr.bf16.mxu0 %v2511_v16 }
  0x4e   : > { %2190 = vmatmul.mubr.bf16.gmra.mrb[4].mxu1 %v2824_v17 }
  0x4f   : > { %2198 = vmatpush3.bf16.msra.mxu1 %v2510_v11  ;;  %2286 = vmatmul.mubr.bf16.gmra.mrb[4].mxu0 %v997_v21 }
  0x50   : > { %2294 = vmatpush3.bf16.msra.mxu0 %v2511_v16  ;;  %2199 = vmatprep.subr.bf16.mxu1 %v2512_v22 }
  0x51   : > { %2295 = vmatprep.subr.bf16.mxu0 %v2513_v23  ;;  %2209 = vmatprep.mubr.bf16.mxu1 %v495_v24 }
  0x52   : > { %2305 = vmatprep.mubr.bf16.mxu0 %v2673_v29  ;;  %v2519_v29 = vld [vmem:[%s2996_s1 + $0x1b0] sm:$0xff]  }
  0x53   : > { %2200 = vmatpush3.bf16.msra.mxu1 %v2512_v22 }
  0x54   : > { %2296 = vmatpush3.bf16.msra.mxu0 %v2513_v23  ;;  %2201 = vmatprep.subr.bf16.mxu1 %v2514_v26 }
  0x55   : > { %2297 = vmatprep.subr.bf16.mxu0 %v2515_v27 }
  0x57   : > { %2202 = vmatpush3.bf16.msra.mxu1 %v2514_v26 }
  0x58   : > { %2298 = vmatpush3.bf16.msra.mxu0 %v2515_v27  ;;  %2203 = vmatprep.subr.bf16.mxu1 %v2516_v28 }
  0x59   : > { %2299 = vmatprep.subr.bf16.mxu0 %v2517_v31 }
  0x5b   : > { %2204 = vmatpush3.bf16.msra.mxu1 %v2516_v28 }
  0x5c   : > { %2300 = vmatpush3.bf16.msra.mxu0 %v2517_v31  ;;  %2205 = vmatprep.subr.bf16.mxu1 %v2518_v34 }
  0x5d   : > { %2301 = vmatprep.subr.bf16.mxu0 %v2519_v29 }
  0x5f   : > { %2206 = vmatpush3.bf16.msra.mxu1 %v2518_v34 }
  0x60   : > { %2302 = vmatpush3.bf16.msra.mxu0 %v2519_v29  ;;  %2207 = vmatprep.subr.bf16.mxu1 %v2520_v35 }
  0x61   : > { %2303 = vmatprep.subr.bf16.mxu0 %v2521_v36 }
  0x63   : > { %2208 = vmatpush3.bf16.msra.mxu1 %v2520_v35 }
  0x64   : > { %2304 = vmatpush3.bf16.msra.mxu0 %v2521_v36  ;;  %2217 = vmatprep.subr.bf16.mxu1 %v2522_v37 }
  0x65   : > { %2313 = vmatprep.subr.bf16.mxu0 %v2523_v39 }
  0x66   : > { %2210 = vmatmul.mubr.bf16.vlgmr.msra.gmra.mrb[0].mxu1 %v2870_v40 }
  0x67   : > { %2218 = vmatpush3.bf16.msra.mxu1 %v2522_v37  ;;  %2306 = vmatmul.mubr.bf16.vlgmr.msra.gmra.mrb[0].mxu0 %v2699_v38  ;;  %v2898_v38 = vpack.c.bf16 %v2813_v14, %v2794_v7 }
  0x68   : > { %2314 = vmatpush3.bf16.msra.mxu0 %v2523_v39  ;;  %2219 = vmatprep.subr.bf16.mxu1 %v2524_v43 }
  0x69   : > { %2315 = vmatprep.subr.bf16.mxu0 %v2525_v46  ;;  %2213 = vmatprep.mubr.bf16.mxu1 %v2880_v48 }
  0x6a   : > { %2309 = vmatprep.mubr.bf16.mxu0 %v2727_v47  ;;  %v2530_v47 = vld [vmem:[%s2996_s1 + $0xe0] sm:$0xff]  }
  0x6b   : > { %2220 = vmatpush3.bf16.msra.mxu1 %v2524_v43 }
  0x6c   : > { %2316 = vmatpush3.bf16.msra.mxu0 %v2525_v46  ;;  %2221 = vmatprep.subr.bf16.mxu1 %v2526_v49 }
  0x6d   : > { %2317 = vmatprep.subr.bf16.mxu0 %v2527_v52 }
  0x6e   : > { %2214 = vmatmul.mubr.bf16.gmra.mrb[4].mxu1 %v2898_v38 }
  0x6f   : > { %2222 = vmatpush3.bf16.msra.mxu1 %v2526_v49  ;;  %2310 = vmatmul.mubr.bf16.gmra.mrb[4].mxu0 %v1164_v53 }
  0x70   : > { %2318 = vmatpush3.bf16.msra.mxu0 %v2527_v52  ;;  %2223 = vmatprep.subr.bf16.mxu1 %v2528_v54 }
  0x71   : > { %2319 = vmatprep.subr.bf16.mxu0 %v2529_v55  ;;  %2233 = vmatprep.mubr.bf16.mxu1 %v662_v20  ;;  %v2536_v20 = vld [vmem:[%s2996_s1 + $0xf8] sm:$0xff]  }
  0x72   : > { %2329 = vmatprep.mubr.bf16.mxu0 %v2786_v4 }
  0x73   : > { %2224 = vmatpush3.bf16.msra.mxu1 %v2528_v54 }
  0x74   : > { %2320 = vmatpush3.bf16.msra.mxu0 %v2529_v55  ;;  %2225 = vmatprep.subr.bf16.mxu1 %v2530_v47 }
  0x75   : > { %2321 = vmatprep.subr.bf16.mxu0 %v2531_v56 }
  0x77   : > { %2226 = vmatpush3.bf16.msra.mxu1 %v2530_v47 }
  0x78   : > { %2322 = vmatpush3.bf16.msra.mxu0 %v2531_v56  ;;  %2227 = vmatprep.subr.bf16.mxu1 %v2532_v57 }
  0x79   : > { %2323 = vmatprep.subr.bf16.mxu0 %v2533_v58 }
  0x7b   : > { %2228 = vmatpush3.bf16.msra.mxu1 %v2532_v57 }
  0x7c   : > { %2324 = vmatpush3.bf16.msra.mxu0 %v2533_v58  ;;  %2229 = vmatprep.subr.bf16.mxu1 %v2534_v12 }
  0x7d   : > { %2325 = vmatprep.subr.bf16.mxu0 %v2535_v18 }
  0x7f   : > { %2230 = vmatpush3.bf16.msra.mxu1 %v2534_v12  ;;  %v2033_v12 = vld [vmem:[%s2997_s2] ss:$0 sm:$0xff] }
  0x80   : > { %2326 = vmatpush3.bf16.msra.mxu0 %v2535_v18  ;;  %2231 = vmatprep.subr.bf16.mxu1 %v2536_v20 }
  0x81   : > { %2327 = vmatprep.subr.bf16.mxu0 %v2537_v59 }
  0x83   : > { %2232 = vmatpush3.bf16.msra.mxu1 %v2536_v20 }
  0x84   : > { %2328 = vmatpush3.bf16.msra.mxu0 %v2537_v59  ;;  %2361 = vmatprep.subr.bf16.mxu1 %v2538_v60 }
  0x85   : > { %2337 = vmatprep.subr.bf16.mxu0 %v2538_v60 }
  0x86   : > { %2234 = vmatmul.mubr.bf16.vlgmr.msra.gmra.mrb[0].mxu1 %v663_v33  ;;  %v2541_v33 = vld [vmem:[%s2996_s1 + $0x218] sm:$0xff]  }
  0x87   : > { %2330 = vmatmul.mubr.bf16.vlgmr.msra.gmra.mrb[0].mxu0 %v2804_v10  ;;  %2369 = vmatpush3.bf16.msra.mxu1 %v2538_v60 }
  0x88   : > { %2338 = vmatpush3.bf16.msra.mxu0 %v2538_v60  ;;  %2362 = vmatprep.subr.bf16.mxu1 %v2539_v61 }
  0x89   : > { %2339 = vmatprep.subr.bf16.mxu0 %v2539_v61  ;;  %2237 = vmatprep.mubr.bf16.mxu1 %v664_v44  ;;  %v2545_v44 = vld [vmem:[%s2996_s1 + $0x238] sm:$0xff]  }
  0x8a   : > { %2333 = vmatprep.mubr.bf16.mxu0 %v2824_v17 }
  0x8b   : > { %2370 = vmatpush3.bf16.msra.mxu1 %v2539_v61 }
  0x8c   : > { %2340 = vmatpush3.bf16.msra.mxu0 %v2539_v61  ;;  %2363 = vmatprep.subr.bf16.mxu1 %v2540_v63 }
  0x8d   : > { %2341 = vmatprep.subr.bf16.mxu0 %v2540_v63 }
  0x8e   : > { %2238 = vmatmul.mubr.bf16.gmra.mrb[4].mxu1 %v665_v25 }
  0x8f   : > { %2334 = vmatmul.mubr.bf16.gmra.mrb[4].mxu0 %v1330_v30  ;;  %2371 = vmatpush3.bf16.msra.mxu1 %v2540_v63 }
  0x90   : > { %2342 = vmatpush3.bf16.msra.mxu0 %v2540_v63  ;;  %2364 = vmatprep.subr.bf16.mxu1 %v2541_v33 }
  0x91   : > { %2343 = vmatprep.subr.bf16.mxu0 %v2541_v33  ;;  %2353 = vmatprep.mubr.bf16.mxu0 %v2870_v40 }
  0x92   : > { %2357 = vmatprep.mubr.bf16.mxu1 %v2898_v38 }
  0x93   : > { %2372 = vmatpush3.bf16.msra.mxu1 %v2541_v33 }
  0x94   : > { %2344 = vmatpush3.bf16.msra.mxu0 %v2541_v33  ;;  %2365 = vmatprep.subr.bf16.mxu1 %v2542_v32 }
  0x95   : > { %2345 = vmatprep.subr.bf16.mxu0 %v2542_v32 }
  0x97   : > { %2373 = vmatpush3.bf16.msra.mxu1 %v2542_v32 }
  0x98   : > { %2346 = vmatpush3.bf16.msra.mxu0 %v2542_v32  ;;  %2366 = vmatprep.subr.bf16.mxu1 %v2543_v41 }
  0x99   : > { %2347 = vmatprep.subr.bf16.mxu0 %v2543_v41 }
  0x9b   : > { %2374 = vmatpush3.bf16.msra.mxu1 %v2543_v41 }
  0x9c   : > { %2348 = vmatpush3.bf16.msra.mxu0 %v2543_v41  ;;  %2367 = vmatprep.subr.bf16.mxu1 %v2544_v42 }
  0x9d   : > { %2349 = vmatprep.subr.bf16.mxu0 %v2544_v42 }
  0x9f   : > { %2375 = vmatpush3.bf16.msra.mxu1 %v2544_v42 }
  0xa0   : > { %2350 = vmatpush3.bf16.msra.mxu0 %v2544_v42  ;;  %2368 = vmatprep.subr.bf16.mxu1 %v2545_v44 }
  0xa1   : > { %2351 = vmatprep.subr.bf16.mxu0 %v2545_v44 }
  0xa3   : > { %2376 = vmatpush3.bf16.msra.mxu1 %v2545_v44 }
  0xa4   : > { %2352 = vmatpush3.bf16.msra.mxu0 %v2545_v44 }
  0xa6   : > { %2358 = vmatmul.mubr.bf16.vlgmr.msra.gmra.mrb[8].mxu1 %v1496_v0 }
  0xa7   : > { %2354 = vmatmul.mubr.bf16.vlgmr.msra.gmra.mrb[0].mxu0 %v2880_v48 }
 0x159   : > { %v2235_v1 = vpop.f32.mrb[0].mxu1 }
 0x15a   : > { %v765_v2 = vpop.f32.mrb[1].mxu1 }
 0x15b   : > { %v2236_v3 = vpop.f32.mrb[2].mxu1 }
 0x15c   : > { %v768_v4 = vpop.f32.mrb[3].mxu1 }
 0x161   : > { %v2239_v5 = vpop.f32.mrb[4].mxu1 }
 0x162   : > { %v2335_v6 = vpop.f32.mrb[4].mxu0  ;;  %v781_v7 = vpop.f32.mrb[5].mxu1 }
 0x163   : > { %v2391_v8 = vadd.f32 %v2335_v6, %v2239_v5  ;;  %v1446_v9 = vpop.f32.mrb[5].mxu0  ;;  %v2240_v10 = vpop.f32.mrb[6].mxu1 }
 0x164   : > { %v2397_v11 = vadd.f32 %v1446_v9, %v781_v7  ;;  %v2336_v13 = vpop.f32.mrb[6].mxu0  ;;  %v784_v14 = vpop.f32.mrb[7].mxu1 }
 0x165   : > { %v2403_v16 = vadd.f32 %v2336_v13, %v2240_v10  ;;  %v1449_v15 = vpop.f32.mrb[7].mxu0 }
 0x166   : > { %v2409_v17 = vadd.f32 %v1449_v15, %v784_v14 }
 0x179   : > { %v2359_v19 = vpop.f32.mrb[8].mxu1 }
 0x17a   : > { %v2355_v21 = vpop.f32.mrb[0].mxu0  ;;  %v2394_v22 = vadd.f32 %v2391_v8, %v2359_v19  ;;  %v1612_v23 = vpop.f32.mrb[9].mxu1 }
 0x17b   : > { %v2379_v24 = vadd.f32 %v2355_v21, %v2235_v1  ;;  %v1596_v26 = vpop.f32.mrb[1].mxu0  ;;  %v2400_v27 = vadd.f32 %v2397_v11, %v1612_v23  ;;  %v2360_v28 = vpop.f32.mrb[10].mxu1 }
 0x17c   : > { %1649 = vst [vmem:[#allocation2 + $0x30] sm:$0xff] %v2394_v22  ;;  %v2382_v31 = vadd.f32 %v1596_v26, %v765_v2  ;;  %v2356_v34 = vpop.f32.mrb[2].mxu0  ;;  %v2406_v29 = vadd.f32 %v2403_v16, %v2360_v28  ;;  %v1615_v35 = vpop.f32.mrb[11].mxu1 }
 0x17d   : > { %1645 = vst [vmem:[#allocation2 + $0x10] sm:$0xff] %v2379_v24  ;;  %1647 = vst [vmem:[#allocation2 + $0x20] sm:$0xff] %v2400_v27  ;;  %v2385_v36 = vadd.f32 %v2356_v34, %v2236_v3  ;;  %v1599_v37 = vpop.f32.mrb[3].mxu0  ;;  %v2412_v39 = vadd.f32 %v2409_v17, %v1615_v35 }
 0x17e   : > { %1643 = vst [vmem:[#allocation2] sm:$0xff] %v2382_v31  ;;  %1650 = vst [vmem:[#allocation2 + $0x38] sm:$0xff] %v2406_v29  ;;  %v2388_v40 = vadd.f32 %v1599_v37, %v768_v4 }
 0x17f   : > { %1646 = vst [vmem:[#allocation2 + $0x18] sm:$0xff] %v2385_v36  ;;  %1648 = vst [vmem:[#allocation2 + $0x28] sm:$0xff] %v2412_v39 }
 0x180   : > { %1644 = vst [vmem:[#allocation2 + $0x8] sm:$0xff] %v2388_v40 }
 0x183   : > { %v1663_v43 = vld [vmem:[#allocation2 + $0x30] ss:$2 sm:$0xf]  ;;  %v1679_v49 = vld [vmem:[#allocation2 + $0x31] ss:$2 sm:$0xf] }
 0x184   : > { %v1655_v46 = vld [vmem:[#allocation2 + $0x10] ss:$2 sm:$0xf]  ;;  %v1671_v48 = vld [vmem:[#allocation2 + $0x11] ss:$2 sm:$0xf]  ;;  %v1688_v55 = vmax.f32 %v1663_v43, %v1679_v49 }
 0x185   : > { %v1651_v50 = vld [vmem:[#allocation2] ss:$2 sm:$0xf]  ;;  %v1667_v51 = vld [vmem:[#allocation2 + $0x1] ss:$2 sm:$0xf]  ;;  %v1684_v38 = vmax.f32 %v1655_v46, %v1671_v48 }
 0x186   : > { %v1659_v52 = vld [vmem:[#allocation2 + $0x20] ss:$2 sm:$0xf]  ;;  %v1675_v53 = vld [vmem:[#allocation2 + $0x21] ss:$2 sm:$0xf]  ;;  %v1682_v57 = vmax.f32 %v1651_v50, %v1667_v51 }
 0x187   : > { %v1657_v54 = vld [vmem:[#allocation2 + $0x18] ss:$2 sm:$0xf]  ;;  %v1673_v47 = vld [vmem:[#allocation2 + $0x19] ss:$2 sm:$0xf]  ;;  %v1686_v62 = vmax.f32 %v1659_v52, %v1675_v53 }
 0x188   : > { %v1665_v56 = vld [vmem:[#allocation2 + $0x38] ss:$2 sm:$0xf]  ;;  %v1685_v58 = vmax.f32 %v1657_v54, %v1673_v47  ;;  %v1681_v18 = vld [vmem:[#allocation2 + $0x39] ss:$2 sm:$0xf] }
 0x189   : > { %v1689_v20 = vmax.f32 %v1665_v56, %v1681_v18  ;;  %v1653_v59 = vld [vmem:[#allocation2 + $0x8] ss:$2 sm:$0xf]  ;;  %v1669_v60 = vld [vmem:[#allocation2 + $0x9] ss:$2 sm:$0xf] }
 0x18a   : > { %v1694_v61 = vsel %vm1690_vm0, %v1684_v38, -inf  ;;  %v1695_v63 = vsel %vm1690_vm0, %v1685_v58, -inf  ;;  %v1683_v25 = vmax.f32 %v1653_v59, %v1669_v60  ;;  %v1661_v30 = vld [vmem:[#allocation2 + $0x28] ss:$2 sm:$0xf]  ;;  %v1700_v33 = vsel %vm1690_vm0, %v1688_v55, -inf }
 0x18b   : > { %v1696_v32 = vmax.f32 %v1694_v61, %v1695_v63  ;;  %v1701_v41 = vsel %vm1690_vm0, %v1689_v20, -inf  ;;  %v1677_v42 = vld [vmem:[#allocation2 + $0x29] ss:$2 sm:$0xf]  ;;  %v1691_v44 = vsel %vm1690_vm0, %v1682_v57, -inf  ;;  %v1697_v4 = vsel %vm1690_vm0, %v1686_v62, -inf }
 0x18c   : > { %v1702_v45 = vmax.f32 %v1700_v33, %v1701_v41  ;;  %v1692_v0 = vsel %vm1690_vm0, %v1683_v25, -inf  ;;  %v1687_v1 = vmax.f32 %v1661_v30, %v1677_v42 }
 0x18d   : > { %v1711_v2 = vadd.f32 %v2033_v12, %v1696_v32  ;;  %v1693_v3 = vmax.f32 %v1691_v44, %v1692_v0 }
 0x18e   : > { %v1713_v5 = vadd.f32 %v2033_v12, %v1702_v45  ;;  %v1698_v6 = vsel %vm1690_vm0, %v1687_v1, -inf }
 0x18f   : > { %v1715_v7 = vmax.f32 %v1711_v2, 0.0  ;;  %v1710_v8 = vadd.f32 %v2033_v12, %v1693_v3  ;;  %v1699_v9 = vmax.f32 %v1697_v4, %v1698_v6 }
 0x190   : > { %v1717_v10 = vmax.f32 %v1713_v5, 0.0 }
 0x191   : > { %1719 = vst [vmem:[%s170_s21 + $0x4] sm:$0xf] %v1715_v7  ;;  %v1714_v11 = vmax.f32 %v1710_v8, 0.0  ;;  %v1712_v13 = vadd.f32 %v2033_v12, %v1699_v9 }
 0x192   : > { %1721 = vst [vmem:[%s170_s21 + $0xc] sm:$0xf] %v1717_v10 }
 0x193   : > { %1718 = vst [vmem:[%s170_s21] sm:$0xf] %v1714_v11  ;;  %v1716_v14 = vmax.f32 %v1712_v13, 0.0 }
 0x195   : > { %1720 = vst [vmem:[%s170_s21 + $0x8] sm:$0xf] %v1716_v14 }
 0x196 PF: > { %s13_s12 = sadd.s32 1, %s2552_s12  }
 0x197   : > { %p10_p4 = scmp.ge.s32.totalorder %s13_s12, 4  }
 0x199   :  { %12 = sbr.rel (!%p10_p4) target bundleno = 1 (0x1), region = 87 }

// kernel: vgg_forward.3
= control target key start
LH: loop header
LB: loop body
LE: loop exit
PB: predicated region body
PF: predicated region fallthrough
CT: control target
= control target key end

     0   :  { %s4685_s12 = smov 0   ;;  %s5286_s0 = inlined_call_operand.vmem [shape: f32[2,18,18,3], index: 0, kind: input, shape index: {}]   ;;  %s5287_s1 = inlined_call_operand.vmem [shape: bf16[9,3,128], index: 1, kind: input, shape index: {}]   ;;  %s5288_s2 = inlined_call_operand.vmem [shape: f32[1,128], index: 2, kind: input, shape index: {}]   ;;  %s5289_s3 = inlined_call_operand.vmem [shape: f32[2,8,8,128], index: 3, kind: output, shape index: {}]  }
   0x1 LB: > { %s3509_s13 = sadd.s32 4294967295, %s4662_s12   ;;  %p3513_p0 = scmp.ge.s32.totalorder %s4662_s12, 1  ;;  %s4662_s12 = sphi %s4685_s12, %s13_s12  }
   0x2   : > { %p137_p1 = scmp.lt.s32.totalorder %s4662_s12, 3 }
   0x4   : > { %p138_p2 = pnand %p3513_p0, %p137_p1 }
   0x5   : > { %v220_v0 = vld [vmem:[%s5287_s1] sm:$0x3] (!%p138_p2)  ;;  %vm270_vm0 = vcmask (!%p138_p2), 1040384   ;;  %vm271_vm1 = vcmask (!%p138_p2), 1041408   ;;  %p161_p3 = scmp.lt.s32.totalorder (!%p138_p2), %s3509_s13, 1  ;;  %v4664_v1 = vmov (!%p138_p2), 65535  }
   0x6   : > { %141 = sbr.rel (%p138_p2) target bundleno = 537 (0x219), region = 32  ;;  %v272_v2 = vsel (!%p138_p2), %vm270_vm0, 4294967295, %v4664_v1  ;;  %v3648_v3 = vld [vmem:[%s5287_s1 + $0x8] sm:$0x3] (!%p138_p2)  ;;  %v3533_v4 = vld [vmem:[%s5287_s1 + $0x2] sm:$0x3] (!%p138_p2) }
   0x7   : > { %v4702_v5 = vsel (!%p138_p2), %vm271_vm1, %v272_v2, 0  ;;  %v3697_v6 = vld [vmem:[%s5287_s1 + $0xa] sm:$0x3] (!%p138_p2)  ;;  %v3746_v11 = vld [vmem:[%s5287_s1 + $0xc] sm:$0x3] (!%p138_p2)  ;;  %vm221_vm2 = vcmask (!%p138_p2), 23552  }
   0x8   : > { %v275_v7 = vand.u32 (!%p138_p2), %v4702_v5, %v220_v0  ;;  %v4711_v8 = vand.u32 (!%p138_p2), %v3648_v3, %v4702_v5  ;;  %v569_v9 = vand.u32 (!%p138_p2), %v3533_v4, %v4702_v5  ;;  %v2002_v10 = vand.u32 (!%p138_p2), %v3697_v6, %v4702_v5  ;;  %v3550_v12 = vld [vmem:[%s5287_s1 + $0x4] sm:$0x3] (!%p138_p2) }
   0x9   : > { %v4749_v29 = vand.u32 (!%p138_p2), %v3550_v12, %v4702_v5  ;;  %v4760_v32 = vand.u32 (!%p138_p2), %v3746_v11, %v4702_v5 }
   0xa   : > { %4018 = vmatprep.subr.bf16.mxu1 (!%p138_p2), %v275_v7  ;;  %4154 = vmatprep.subr.bf16.mxu0 (!%p138_p2), %v4711_v8 }
   0xb   : > { %4019 = vmatpush3.bf16.msra.mxu1 (!%p138_p2), %v275_v7  ;;  %4155 = vmatpush3.bf16.msra.mxu0 (!%p138_p2), %v4711_v8 }
   0xc   : > { %4052 = vmatprep.subr.bf16.mxu1 (!%p138_p2), %v569_v9  ;;  %4188 = vmatprep.subr.bf16.mxu0 (!%p138_p2), %v2002_v10 }
   0xd   : > { %s5291_s13 = smov (!%p161_p3, %s3509_s13), 1 }
   0xe   : > { %s4646_s22 = smul.u32 432, %s5291_s13  ;;  %s3864_s11 = sshll.u32 %s5291_s13, 6 }
   0xf   : > { %s5263_s16 = scalar_lea.vmem %s5289_s3, %s3864_s11 }
  0x10   : > { %s4721_s25 = scalar_lea.vmem %s5286_s0, %s4646_s22 }
  0x11   : > { %v172_v13 = vld [vmem:[%s4721_s25] sm:$0xff]  ;;  %v173_v14 = vld [vmem:[%s4721_s25 + $0x8] sm:$0xff]  ;;  %v174_v18 = vld [vmem:[%s4721_s25 + $0x18] sm:$0xff] }
  0x12   : > { %v3616_v15 = vld [vmem:[%s4721_s25 + $0x19] sm:$0xff]  ;;  %v204_v16 = vpack.c.bf16 %v173_v14, %v172_v13  ;;  %v3617_v17 = vld [vmem:[%s4721_s25 + $0x21] sm:$0xff]  ;;  %v3618_v22 = vld [vmem:[%s4721_s25 + $0x31] sm:$0xff] }
  0x13   : > { %v175_v19 = vld [vmem:[%s4721_s25 + $0x20] sm:$0xff]  ;;  %v4735_v20 = vpack.c.bf16 %v3617_v17, %v3616_v15  ;;  %v176_v24 = vld [vmem:[%s4721_s25 + $0x30] sm:$0xff]  ;;  %v177_v26 = vld [vmem:[%s4721_s25 + $0x38] sm:$0xff] }
  0x14   : > { %v4737_v21 = vpack.c.bf16 %v175_v19, %v174_v18  ;;  %v3619_v23 = vld [vmem:[%s4721_s25 + $0x39] sm:$0xff]  ;;  %4020 = vmatprep.mubr.msk.bf16.mxu1 %vm221_vm2, %v204_v16  ;;  %v3620_v27 = vld [vmem:[%s4721_s25 + $0x49] sm:$0xff]  ;;  %v3621_v28 = vld [vmem:[%s4721_s25 + $0x51] sm:$0xff]  ;;  %v4755_v30 = vpack.c.bf16 %v177_v26, %v176_v24 }
  0x15   : > { %v4743_v25 = vpack.c.bf16 %v3619_v23, %v3618_v22  ;;  %4156 = vmatprep.mubr.msk.bf16.mxu0 %vm221_vm2, %v4735_v20  ;;  %v4757_v31 = vpack.c.bf16 %v3621_v28, %v3620_v27  ;;  %v178_v33 = vld [vmem:[%s4721_s25 + $0x48] sm:$0xff]  ;;  %v179_v34 = vld [vmem:[%s4721_s25 + $0x50] sm:$0xff]  ;;  %v180_v37 = vld [vmem:[%s4721_s25 + $0x60] sm:$0xff] }
  0x16   : > { %4021 = vmatmul.mubr.msk.bf16.vlgmr.msra.gmra.mrb[0].mxu1 %vm221_vm2, %v4737_v21  ;;  %v3622_v35 = vld [vmem:[%s4721_s25 + $0x61] sm:$0xff]  ;;  %v3623_v36 = vld [vmem:[%s4721_s25 + $0x69] sm:$0xff]  ;;  %v3624_v39 = vld [vmem:[%s4721_s25 + $0x79] sm:$0xff]  ;;  %v4777_v41 = vpack.c.bf16 %v179_v34, %v178_v33 }
  0x17   : > { %4053 = vmatpush3.bf16.msra.mxu1 %v569_v9  ;;  %4157 = vmatmul.mubr.msk.bf16.vlgmr.msra.gmra.mrb[0].mxu0 %vm221_vm2, %v4743_v25  ;;  %v181_v38 = vld [vmem:[%s4721_s25 + $0x68] sm:$0xff]  ;;  %v4780_v42 = vpack.c.bf16 %v3623_v36, %v3622_v35  ;;  %v182_v45 = vld [vmem:[%s4721_s25 + $0x78] sm:$0xff]  ;;  %v183_v46 = vld [vmem:[%s4721_s25 + $0x80] sm:$0xff] }
  0x18   : > { %4024 = vmatprep.mubr.msk.bf16.mxu1 %vm221_vm2, %v4755_v30  ;;  %4160 = vmatprep.mubr.msk.bf16.mxu0 %vm221_vm2, %v4757_v31  ;;  %v3625_v40 = vld [vmem:[%s4721_s25 + $0x81] sm:$0xff]  ;;  %v4782_v43 = vpack.c.bf16 %v181_v38, %v180_v37  ;;  %v3626_v47 = vld [vmem:[%s4721_s25 + $0x91] sm:$0xff]  ;;  %v3627_v48 = vld [vmem:[%s4721_s25 + $0x99] sm:$0xff]  ;;  %v4802_v53 = vpack.c.bf16 %v183_v46, %v182_v45 }
  0x19   : > { %4189 = vmatpush3.bf16.msra.mxu0 %v2002_v10  ;;  %4086 = vmatprep.subr.bf16.mxu1 %v4749_v29  ;;  %v4784_v44 = vpack.c.bf16 %v3625_v40, %v3624_v39  ;;  %v184_v49 = vld [vmem:[%s4721_s25 + $0x90] sm:$0xff]  ;;  %v185_v50 = vld [vmem:[%s4721_s25 + $0x98] sm:$0xff]  ;;  %v4804_v54 = vpack.c.bf16 %v3627_v48, %v3626_v47  ;;  %v186_v57 = vld [vmem:[%s4721_s25 + $0xa8] sm:$0xff] }
  0x1a   : > { %4222 = vmatprep.subr.bf16.mxu0 %v4760_v32  ;;  %v3628_v51 = vld [vmem:[%s4721_s25 + $0xa9] sm:$0xff]  ;;  %v3629_v52 = vld [vmem:[%s4721_s25 + $0xb1] sm:$0xff]  ;;  %v4806_v55 = vpack.c.bf16 %v185_v50, %v184_v49  ;;  %v3630_v59 = vld [vmem:[%s4721_s25 + $0xc1] sm:$0xff] }
  0x1b   : > { %v4808_v56 = vpack.c.bf16 %v3629_v52, %v3628_v51  ;;  %v187_v58 = vld [vmem:[%s4721_s25 + $0xb0] sm:$0xff]  ;;  %v188_v61 = vld [vmem:[%s4721_s25 + $0xc0] sm:$0xff]  ;;  %v189_v62 = vld [vmem:[%s4721_s25 + $0xc8] sm:$0xff] }
  0x1c   : > { %v3631_v60 = vld [vmem:[%s4721_s25 + $0xc9] sm:$0xff]  ;;  %v3665_v63 = vld [vmem:[%s4721_s25 + $0x1a] sm:$0xff]  ;;  %v4826_v1 = vpack.c.bf16 %v187_v58, %v186_v57  ;;  %v4830_v3 = vpack.c.bf16 %v189_v62, %v188_v61  ;;  %v3667_v9 = vld [vmem:[%s4721_s25 + $0x32] sm:$0xff] }
  0x1d   : > { %v3666_v0 = vld [vmem:[%s4721_s25 + $0x22] sm:$0xff]  ;;  %v4828_v2 = vpack.c.bf16 %v3631_v60, %v3630_v59  ;;  %v190_v6 = vld [vmem:[%s4721_s25 + $0xd8] sm:$0xff]  ;;  %v192_v11 = vld [vmem:[%s4721_s25 + $0xf0] sm:$0xff] }
  0x1e   : > { %4025 = vmatmul.mubr.msk.bf16.gmra.mrb[4].mxu1 %vm221_vm2, %v4777_v41  ;;  %v4832_v4 = vpack.c.bf16 %v3666_v0, %v3665_v63  ;;  %v191_v7 = vld [vmem:[%s4721_s25 + $0xe0] sm:$0xff]  ;;  %v193_v12 = vld [vmem:[%s4721_s25 + $0xf8] sm:$0xff]  ;;  %v3669_v13 = vld [vmem:[%s4721_s25 + $0x4a] sm:$0xff] }
  0x1f   : > { %4161 = vmatmul.mubr.msk.bf16.gmra.mrb[4].mxu0 %vm221_vm2, %v4780_v42  ;;  %4028 = vmatprep.mubr.msk.bf16.mxu1 %vm221_vm2, %v4782_v43  ;;  %v3668_v10 = vld [vmem:[%s4721_s25 + $0x3a] sm:$0xff]  ;;  %v3670_v14 = vld [vmem:[%s4721_s25 + $0x52] sm:$0xff]  ;;  %v4850_v15 = vpack.c.bf16 %v191_v7, %v190_v6  ;;  %v3795_v16 = vld [vmem:[%s5287_s1 + $0xe] sm:$0x3]  ;;  %v4857_v18 = vpack.c.bf16 %v193_v12, %v192_v11 }
  0x20   : > { %4164 = vmatprep.mubr.msk.bf16.mxu0 %vm221_vm2, %v4784_v44  ;;  %v4855_v17 = vpack.c.bf16 %v3668_v10, %v3667_v9  ;;  %v4859_v19 = vpack.c.bf16 %v3670_v14, %v3669_v13  ;;  %v4862_v22 = vand.u32 %v3795_v16, %v4702_v5  ;;  %v194_v23 = vld [vmem:[%s4721_s25 + $0x108] sm:$0xff]  ;;  %v195_v24 = vld [vmem:[%s4721_s25 + $0x110] sm:$0xff]  ;;  %v196_v28 = vld [vmem:[%s4721_s25 + $0x120] sm:$0xff] }
  0x21   : > { %v3671_v26 = vld [vmem:[%s4721_s25 + $0x62] sm:$0xff]  ;;  %v3672_v27 = vld [vmem:[%s4721_s25 + $0x6a] sm:$0xff]  ;;  %v3673_v34 = vld [vmem:[%s4721_s25 + $0x7a] sm:$0xff]  ;;  %v4882_v36 = vpack.c.bf16 %v195_v24, %v194_v23 }
  0x22   : > { %v197_v33 = vld [vmem:[%s4721_s25 + $0x128] sm:$0xff]  ;;  %v4884_v37 = vpack.c.bf16 %v3672_v27, %v3671_v26  ;;  %v199_v40 = vld [vmem:[%s4721_s25 + $0x140] sm:$0xff]  ;;  %v3675_v45 = vld [vmem:[%s4721_s25 + $0x92] sm:$0xff] }
  0x23   : > { %v3674_v35 = vld [vmem:[%s4721_s25 + $0x82] sm:$0xff]  ;;  %v4886_v38 = vpack.c.bf16 %v197_v33, %v196_v28  ;;  %v3676_v46 = vld [vmem:[%s4721_s25 + $0x9a] sm:$0xff]  ;;  %v200_v47 = vld [vmem:[%s4721_s25 + $0x150] sm:$0xff] }
  0x24   : > { %v4888_v39 = vpack.c.bf16 %v3674_v35, %v3673_v34  ;;  %v201_v48 = vld [vmem:[%s4721_s25 + $0x158] sm:$0xff]  ;;  %v3677_v49 = vld [vmem:[%s4721_s25 + $0xaa] sm:$0xff]  ;;  %v4908_v52 = vpack.c.bf16 %v3676_v46, %v3675_v45  ;;  %v3679_v61 = vld [vmem:[%s4721_s25 + $0xc2] sm:$0xff] }
  0x25   : > { %v3678_v50 = vld [vmem:[%s4721_s25 + $0xb2] sm:$0xff]  ;;  %v4910_v57 = vpack.c.bf16 %v201_v48, %v200_v47  ;;  %v202_v59 = vld [vmem:[%s4721_s25 + $0x168] sm:$0xff]  ;;  %v3681_v6 = vld [vmem:[%s4721_s25 + $0xda] sm:$0xff] }
  0x26   : > { %4029 = vmatmul.mubr.msk.bf16.gmra.mrb[8].mxu1 %vm221_vm2, %v4802_v53  ;;  %v4912_v58 = vpack.c.bf16 %v3678_v50, %v3677_v49  ;;  %v203_v60 = vld [vmem:[%s4721_s25 + $0x170] sm:$0xff]  ;;  %v470_v63 = vld [vmem:[%s4721_s25 + $0x1] sm:$0xff] }
  0x27   : > { %4165 = vmatmul.mubr.msk.bf16.gmra.mrb[8].mxu0 %vm221_vm2, %v4804_v54  ;;  %4032 = vmatprep.mubr.msk.bf16.mxu1 %vm221_vm2, %v4806_v55  ;;  %v3680_v62 = vld [vmem:[%s4721_s25 + $0xca] sm:$0xff]  ;;  %v3682_v7 = vld [vmem:[%s4721_s25 + $0xe2] sm:$0xff]  ;;  %v4930_v9 = vpack.c.bf16 %v203_v60, %v202_v59  ;;  %v3683_v13 = vld [vmem:[%s4721_s25 + $0xf2] sm:$0xff] }
  0x28   : > { %4168 = vmatprep.mubr.msk.bf16.mxu0 %vm221_vm2, %v4808_v56  ;;  %v471_v0 = vld [vmem:[%s4721_s25 + $0x9] sm:$0xff]  ;;  %v4932_v10 = vpack.c.bf16 %v3680_v62, %v3679_v61  ;;  %v4934_v12 = vpack.c.bf16 %v3682_v7, %v3681_v6  ;;  %v3684_v14 = vld [vmem:[%s4721_s25 + $0xfa] sm:$0xff]  ;;  %v3686_v23 = vld [vmem:[%s4721_s25 + $0x112] sm:$0xff] }
  0x29   : > { %v502_v11 = vpack.c.bf16 %v471_v0, %v470_v63  ;;  %v3685_v16 = vld [vmem:[%s4721_s25 + $0x10a] sm:$0xff]  ;;  %v3599_v24 = vld [vmem:[%s5287_s1 + $0x6] sm:$0x3]  ;;  %v4950_v26 = vpack.c.bf16 %v3684_v14, %v3683_v13  ;;  %v3689_v35 = vld [vmem:[%s4721_s25 + $0x13a] sm:$0xff] }
  0x2a   : > { %v4952_v27 = vpack.c.bf16 %v3686_v23, %v3685_v16  ;;  %v4955_v28 = vand.u32 %v3599_v24, %v4702_v5  ;;  %v3687_v33 = vld [vmem:[%s4721_s25 + $0x122] sm:$0xff]  ;;  %v3688_v34 = vld [vmem:[%s4721_s25 + $0x12a] sm:$0xff]  ;;  %v3692_v45 = vld [vmem:[%s4721_s25 + $0x15a] sm:$0xff] }
  0x2b   : > { %v3693_v46 = vld [vmem:[%s4721_s25 + $0x16a] sm:$0xff]  ;;  %v3694_v47 = vld [vmem:[%s4721_s25 + $0x172] sm:$0xff]  ;;  %v3695_v50 = vld [vmem:[%s4721_s25 + $0x182] sm:$0xff] }
  0x2c   : > { %v4989_v49 = vpack.c.bf16 %v3694_v47, %v3693_v46  ;;  %v3696_v59 = vld [vmem:[%s4721_s25 + $0x18a] sm:$0xff]  ;;  %v488_v61 = vld [vmem:[%s4721_s25 + $0xd9] sm:$0xff]  ;;  %v489_v62 = vld [vmem:[%s4721_s25 + $0xe1] sm:$0xff] }
  0x2d   : > { %v5001_v60 = vpack.c.bf16 %v3696_v59, %v3695_v50  ;;  %v490_v63 = vld [vmem:[%s4721_s25 + $0xf1] sm:$0xff]  ;;  %v491_v0 = vld [vmem:[%s4721_s25 + $0xf9] sm:$0xff]  ;;  %v5015_v6 = vpack.c.bf16 %v489_v62, %v488_v61  ;;  %v492_v14 = vld [vmem:[%s4721_s25 + $0x109] sm:$0xff] }
  0x2e   : > { %4033 = vmatmul.mubr.msk.bf16.gmra.mrb[12].mxu1 %vm221_vm2, %v4826_v1  ;;  %v3844_v7 = vld [vmem:[%s5287_s1 + $0x10] sm:$0x3]  ;;  %v828_v50 = vld [vmem:[%s4721_s25 + $0x2] sm:$0xff] }
  0x2f   : > { %4169 = vmatmul.mubr.msk.bf16.gmra.mrb[12].mxu0 %vm221_vm2, %v4828_v2  ;;  %4036 = vmatprep.mubr.msk.bf16.mxu1 %vm221_vm2, %v4830_v3  ;;  %v5023_v13 = vand.u32 %v3844_v7, %v4702_v5  ;;  %v493_v16 = vld [vmem:[%s4721_s25 + $0x111] sm:$0xff]  ;;  %v494_v5 = vld [vmem:[%s4721_s25 + $0x121] sm:$0xff]  ;;  %v495_v23 = vld [vmem:[%s4721_s25 + $0x129] sm:$0xff] }
  0x30   : > { %4190 = vmatprep.mubr.msk.bf16.mxu0 %vm221_vm2, %v4832_v4  ;;  %v5039_v24 = vpack.c.bf16 %v493_v16, %v492_v14  ;;  %v500_v46 = vld [vmem:[%s4721_s25 + $0x169] sm:$0xff]  ;;  %v501_v47 = vld [vmem:[%s4721_s25 + $0x171] sm:$0xff]  ;;  %v3745_v7 = vld [vmem:[%s4721_s25 + $0x1a0] sm:$0xff] }
  0x31   : > { %v829_v59 = vld [vmem:[%s4721_s25 + $0xa] sm:$0xff]  ;;  %v5071_v61 = vpack.c.bf16 %v501_v47, %v500_v46 }
  0x32   : > { %v860_v62 = vpack.c.bf16 %v829_v59, %v828_v50 }
  0x36   : > { %4037 = vmatmul.mubr.msk.bf16.gmra.mrb[16].mxu1 %vm221_vm2, %v4850_v15 }
  0x37   : > { %4191 = vmatmul.mubr.msk.bf16.vlgmr.msra.gmra.mrb[0].mxu0 %vm221_vm2, %v4855_v17  ;;  %4040 = vmatprep.mubr.msk.bf16.mxu1 %vm221_vm2, %v4857_v18 }
  0x38   : > { %4194 = vmatprep.mubr.msk.bf16.mxu0 %vm221_vm2, %v4859_v19  ;;  %4223 = vmatpush3.bf16.msra.mxu0 %v4760_v32  ;;  %v198_v32 = vld [vmem:[%s4721_s25 + $0x138] sm:$0xff] }
  0x39   : > { %4256 = vmatprep.subr.bf16.mxu0 %v4862_v22  ;;  %v4906_v51 = vpack.c.bf16 %v199_v40, %v198_v32  ;;  %v3690_v32 = vld [vmem:[%s4721_s25 + $0x142] sm:$0xff]  ;;  %v3691_v40 = vld [vmem:[%s4721_s25 + $0x152] sm:$0xff] }
  0x3a   : > { %v4987_v48 = vpack.c.bf16 %v3692_v45, %v3691_v40 }
  0x3e   : > { %4041 = vmatmul.mubr.msk.bf16.gmra.mrb[20].mxu1 %vm221_vm2, %v4882_v36 }
  0x3f   : > { %4195 = vmatmul.mubr.msk.bf16.gmra.mrb[4].mxu0 %vm221_vm2, %v4884_v37  ;;  %4044 = vmatprep.mubr.msk.bf16.mxu1 %vm221_vm2, %v4886_v38 }
  0x40   : > { %4198 = vmatprep.mubr.msk.bf16.mxu0 %vm221_vm2, %v4888_v39 }
  0x46   : > { %4045 = vmatmul.mubr.msk.bf16.gmra.mrb[24].mxu1 %vm221_vm2, %v4906_v51 }
  0x47   : > { %4199 = vmatmul.mubr.msk.bf16.gmra.mrb[8].mxu0 %vm221_vm2, %v4908_v52  ;;  %4048 = vmatprep.mubr.msk.bf16.mxu1 %vm221_vm2, %v4910_v57 }
  0x48   : > { %4202 = vmatprep.mubr.msk.bf16.mxu0 %vm221_vm2, %v4912_v58 }
  0x4e   : > { %4049 = vmatmul.mubr.msk.bf16.gmra.mrb[28].mxu1 %vm221_vm2, %v4930_v9 }
  0x4f   : > { %4203 = vmatmul.mubr.msk.bf16.gmra.mrb[12].mxu0 %vm221_vm2, %v4932_v10  ;;  %4054 = vmatprep.mubr.msk.bf16.mxu1 %vm221_vm2, %v502_v11  ;;  %v5020_v11 = vpack.c.bf16 %v491_v0, %v490_v63  ;;  %v3744_v0 = vld [vmem:[%s4721_s25 + $0x198] sm:$0xff] }
  0x50   : > { %4206 = vmatprep.mubr.msk.bf16.mxu0 %vm221_vm2, %v4934_v12  ;;  %v2309_v14 = vpack.c.bf16 %v3745_v7, %v3744_v0 }
  0x56   : > { %4055 = vmatmul.mubr.msk.bf16.vlgmr.msra.gmra.mrb[0].mxu1 %vm221_vm2, %v4735_v20  ;;  %v4971_v20 = vpack.c.bf16 %v3688_v34, %v3687_v33  ;;  %v5041_v33 = vpack.c.bf16 %v495_v23, %v494_v5  ;;  %v497_v34 = vld [vmem:[%s4721_s25 + $0x141] sm:$0xff] }
  0x57   : > { %4087 = vmatpush3.bf16.msra.mxu1 %v4749_v29  ;;  %4207 = vmatmul.mubr.msk.bf16.gmra.mrb[16].mxu0 %vm221_vm2, %v4950_v26  ;;  %v4973_v29 = vpack.c.bf16 %v3690_v32, %v3689_v35  ;;  %v498_v35 = vld [vmem:[%s4721_s25 + $0x151] sm:$0xff]  ;;  %v499_v32 = vld [vmem:[%s4721_s25 + $0x159] sm:$0xff] }
  0x58   : > { %4058 = vmatprep.mubr.msk.bf16.mxu1 %vm221_vm2, %v4743_v25  ;;  %4210 = vmatprep.mubr.msk.bf16.mxu0 %vm221_vm2, %v4952_v27  ;;  %v5057_v45 = vpack.c.bf16 %v499_v32, %v498_v35 }
  0x59   : > { %4120 = vmatprep.subr.bf16.mxu1 %v4955_v28 }
  0x5e   : > { %4059 = vmatmul.mubr.msk.bf16.gmra.mrb[4].mxu1 %vm221_vm2, %v4757_v31 }
  0x5f   : > { %4211 = vmatmul.mubr.msk.bf16.gmra.mrb[20].mxu0 %vm221_vm2, %v4971_v20  ;;  %4062 = vmatprep.mubr.msk.bf16.mxu1 %vm221_vm2, %v4780_v42 }
  0x60   : > { %4214 = vmatprep.mubr.msk.bf16.mxu0 %vm221_vm2, %v4973_v29 }
  0x66   : > { %4063 = vmatmul.mubr.msk.bf16.gmra.mrb[8].mxu1 %vm221_vm2, %v4784_v44 }
  0x67   : > { %4215 = vmatmul.mubr.msk.bf16.gmra.mrb[24].mxu0 %vm221_vm2, %v4987_v48  ;;  %4066 = vmatprep.mubr.msk.bf16.mxu1 %vm221_vm2, %v4804_v54 }
  0x68   : > { %4218 = vmatprep.mubr.msk.bf16.mxu0 %vm221_vm2, %v4989_v49 }
  0x6e   : > { %4067 = vmatmul.mubr.msk.bf16.gmra.mrb[12].mxu1 %vm221_vm2, %v4808_v56 }
  0x6f   : > { %4219 = vmatmul.mubr.msk.bf16.gmra.mrb[28].mxu0 %vm221_vm2, %v5001_v60  ;;  %4070 = vmatprep.mubr.msk.bf16.mxu1 %vm221_vm2, %v4828_v2 }
  0x70   : > { %4224 = vmatprep.mubr.msk.bf16.mxu0 %vm221_vm2, %v4755_v30 }
  0x76   : > { %4071 = vmatmul.mubr.msk.bf16.gmra.mrb[16].mxu1 %vm221_vm2, %v5015_v6 }
  0x77   : > { %4225 = vmatmul.mubr.msk.bf16.vlgmr.msra.gmra.mrb[0].mxu0 %vm221_vm2, %v4777_v41  ;;  %4074 = vmatprep.mubr.msk.bf16.mxu1 %vm221_vm2, %v5020_v11 }
  0x78   : > { %4228 = vmatprep.mubr.msk.bf16.mxu0 %vm221_vm2, %v4782_v43  ;;  %4257 = vmatpush3.bf16.msra.mxu0 %v4862_v22  ;;  %v496_v22 = vld [vmem:[%s4721_s25 + $0x139] sm:$0xff] }
  0x79   : > { %4290 = vmatprep.subr.bf16.mxu0 %v5023_v13  ;;  %v5055_v40 = vpack.c.bf16 %v497_v34, %v496_v22  ;;  %v5256_v34 = vld [vmem:[%s5288_s2] ss:$0 sm:$0xff] }
  0x7e   : > { %4075 = vmatmul.mubr.msk.bf16.gmra.mrb[20].mxu1 %vm221_vm2, %v5039_v24 }
  0x7f   : > { %4229 = vmatmul.mubr.msk.bf16.gmra.mrb[4].mxu0 %vm221_vm2, %v4802_v53  ;;  %4078 = vmatprep.mubr.msk.bf16.mxu1 %vm221_vm2, %v5041_v33 }
  0x80   : > { %4232 = vmatprep.mubr.msk.bf16.mxu0 %vm221_vm2, %v4806_v55 }
  0x86   : > { %4079 = vmatmul.mubr.msk.bf16.gmra.mrb[24].mxu1 %vm221_vm2, %v5055_v40 }
  0x87   : > { %4233 = vmatmul.mubr.msk.bf16.gmra.mrb[8].mxu0 %vm221_vm2, %v4826_v1  ;;  %4082 = vmatprep.mubr.msk.bf16.mxu1 %vm221_vm2, %v5057_v45 }
  0x88   : > { %4236 = vmatprep.mubr.msk.bf16.mxu0 %vm221_vm2, %v4830_v3 }
  0x8e   : > { %4083 = vmatmul.mubr.msk.bf16.gmra.mrb[28].mxu1 %vm221_vm2, %v5071_v61 }
  0x8f   : > { %4237 = vmatmul.mubr.msk.bf16.gmra.mrb[12].mxu0 %vm221_vm2, %v4850_v15  ;;  %4088 = vmatprep.mubr.msk.bf16.mxu1 %vm221_vm2, %v860_v62 }
  0x90   : > { %4240 = vmatprep.mubr.msk.bf16.mxu0 %vm221_vm2, %v4857_v18 }
  0x96   : > { %4089 = vmatmul.mubr.msk.bf16.vlgmr.msra.gmra.mrb[0].mxu1 %vm221_vm2, %v4832_v4  ;;  %v3742_v4 = vld [vmem:[%s4721_s25 + $0x180] sm:$0xff] }
  0x97   : > { %4121 = vmatpush3.bf16.msra.mxu1 %v4955_v28  ;;  %4241 = vmatmul.mubr.msk.bf16.gmra.mrb[16].mxu0 %vm221_vm2, %v4882_v36  ;;  %v3743_v28 = vld [vmem:[%s4721_s25 + $0x188] sm:$0xff] }
  0x98   : > { %4092 = vmatprep.mubr.msk.bf16.mxu1 %vm221_vm2, %v4855_v17  ;;  %4244 = vmatprep.mubr.msk.bf16.mxu0 %vm221_vm2, %v4886_v38  ;;  %v5100_v63 = vpack.c.bf16 %v3743_v28, %v3742_v4 }
  0x99   : > { %4324 = vmatprep.subr.bf16.mxu1 %v4711_v8 }
  0x9e   : > { %4093 = vmatmul.mubr.msk.bf16.gmra.mrb[4].mxu1 %vm221_vm2, %v4859_v19 }
  0x9f   : > { %4245 = vmatmul.mubr.msk.bf16.gmra.mrb[20].mxu0 %vm221_vm2, %v4906_v51  ;;  %4096 = vmatprep.mubr.msk.bf16.mxu1 %vm221_vm2, %v4884_v37 }
  0xa0   : > { %4248 = vmatprep.mubr.msk.bf16.mxu0 %vm221_vm2, %v4910_v57 }
  0xa6   : > { %4097 = vmatmul.mubr.msk.bf16.gmra.mrb[8].mxu1 %vm221_vm2, %v4888_v39 }
  0xa7   : > { %4249 = vmatmul.mubr.msk.bf16.gmra.mrb[24].mxu0 %vm221_vm2, %v4930_v9  ;;  %4100 = vmatprep.mubr.msk.bf16.mxu1 %vm221_vm2, %v4908_v52 }
  0xa8   : > { %4252 = vmatprep.mubr.msk.bf16.mxu0 %vm221_vm2, %v5100_v63 }
  0xae   : > { %4101 = vmatmul.mubr.msk.bf16.gmra.mrb[12].mxu1 %vm221_vm2, %v4912_v58 }
  0xaf   : > { %4253 = vmatmul.mubr.msk.bf16.gmra.mrb[28].mxu0 %vm221_vm2, %v2309_v14  ;;  %4104 = vmatprep.mubr.msk.bf16.mxu1 %vm221_vm2, %v4932_v10 }
  0xb0   : > { %4258 = vmatprep.mubr.msk.bf16.mxu0 %vm221_vm2, %v4743_v25 }
  0xb6   : > { %4105 = vmatmul.mubr.msk.bf16.gmra.mrb[16].mxu1 %vm221_vm2, %v4934_v12 }
  0xb7   : > { %4259 = vmatmul.mubr.msk.bf16.vlgmr.msra.gmra.mrb[0].mxu0 %vm221_vm2, %v4757_v31  ;;  %4108 = vmatprep.mubr.msk.bf16.mxu1 %vm221_vm2, %v4950_v26  ;;  %v3794_v31 = vld [vmem:[%s4721_s25 + $0x1a1] sm:$0xff] }
  0xb8   : > { %4262 = vmatprep.mubr.msk.bf16.mxu0 %vm221_vm2, %v4780_v42  ;;  %4291 = vmatpush3.bf16.msra.mxu0 %v5023_v13  ;;  %v3842_v42 = vld [vmem:[%s4721_s25 + $0x19a] sm:$0xff] }
  0xbe   : > { %4109 = vmatmul.mubr.msk.bf16.gmra.mrb[20].mxu1 %vm221_vm2, %v4952_v27 }
  0xbf   : > { %4263 = vmatmul.mubr.msk.bf16.gmra.mrb[4].mxu0 %vm221_vm2, %v4784_v44  ;;  %4112 = vmatprep.mubr.msk.bf16.mxu1 %vm221_vm2, %v4971_v20 }
  0xc0   : > { %4266 = vmatprep.mubr.msk.bf16.mxu0 %vm221_vm2, %v4804_v54 }
  0xc6   : > { %4113 = vmatmul.mubr.msk.bf16.gmra.mrb[24].mxu1 %vm221_vm2, %v4973_v29 }
  0xc7   : > { %4267 = vmatmul.mubr.msk.bf16.gmra.mrb[8].mxu0 %vm221_vm2, %v4808_v56  ;;  %4116 = vmatprep.mubr.msk.bf16.mxu1 %vm221_vm2, %v4987_v48 }
  0xc8   : > { %4270 = vmatprep.mubr.msk.bf16.mxu0 %vm221_vm2, %v4828_v2 }
  0xce   : > { %4117 = vmatmul.mubr.msk.bf16.gmra.mrb[28].mxu1 %vm221_vm2, %v4989_v49 }
  0xcf   : > { %4271 = vmatmul.mubr.msk.bf16.gmra.mrb[12].mxu0 %vm221_vm2, %v5015_v6  ;;  %4122 = vmatprep.mubr.msk.bf16.mxu1 %vm221_vm2, %v4737_v21  ;;  %v3792_v21 = vld [vmem:[%s4721_s25 + $0x189] sm:$0xff] }
  0xd0   : > { %4274 = vmatprep.mubr.msk.bf16.mxu0 %vm221_vm2, %v5020_v11 }
  0xd6   : > { %4123 = vmatmul.mubr.msk.bf16.vlgmr.msra.gmra.mrb[0].mxu1 %vm221_vm2, %v4755_v30  ;;  %v3793_v30 = vld [vmem:[%s4721_s25 + $0x199] sm:$0xff] }
  0xd7   : > { %4325 = vmatpush3.bf16.msra.mxu1 %v4711_v8  ;;  %4275 = vmatmul.mubr.msk.bf16.gmra.mrb[16].mxu0 %vm221_vm2, %v5039_v24  ;;  %v3791_v8 = vld [vmem:[%s4721_s25 + $0x181] sm:$0xff] }
  0xd8   : > { %4126 = vmatprep.mubr.msk.bf16.mxu1 %vm221_vm2, %v4777_v41  ;;  %4278 = vmatprep.mubr.msk.bf16.mxu0 %vm221_vm2, %v5041_v33  ;;  %v2666_v25 = vpack.c.bf16 %v3792_v21, %v3791_v8  ;;  %v2667_v41 = vpack.c.bf16 %v3794_v31, %v3793_v30 }
  0xde   : > { %4127 = vmatmul.mubr.msk.bf16.gmra.mrb[4].mxu1 %vm221_vm2, %v4782_v43  ;;  %v3843_v43 = vld [vmem:[%s4721_s25 + $0x1a2] sm:$0xff] }
  0xdf   : > { %4279 = vmatmul.mubr.msk.bf16.gmra.mrb[20].mxu0 %vm221_vm2, %v5055_v40  ;;  %4130 = vmatprep.mubr.msk.bf16.mxu1 %vm221_vm2, %v4802_v53  ;;  %v3025_v44 = vpack.c.bf16 %v3843_v43, %v3842_v42 }
  0xe0   : > { %4282 = vmatprep.mubr.msk.bf16.mxu0 %vm221_vm2, %v5057_v45 }
  0xe6   : > { %4131 = vmatmul.mubr.msk.bf16.gmra.mrb[8].mxu1 %vm221_vm2, %v4806_v55 }
  0xe7   : > { %4283 = vmatmul.mubr.msk.bf16.gmra.mrb[24].mxu0 %vm221_vm2, %v5071_v61  ;;  %4134 = vmatprep.mubr.msk.bf16.mxu1 %vm221_vm2, %v4826_v1 }
  0xe8   : > { %4286 = vmatprep.mubr.msk.bf16.mxu0 %vm221_vm2, %v2666_v25 }
  0xee   : > { %4135 = vmatmul.mubr.msk.bf16.gmra.mrb[12].mxu1 %vm221_vm2, %v4830_v3 }
  0xef   : > { %4287 = vmatmul.mubr.msk.bf16.gmra.mrb[28].mxu0 %vm221_vm2, %v2667_v41  ;;  %4138 = vmatprep.mubr.msk.bf16.mxu1 %vm221_vm2, %v4850_v15 }
  0xf0   : > { %4292 = vmatprep.mubr.msk.bf16.mxu0 %vm221_vm2, %v4855_v17 }
  0xf6   : > { %4139 = vmatmul.mubr.msk.bf16.gmra.mrb[16].mxu1 %vm221_vm2, %v4857_v18 }
  0xf7   : > { %4293 = vmatmul.mubr.msk.bf16.vlgmr.msra.gmra.mrb[0].mxu0 %vm221_vm2, %v4859_v19  ;;  %4142 = vmatprep.mubr.msk.bf16.mxu1 %vm221_vm2, %v4882_v36 }
  0xf8   : > { %4296 = vmatprep.mubr.msk.bf16.mxu0 %vm221_vm2, %v4884_v37 }
  0xfe   : > { %4143 = vmatmul.mubr.msk.bf16.gmra.mrb[20].mxu1 %vm221_vm2, %v4886_v38 }
  0xff   : > { %4297 = vmatmul.mubr.msk.bf16.gmra.mrb[4].mxu0 %vm221_vm2, %v4888_v39  ;;  %4146 = vmatprep.mubr.msk.bf16.mxu1 %vm221_vm2, %v4906_v51 }
 0x100   : > { %4300 = vmatprep.mubr.msk.bf16.mxu0 %vm221_vm2, %v4908_v52 }
 0x106   : > { %4147 = vmatmul.mubr.msk.bf16.gmra.mrb[24].mxu1 %vm221_vm2, %v4910_v57 }
 0x107   : > { %4301 = vmatmul.mubr.msk.bf16.gmra.mrb[8].mxu0 %vm221_vm2, %v4912_v58  ;;  %4150 = vmatprep.mubr.msk.bf16.mxu1 %vm221_vm2, %v4930_v9 }
 0x108   : > { %4304 = vmatprep.mubr.msk.bf16.mxu0 %vm221_vm2, %v4932_v10 }
 0x10e   : > { %4151 = vmatmul.mubr.msk.bf16.gmra.mrb[28].mxu1 %vm221_vm2, %v5100_v63 }
 0x10f   : > { %4305 = vmatmul.mubr.msk.bf16.gmra.mrb[12].mxu0 %vm221_vm2, %v4934_v12  ;;  %4172 = vmatprep.mubr.msk.bf16.mxu1 %vm221_vm2, %v5015_v6 }
 0x110   : > { %4308 = vmatprep.mubr.msk.bf16.mxu0 %vm221_vm2, %v4950_v26 }
 0x116   : > { %4173 = vmatmul.mubr.msk.bf16.vlgmr.msra.gmra.mrb[16].mxu1 %vm221_vm2, %v5020_v11 }
 0x117   : > { %4309 = vmatmul.mubr.msk.bf16.gmra.mrb[16].mxu0 %vm221_vm2, %v4952_v27  ;;  %4176 = vmatprep.mubr.msk.bf16.mxu1 %vm221_vm2, %v5039_v24 }
 0x118   : > { %4312 = vmatprep.mubr.msk.bf16.mxu0 %vm221_vm2, %v4971_v20 }
 0x11e   : > { %4177 = vmatmul.mubr.msk.bf16.gmra.mrb[20].mxu1 %vm221_vm2, %v5041_v33 }
 0x11f   : > { %4313 = vmatmul.mubr.msk.bf16.gmra.mrb[20].mxu0 %vm221_vm2, %v4973_v29  ;;  %4180 = vmatprep.mubr.msk.bf16.mxu1 %vm221_vm2, %v5055_v40 }
 0x120   : > { %4316 = vmatprep.mubr.msk.bf16.mxu0 %vm221_vm2, %v4987_v48 }
 0x126   : > { %4181 = vmatmul.mubr.msk.bf16.gmra.mrb[24].mxu1 %vm221_vm2, %v5057_v45 }
 0x127   : > { %4317 = vmatmul.mubr.msk.bf16.gmra.mrb[24].mxu0 %vm221_vm2, %v4989_v49  ;;  %4184 = vmatprep.mubr.msk.bf16.mxu1 %vm221_vm2, %v5071_v61 }
 0x128   : > { %4320 = vmatprep.mubr.msk.bf16.mxu0 %vm221_vm2, %v5001_v60 }
 0x12e   : > { %4185 = vmatmul.mubr.msk.bf16.gmra.mrb[28].mxu1 %vm221_vm2, %v2666_v25 }
 0x12f   : > { %4321 = vmatmul.mubr.msk.bf16.gmra.mrb[28].mxu0 %vm221_vm2, %v3025_v44 }
 0x1a9   : > { %v4124_v53 = vpop.f32.mrb[0].mxu1 }
 0x1aa   : > { %v1322_v54 = vpop.f32.mrb[1].mxu1 }
 0x1ab   : > { %v4125_v55 = vpop.f32.mrb[2].mxu1 }
 0x1ac   : > { %v1325_v56 = vpop.f32.mrb[3].mxu1 }
 0x1b1   : > { %v4128_v1 = vpop.f32.mrb[4].mxu1 }
 0x1b2   : > { %v1338_v2 = vpop.f32.mrb[5].mxu1 }
 0x1b3   : > { %v4129_v3 = vpop.f32.mrb[6].mxu1 }
 0x1b4   : > { %v1341_v15 = vpop.f32.mrb[7].mxu1 }
 0x1b9   : > { %v4132_v17 = vpop.f32.mrb[8].mxu1 }
 0x1ba   : > { %v1354_v18 = vpop.f32.mrb[9].mxu1 }
 0x1bb   : > { %v4133_v19 = vpop.f32.mrb[10].mxu1 }
 0x1bc   : > { %v1357_v36 = vpop.f32.mrb[11].mxu1 }
 0x1c1   : > { %v4136_v37 = vpop.f32.mrb[12].mxu1 }
 0x1c2   : > { %v5247_v38 = vpop.f32.mrb[13].mxu1 }
 0x1c3   : > { %v5249_v39 = vpop.f32.mrb[14].mxu1 }
 0x1c4   : > { %v5251_v51 = vpop.f32.mrb[15].mxu1 }
 0x1ca   : > { %v4294_v52 = vpop.f32.mrb[0].mxu0 }
 0x1cb   : > { %v4328_v57 = vadd.f32 %v4294_v52, %v4124_v53  ;;  %v3113_v58 = vpop.f32.mrb[1].mxu0 }
 0x1cc   : > { %v4331_v9 = vadd.f32 %v3113_v58, %v1322_v54  ;;  %v4295_v10 = vpop.f32.mrb[2].mxu0 }
 0x1cd   : > { %3306 = vst [vmem:[#allocation2 + $0x10] sm:$0xff] %v4328_v57  ;;  %v4334_v12 = vadd.f32 %v4295_v10, %v4125_v55  ;;  %v3116_v26 = vpop.f32.mrb[3].mxu0 }
 0x1ce   : > { %3304 = vst [vmem:[#allocation2] sm:$0xff] %v4331_v9  ;;  %v4337_v27 = vadd.f32 %v3116_v26, %v1325_v56 }
 0x1cf   : > { %3307 = vst [vmem:[#allocation2 + $0x18] sm:$0xff] %v4334_v12 }
 0x1d0   : > { %3305 = vst [vmem:[#allocation2 + $0x8] sm:$0xff] %v4337_v27 }
 0x1d2   : > { %v4298_v20 = vpop.f32.mrb[4].mxu0 }
 0x1d3   : > { %v4340_v29 = vadd.f32 %v4298_v20, %v4128_v1  ;;  %v3129_v48 = vpop.f32.mrb[5].mxu0 }
 0x1d4   : > { %v4343_v49 = vadd.f32 %v3129_v48, %v1338_v2  ;;  %v4299_v60 = vpop.f32.mrb[6].mxu0 }
 0x1d5   : > { %3310 = vst [vmem:[#allocation2 + $0x30] sm:$0xff] %v4340_v29  ;;  %v4346_v6 = vadd.f32 %v4299_v60, %v4129_v3  ;;  %v3132_v11 = vpop.f32.mrb[7].mxu0 }
 0x1d6   : > { %v3338_v13 = vld [vmem:[#allocation2 + $0x10] ss:$2 sm:$0xff]  ;;  %v3370_v16 = vld [vmem:[#allocation2 + $0x11] ss:$2 sm:$0xff]  ;;  %3308 = vst [vmem:[#allocation2 + $0x20] sm:$0xff] %v4343_v49  ;;  %v4349_v5 = vadd.f32 %v3132_v11, %v1341_v15 }
 0x1d7   : > { %v3400_v23 = vmax.f32 %v3338_v13, %v3370_v16  ;;  %v3336_v24 = vld [vmem:[#allocation2] ss:$2 sm:$0xff]  ;;  %v3368_v33 = vld [vmem:[#allocation2 + $0x1] ss:$2 sm:$0xff]  ;;  %3311 = vst [vmem:[#allocation2 + $0x38] sm:$0xff] %v4346_v6 }
 0x1d8   : > { %v3399_v22 = vmax.f32 %v3336_v24, %v3368_v33  ;;  %3309 = vst [vmem:[#allocation2 + $0x28] sm:$0xff] %v4349_v5 }
 0x1da   : > { %v3415_v35 = vmax.f32 %v3399_v22, %v3400_v23  ;;  %v4302_v32 = vpop.f32.mrb[8].mxu0 }
 0x1db   : > { %v4352_v40 = vadd.f32 %v4302_v32, %v4132_v17  ;;  %v3145_v45 = vpop.f32.mrb[9].mxu0 }
 0x1dc   : > { %v3430_v46 = vadd.f32 %v5256_v34, %v3415_v35  ;;  %v4355_v47 = vadd.f32 %v3145_v45, %v1354_v18  ;;  %v4303_v50 = vpop.f32.mrb[10].mxu0 }
 0x1dd   : > { %3314 = vst [vmem:[#allocation2 + $0x50] sm:$0xff] %v4352_v40  ;;  %v4358_v59 = vadd.f32 %v4303_v50, %v4133_v19  ;;  %v3148_v61 = vpop.f32.mrb[11].mxu0 }
 0x1de   : > { %v3438_v62 = vmax.f32 %v3430_v46, 0.0  ;;  %v3342_v4 = vld [vmem:[#allocation2 + $0x30] ss:$2 sm:$0xff]  ;;  %v3374_v28 = vld [vmem:[#allocation2 + $0x31] ss:$2 sm:$0xff]  ;;  %3312 = vst [vmem:[#allocation2 + $0x40] sm:$0xff] %v4355_v47  ;;  %v4361_v63 = vadd.f32 %v3148_v61, %v1357_v36 }
 0x1df   : > { %v3402_v0 = vmax.f32 %v3342_v4, %v3374_v28  ;;  %v3340_v7 = vld [vmem:[#allocation2 + $0x20] ss:$2 sm:$0xff]  ;;  %v3372_v14 = vld [vmem:[#allocation2 + $0x21] ss:$2 sm:$0xff]  ;;  %3315 = vst [vmem:[#allocation2 + $0x58] sm:$0xff] %v4358_v59 }
 0x1e0   : > { %3446 = vst [vmem:[%s5263_s16] sm:$0xff] %v3438_v62  ;;  %v3401_v8 = vmax.f32 %v3340_v7, %v3372_v14  ;;  %3313 = vst [vmem:[#allocation2 + $0x48] sm:$0xff] %v4361_v63 }
 0x1e2   : > { %v3416_v21 = vmax.f32 %v3401_v8, %v3402_v0  ;;  %v4306_v25 = vpop.f32.mrb[12].mxu0 }
 0x1e3   : > { %v4364_v30 = vadd.f32 %v4306_v25, %v4136_v37  ;;  %v3161_v31 = vpop.f32.mrb[13].mxu0 }
 0x1e4   : > { %v3431_v41 = vadd.f32 %v5256_v34, %v3416_v21  ;;  %v4367_v42 = vadd.f32 %v3161_v31, %v5247_v38  ;;  %v4307_v43 = vpop.f32.mrb[14].mxu0 }
 0x1e5   : > { %3318 = vst [vmem:[#allocation2 + $0x70] sm:$0xff] %v4364_v30  ;;  %v4370_v44 = vadd.f32 %v4307_v43, %v5249_v39  ;;  %v3164_v53 = vpop.f32.mrb[15].mxu0 }
 0x1e6   : > { %v3439_v54 = vmax.f32 %v3431_v41, 0.0  ;;  %v3346_v55 = vld [vmem:[#allocation2 + $0x50] ss:$2 sm:$0xff]  ;;  %v3378_v56 = vld [vmem:[#allocation2 + $0x51] ss:$2 sm:$0xff]  ;;  %3316 = vst [vmem:[#allocation2 + $0x60] sm:$0xff] %v4367_v42  ;;  %v4373_v1 = vadd.f32 %v3164_v53, %v5251_v51 }
 0x1e7   : > { %v3404_v2 = vmax.f32 %v3346_v55, %v3378_v56  ;;  %v3344_v3 = vld [vmem:[#allocation2 + $0x40] ss:$2 sm:$0xff]  ;;  %v3376_v15 = vld [vmem:[#allocation2 + $0x41] ss:$2 sm:$0xff]  ;;  %3319 = vst [vmem:[#allocation2 + $0x78] sm:$0xff] %v4370_v44 }
 0x1e8   : > { %3447 = vst [vmem:[%s5263_s16 + $0x8] sm:$0xff] %v3439_v54  ;;  %v3403_v17 = vmax.f32 %v3344_v3, %v3376_v15  ;;  %3317 = vst [vmem:[#allocation2 + $0x68] sm:$0xff] %v4373_v1 }
 0x1e9   : > { %v4174_v18 = vpop.f32.mrb[16].mxu1 }
 0x1ea   : > { %v3417_v19 = vmax.f32 %v3403_v17, %v3404_v2  ;;  %v4310_v36 = vpop.f32.mrb[16].mxu0  ;;  %v1744_v37 = vpop.f32.mrb[17].mxu1 }
 0x1eb   : > { %v4376_v38 = vadd.f32 %v4310_v36, %v4174_v18  ;;  %v3177_v39 = vpop.f32.mrb[17].mxu0  ;;  %v4175_v52 = vpop.f32.mrb[18].mxu1 }
 0x1ec   : > { %v3432_v57 = vadd.f32 %v5256_v34, %v3417_v19  ;;  %v4379_v58 = vadd.f32 %v3177_v39, %v1744_v37  ;;  %v4311_v9 = vpop.f32.mrb[18].mxu0  ;;  %v1747_v51 = vpop.f32.mrb[19].mxu1 }
 0x1ed   : > { %3322 = vst [vmem:[#allocation2 + $0x90] sm:$0xff] %v4376_v38  ;;  %v4382_v10 = vadd.f32 %v4311_v9, %v4175_v52  ;;  %v3180_v12 = vpop.f32.mrb[19].mxu0 }
 0x1ee   : > { %v3440_v26 = vmax.f32 %v3432_v57, 0.0  ;;  %v3350_v27 = vld [vmem:[#allocation2 + $0x70] ss:$2 sm:$0xff]  ;;  %v3382_v20 = vld [vmem:[#allocation2 + $0x71] ss:$2 sm:$0xff]  ;;  %3320 = vst [vmem:[#allocation2 + $0x80] sm:$0xff] %v4379_v58  ;;  %v4385_v29 = vadd.f32 %v3180_v12, %v1747_v51 }
 0x1ef   : > { %v3406_v48 = vmax.f32 %v3350_v27, %v3382_v20  ;;  %v3348_v49 = vld [vmem:[#allocation2 + $0x60] ss:$2 sm:$0xff]  ;;  %v3380_v60 = vld [vmem:[#allocation2 + $0x61] ss:$2 sm:$0xff]  ;;  %3323 = vst [vmem:[#allocation2 + $0x98] sm:$0xff] %v4382_v10 }
 0x1f0   : > { %3448 = vst [vmem:[%s5263_s16 + $0x10] sm:$0xff] %v3440_v26  ;;  %v3405_v6 = vmax.f32 %v3348_v49, %v3380_v60  ;;  %3321 = vst [vmem:[#allocation2 + $0x88] sm:$0xff] %v4385_v29 }
 0x1f1   : > { %v4178_v11 = vpop.f32.mrb[20].mxu1 }
 0x1f2   : > { %v3418_v13 = vmax.f32 %v3405_v6, %v3406_v48  ;;  %v4314_v16 = vpop.f32.mrb[20].mxu0  ;;  %v1760_v5 = vpop.f32.mrb[21].mxu1 }
 0x1f3   : > { %v4388_v23 = vadd.f32 %v4314_v16, %v4178_v11  ;;  %v3193_v24 = vpop.f32.mrb[21].mxu0  ;;  %v4179_v33 = vpop.f32.mrb[22].mxu1 }
 0x1f4   : > { %v3433_v22 = vadd.f32 %v5256_v34, %v3418_v13  ;;  %v4391_v35 = vadd.f32 %v3193_v24, %v1760_v5  ;;  %v4315_v32 = vpop.f32.mrb[22].mxu0  ;;  %v1763_v40 = vpop.f32.mrb[23].mxu1 }
 0x1f5   : > { %3326 = vst [vmem:[#allocation2 + $0xb0] sm:$0xff] %v4388_v23  ;;  %v4394_v45 = vadd.f32 %v4315_v32, %v4179_v33  ;;  %v3196_v46 = vpop.f32.mrb[23].mxu0 }
 0x1f6   : > { %v3441_v47 = vmax.f32 %v3433_v22, 0.0  ;;  %v3354_v50 = vld [vmem:[#allocation2 + $0x90] ss:$2 sm:$0xff]  ;;  %v3386_v59 = vld [vmem:[#allocation2 + $0x91] ss:$2 sm:$0xff]  ;;  %3324 = vst [vmem:[#allocation2 + $0xa0] sm:$0xff] %v4391_v35  ;;  %v4397_v61 = vadd.f32 %v3196_v46, %v1763_v40 }
 0x1f7   : > { %v3408_v62 = vmax.f32 %v3354_v50, %v3386_v59  ;;  %v3352_v4 = vld [vmem:[#allocation2 + $0x80] ss:$2 sm:$0xff]  ;;  %v3384_v28 = vld [vmem:[#allocation2 + $0x81] ss:$2 sm:$0xff]  ;;  %3327 = vst [vmem:[#allocation2 + $0xb8] sm:$0xff] %v4394_v45 }
 0x1f8   : > { %3449 = vst [vmem:[%s5263_s16 + $0x18] sm:$0xff] %v3441_v47  ;;  %v3407_v63 = vmax.f32 %v3352_v4, %v3384_v28  ;;  %3325 = vst [vmem:[#allocation2 + $0xa8] sm:$0xff] %v4397_v61 }
 0x1f9   : > { %v4182_v0 = vpop.f32.mrb[24].mxu1 }
 0x1fa   : > { %v3419_v7 = vmax.f32 %v3407_v63, %v3408_v62  ;;  %v4318_v14 = vpop.f32.mrb[24].mxu0  ;;  %v1776_v8 = vpop.f32.mrb[25].mxu1 }
 0x1fb   : > { %v4400_v21 = vadd.f32 %v4318_v14, %v4182_v0  ;;  %v3209_v25 = vpop.f32.mrb[25].mxu0  ;;  %v4183_v30 = vpop.f32.mrb[26].mxu1 }
 0x1fc   : > { %v3434_v31 = vadd.f32 %v5256_v34, %v3419_v7  ;;  %v4403_v41 = vadd.f32 %v3209_v25, %v1776_v8  ;;  %v4319_v42 = vpop.f32.mrb[26].mxu0  ;;  %v1779_v43 = vpop.f32.mrb[27].mxu1 }
 0x1fd   : > { %3330 = vst [vmem:[#allocation2 + $0xd0] sm:$0xff] %v4400_v21  ;;  %v4406_v44 = vadd.f32 %v4319_v42, %v4183_v30  ;;  %v3212_v53 = vpop.f32.mrb[27].mxu0 }
 0x1fe   : > { %v3442_v54 = vmax.f32 %v3434_v31, 0.0  ;;  %v3358_v55 = vld [vmem:[#allocation2 + $0xb0] ss:$2 sm:$0xff]  ;;  %v3390_v56 = vld [vmem:[#allocation2 + $0xb1] ss:$2 sm:$0xff]  ;;  %3328 = vst [vmem:[#allocation2 + $0xc0] sm:$0xff] %v4403_v41  ;;  %v4409_v1 = vadd.f32 %v3212_v53, %v1779_v43 }
 0x1ff   : > { %v3410_v2 = vmax.f32 %v3358_v55, %v3390_v56  ;;  %v3356_v3 = vld [vmem:[#allocation2 + $0xa0] ss:$2 sm:$0xff]  ;;  %v3388_v15 = vld [vmem:[#allocation2 + $0xa1] ss:$2 sm:$0xff]  ;;  %3331 = vst [vmem:[#allocation2 + $0xd8] sm:$0xff] %v4406_v44 }
 0x200   : > { %3450 = vst [vmem:[%s5263_s16 + $0x20] sm:$0xff] %v3442_v54  ;;  %v3409_v17 = vmax.f32 %v3356_v3, %v3388_v15  ;;  %3329 = vst [vmem:[#allocation2 + $0xc8] sm:$0xff] %v4409_v1 }
 0x201   : > { %v4186_v18 = vpop.f32.mrb[28].mxu1 }
 0x202   : > { %v3420_v19 = vmax.f32 %v3409_v17, %v3410_v2  ;;  %v4322_v36 = vpop.f32.mrb[28].mxu0  ;;  %v1792_v37 = vpop.f32.mrb[29].mxu1 }
 0x203   : > { %v4412_v38 = vadd.f32 %v4322_v36, %v4186_v18  ;;  %v3225_v39 = vpop.f32.mrb[29].mxu0  ;;  %v4187_v52 = vpop.f32.mrb[30].mxu1 }
 0x204   : > { %v3435_v57 = vadd.f32 %v5256_v34, %v3420_v19  ;;  %v4415_v58 = vadd.f32 %v3225_v39, %v1792_v37  ;;  %v4323_v9 = vpop.f32.mrb[30].mxu0  ;;  %v1795_v51 = vpop.f32.mrb[31].mxu1 }
 0x205   : > { %3334 = vst [vmem:[#allocation2 + $0xf0] sm:$0xff] %v4412_v38  ;;  %v4418_v10 = vadd.f32 %v4323_v9, %v4187_v52  ;;  %v3228_v12 = vpop.f32.mrb[31].mxu0 }
 0x206   : > { %v3443_v26 = vmax.f32 %v3435_v57, 0.0  ;;  %v3362_v27 = vld [vmem:[#allocation2 + $0xd0] ss:$2 sm:$0xff]  ;;  %v3394_v20 = vld [vmem:[#allocation2 + $0xd1] ss:$2 sm:$0xff]  ;;  %3332 = vst [vmem:[#allocation2 + $0xe0] sm:$0xff] %v4415_v58  ;;  %v4421_v29 = vadd.f32 %v3228_v12, %v1795_v51 }
 0x207   : > { %v3412_v48 = vmax.f32 %v3362_v27, %v3394_v20  ;;  %v3360_v49 = vld [vmem:[#allocation2 + $0xc0] ss:$2 sm:$0xff]  ;;  %v3392_v60 = vld [vmem:[#allocation2 + $0xc1] ss:$2 sm:$0xff]  ;;  %3335 = vst [vmem:[#allocation2 + $0xf8] sm:$0xff] %v4418_v10 }
 0x208   : > { %3451 = vst [vmem:[%s5263_s16 + $0x28] sm:$0xff] %v3443_v26  ;;  %v3411_v6 = vmax.f32 %v3360_v49, %v3392_v60  ;;  %3333 = vst [vmem:[#allocation2 + $0xe8] sm:$0xff] %v4421_v29 }
 0x20a   : > { %v3421_v11 = vmax.f32 %v3411_v6, %v3412_v48 }
 0x20c   : > { %v3436_v13 = vadd.f32 %v5256_v34, %v3421_v11 }
 0x20e   : > { %v3444_v16 = vmax.f32 %v3436_v13, 0.0  ;;  %v3366_v5 = vld [vmem:[#allocation2 + $0xf0] ss:$2 sm:$0xff]  ;;  %v3398_v23 = vld [vmem:[#allocation2 + $0xf1] ss:$2 sm:$0xff] }
 0x20f   : > { %v3414_v24 = vmax.f32 %v3366_v5, %v3398_v23  ;;  %v3364_v33 = vld [vmem:[#allocation2 + $0xe0] ss:$2 sm:$0xff]  ;;  %v3396_v22 = vld [vmem:[#allocation2 + $0xe1] ss:$2 sm:$0xff] }
 0x210   : > { %3452 = vst [vmem:[%s5263_s16 + $0x30] sm:$0xff] %v3444_v16  ;;  %v3413_v35 = vmax.f32 %v3364_v33, %v3396_v22 }
 0x212   : > { %v3422_v32 = vmax.f32 %v3413_v35, %v3414_v24 }
 0x214   : > { %v3437_v40 = vadd.f32 %v5256_v34, %v3422_v32 }
 0x216   : > { %v3445_v45 = vmax.f32 %v3437_v40, 0.0 }
 0x218   : > { %3453 = vst [vmem:[%s5263_s16 + $0x38] sm:$0xff] %v3445_v45 }
 0x219 PF: > { %s13_s12 = sadd.s32 1, %s4662_s12  }
 0x21a   : > { %p10_p4 = scmp.ge.s32.totalorder %s13_s12, 4  }
 0x21c   :  { %12 = sbr.rel (!%p10_p4) target bundleno = 1 (0x1), region = 103 }

// kernel: vgg_forward.5
= control target key start
LH: loop header
LB: loop body
LE: loop exit
PB: predicated region body
PF: predicated region fallthrough
CT: control target
= control target key end

     0   :  { %s4039_s1 = inlined_call_operand.vmem [shape: bf16[512,512], index: 1, kind: input, shape index: {}]   ;;  %s4040_s0 = inlined_call_operand.vmem [shape: f32[8,512], index: 0, kind: input, shape index: {}]   ;;  %s4041_s3 = inlined_call_operand.vmem [shape: bf16[512,512], index: 3, kind: input, shape index: {}]   ;;  %s4042_s5 = inlined_call_operand.vmem [shape: bf16[512,128], index: 5, kind: input, shape index: {}]   ;;  %s4043_s2 = inlined_call_operand.vmem [shape: f32[1,512], index: 2, kind: input, shape index: {}]   ;;  %s4044_s4 = inlined_call_operand.vmem [shape: f32[1,512], index: 4, kind: input, shape index: {}]   ;;  %s4045_s6 = inlined_call_operand.vmem [shape: f32[1,128], index: 6, kind: input, shape index: {}]   ;;  %s4046_s7 = inlined_call_operand.vmem [shape: f32[8,128], index: 7, kind: output, shape index: {}]  }
   0x1   :  { %v2664_v0 = vld [vmem:[%s4039_s1 + $0x4] ss:$16 sps:$4 sm:$0xff]   ;;  %v2666_v1 = vld [vmem:[%s4039_s1 + $0xc] ss:$16 sps:$4 sm:$0xff]   ;;  %v2668_v2 = vld [vmem:[%s4039_s1] ss:$16 sps:$4 sm:$0xff]  }
   0x2   :  { %825 = vmatprep.subr.bf16.mxu0 %v2664_v0  ;;  %v2669_v3 = vld [vmem:[%s4039_s1 + $0x8] ss:$16 sps:$4 sm:$0xff]   ;;  %907 = vmatprep.subr.bf16.mxu1 %v2666_v1  ;;  %v2670_v4 = vld [vmem:[%s4039_s1 + $0x24] ss:$16 sps:$4 sm:$0xff]   ;;  %v2672_v5 = vld [vmem:[%s4039_s1 + $0x2c] ss:$16 sps:$4 sm:$0xff]  }
   0x3   :  { %826 = vmatpush1.bf16.msra.mxu0 %v2668_v2  ;;  %908 = vmatpush1.bf16.msra.mxu1 %v2669_v3  ;;  %v2674_v6 = vld [vmem:[%s4039_s1 + $0x20] ss:$16 sps:$4 sm:$0xff]   ;;  %v2675_v7 = vld [vmem:[%s4039_s1 + $0x28] ss:$16 sps:$4 sm:$0xff]   ;;  %v2676_v8 = vld [vmem:[%s4039_s1 + $0x44] ss:$16 sps:$4 sm:$0xff]  }
   0x4   :  { %827 = vmatprep.subr.bf16.mxu0 %v2670_v4  ;;  %909 = vmatprep.subr.bf16.mxu1 %v2672_v5  ;;  %v2678_v9 = vld [vmem:[%s4039_s1 + $0x4c] ss:$16 sps:$4 sm:$0xff]   ;;  %v2680_v10 = vld [vmem:[%s4039_s1 + $0x40] ss:$16 sps:$4 sm:$0xff]   ;;  %v2681_v11 = vld [vmem:[%s4039_s1 + $0x48] ss:$16 sps:$4 sm:$0xff]  }
   0x5   :  { %v2682_v12 = vld [vmem:[%s4039_s1 + $0x64] ss:$16 sps:$4 sm:$0xff]   ;;  %v2684_v13 = vld [vmem:[%s4039_s1 + $0x6c] ss:$16 sps:$4 sm:$0xff]   ;;  %v2686_v14 = vld [vmem:[%s4039_s1 + $0x60] ss:$16 sps:$4 sm:$0xff]  }
   0x6   :  { %v2687_v15 = vld [vmem:[%s4039_s1 + $0x68] ss:$16 sps:$4 sm:$0xff]   ;;  %v2688_v16 = vld [vmem:[%s4039_s1 + $0x84] ss:$16 sps:$4 sm:$0xff]   ;;  %v2690_v17 = vld [vmem:[%s4039_s1 + $0x8c] ss:$16 sps:$4 sm:$0xff]  }
   0x7   :  { %828 = vmatpush1.bf16.msra.mxu0 %v2674_v6  ;;  %910 = vmatpush1.bf16.msra.mxu1 %v2675_v7  ;;  %v2692_v18 = vld [vmem:[%s4039_s1 + $0x80] ss:$16 sps:$4 sm:$0xff]   ;;  %v2693_v19 = vld [vmem:[%s4039_s1 + $0x88] ss:$16 sps:$4 sm:$0xff]   ;;  %v2694_v20 = vld [vmem:[%s4039_s1 + $0xa4] ss:$16 sps:$4 sm:$0xff]  }
   0x8   :  { %829 = vmatprep.subr.bf16.mxu0 %v2676_v8  ;;  %911 = vmatprep.subr.bf16.mxu1 %v2678_v9  ;;  %v2696_v21 = vld [vmem:[%s4039_s1 + $0xac] ss:$16 sps:$4 sm:$0xff]   ;;  %v2698_v22 = vld [vmem:[%s4039_s1 + $0xa0] ss:$16 sps:$4 sm:$0xff]   ;;  %v2699_v23 = vld [vmem:[%s4039_s1 + $0xa8] ss:$16 sps:$4 sm:$0xff]  }
   0x9   :  { %v2700_v24 = vld [vmem:[%s4039_s1 + $0xc4] ss:$16 sps:$4 sm:$0xff]   ;;  %v2702_v25 = vld [vmem:[%s4039_s1 + $0xcc] ss:$16 sps:$4 sm:$0xff]   ;;  %v2704_v26 = vld [vmem:[%s4039_s1 + $0xc0] ss:$16 sps:$4 sm:$0xff]  }
   0xa   :  { %v2705_v27 = vld [vmem:[%s4039_s1 + $0xc8] ss:$16 sps:$4 sm:$0xff]   ;;  %v2706_v28 = vld [vmem:[%s4039_s1 + $0xe4] ss:$16 sps:$4 sm:$0xff]   ;;  %v2708_v29 = vld [vmem:[%s4039_s1 + $0xec] ss:$16 sps:$4 sm:$0xff]  }
   0xb   :  { %830 = vmatpush1.bf16.msra.mxu0 %v2680_v10  ;;  %912 = vmatpush1.bf16.msra.mxu1 %v2681_v11  ;;  %v2710_v30 = vld [vmem:[%s4039_s1 + $0xe0] ss:$16 sps:$4 sm:$0xff]   ;;  %v2711_v31 = vld [vmem:[%s4039_s1 + $0xe8] ss:$16 sps:$4 sm:$0xff]   ;;  %v2712_v32 = vld [vmem:[%s4039_s1 + $0x104] ss:$16 sps:$4 sm:$0xff]  }
   0xc   :  { %831 = vmatprep.subr.bf16.mxu0 %v2682_v12  ;;  %913 = vmatprep.subr.bf16.mxu1 %v2684_v13  ;;  %v2714_v33 = vld [vmem:[%s4039_s1 + $0x10c] ss:$16 sps:$4 sm:$0xff]   ;;  %v2716_v34 = vld [vmem:[%s4039_s1 + $0x100] ss:$16 sps:$4 sm:$0xff]   ;;  %v2717_v35 = vld [vmem:[%s4039_s1 + $0x108] ss:$16 sps:$4 sm:$0xff]  }
   0xd   :  { %v2718_v36 = vld [vmem:[%s4039_s1 + $0x124] ss:$16 sps:$4 sm:$0xff]   ;;  %v2720_v37 = vld [vmem:[%s4039_s1 + $0x12c] ss:$16 sps:$4 sm:$0xff]   ;;  %v2722_v38 = vld [vmem:[%s4039_s1 + $0x120] ss:$16 sps:$4 sm:$0xff]  }
   0xe   :  { %v2723_v39 = vld [vmem:[%s4039_s1 + $0x128] ss:$16 sps:$4 sm:$0xff]   ;;  %v2724_v40 = vld [vmem:[%s4039_s1 + $0x144] ss:$16 sps:$4 sm:$0xff]   ;;  %v2726_v41 = vld [vmem:[%s4039_s1 + $0x14c] ss:$16 sps:$4 sm:$0xff]  }
   0xf   :  { %832 = vmatpush1.bf16.msra.mxu0 %v2686_v14  ;;  %914 = vmatpush1.bf16.msra.mxu1 %v2687_v15  ;;  %v2728_v42 = vld [vmem:[%s4039_s1 + $0x140] ss:$16 sps:$4 sm:$0xff]   ;;  %v2729_v43 = vld [vmem:[%s4039_s1 + $0x148] ss:$16 sps:$4 sm:$0xff]   ;;  %v2730_v44 = vld [vmem:[%s4039_s1 + $0x164] ss:$16 sps:$4 sm:$0xff]  }
  0x10   :  { %833 = vmatprep.subr.bf16.mxu0 %v2688_v16  ;;  %915 = vmatprep.subr.bf16.mxu1 %v2690_v17  ;;  %v2732_v45 = vld [vmem:[%s4039_s1 + $0x16c] ss:$16 sps:$4 sm:$0xff]   ;;  %v2734_v47 = vld [vmem:[%s4039_s1 + $0x160] ss:$16 sps:$4 sm:$0xff]   ;;  %v2735_v49 = vld [vmem:[%s4039_s1 + $0x168] ss:$16 sps:$4 sm:$0xff]  }
  0x11   :  { %v28_v46 = vld [vmem:[%s4040_s0 + $0x8] sm:$0xff]  ;;  %v2736_v50 = vld [vmem:[%s4039_s1 + $0x184] ss:$16 sps:$4 sm:$0xff]   ;;  %v2740_v52 = vld [vmem:[%s4039_s1 + $0x180] ss:$16 sps:$4 sm:$0xff]  }
  0x12   :  { %v32_v48 = vpack.c.bf16 %v28_v46, %v28_v46  ;;  %v2738_v51 = vld [vmem:[%s4039_s1 + $0x18c] ss:$16 sps:$4 sm:$0xff]   ;;  %v2741_v53 = vld [vmem:[%s4039_s1 + $0x188] ss:$16 sps:$4 sm:$0xff]   ;;  %v2742_v54 = vld [vmem:[%s4039_s1 + $0x1a4] ss:$16 sps:$4 sm:$0xff]  }
  0x13   :  { %834 = vmatpush1.bf16.msra.mxu0 %v2692_v18  ;;  %916 = vmatpush1.bf16.msra.mxu1 %v2693_v19  ;;  %v2744_v55 = vld [vmem:[%s4039_s1 + $0x1ac] ss:$16 sps:$4 sm:$0xff]   ;;  %v2746_v56 = vld [vmem:[%s4039_s1 + $0x1a0] ss:$16 sps:$4 sm:$0xff]   ;;  %v2747_v57 = vld [vmem:[%s4039_s1 + $0x1a8] ss:$16 sps:$4 sm:$0xff]  }
  0x14   :  { %835 = vmatprep.subr.bf16.mxu0 %v2694_v20  ;;  %917 = vmatprep.subr.bf16.mxu1 %v2696_v21  ;;  %v2748_v58 = vld [vmem:[%s4039_s1 + $0x1c4] ss:$16 sps:$4 sm:$0xff]   ;;  %v2750_v59 = vld [vmem:[%s4039_s1 + $0x1cc] ss:$16 sps:$4 sm:$0xff]   ;;  %v2752_v60 = vld [vmem:[%s4039_s1 + $0x1c0] ss:$16 sps:$4 sm:$0xff]  }
  0x15   :  { %857 = vmatprep.mubr.bf16.mxu0 %v32_v48  ;;  %939 = vmatprep.mubr.bf16.mxu1 %v32_v48  ;;  %v2753_v61 = vld [vmem:[%s4039_s1 + $0x1c8] ss:$16 sps:$4 sm:$0xff]   ;;  %v2754_v62 = vld [vmem:[%s4039_s1 + $0x1e4] ss:$16 sps:$4 sm:$0xff]   ;;  %v2756_v63 = vld [vmem:[%s4039_s1 + $0x1ec] ss:$16 sps:$4 sm:$0xff]  }
  0x16   :  { %v2758_v0 = vld [vmem:[%s4039_s1 + $0x1e0] ss:$16 sps:$4 sm:$0xff]   ;;  %v2759_v1 = vld [vmem:[%s4039_s1 + $0x1e8] ss:$16 sps:$4 sm:$0xff]   ;;  %v2762_v3 = vld [vmem:[%s4039_s1 + $0x204] ss:$16 sps:$4 sm:$0xff]  }
  0x17   :  { %836 = vmatpush1.bf16.msra.mxu0 %v2698_v22  ;;  %918 = vmatpush1.bf16.msra.mxu1 %v2699_v23  ;;  %v27_v2 = vld [vmem:[%s4040_s0] sm:$0xff]  ;;  %v2765_v4 = vld [vmem:[%s4039_s1 + $0x20c] ss:$16 sps:$4 sm:$0xff]   ;;  %v2763_v7 = vld [vmem:[%s4039_s1 + $0x208] ss:$16 sps:$4 sm:$0xff]  }
  0x18   :  { %837 = vmatprep.subr.bf16.mxu0 %v2700_v24  ;;  %919 = vmatprep.subr.bf16.mxu1 %v2702_v25  ;;  %v31_v5 = vpack.c.bf16 %v27_v2, %v27_v2  ;;  %v2760_v6 = vld [vmem:[%s4039_s1 + $0x200] ss:$16 sps:$4 sm:$0xff]   ;;  %v2768_v8 = vld [vmem:[%s4039_s1 + $0x224] ss:$16 sps:$4 sm:$0xff]   ;;  %v2771_v9 = vld [vmem:[%s4039_s1 + $0x22c] ss:$16 sps:$4 sm:$0xff]  }
  0x19   :  { %v2766_v10 = vld [vmem:[%s4039_s1 + $0x220] ss:$16 sps:$4 sm:$0xff]   ;;  %v2769_v11 = vld [vmem:[%s4039_s1 + $0x228] ss:$16 sps:$4 sm:$0xff]   ;;  %v2774_v12 = vld [vmem:[%s4039_s1 + $0x244] ss:$16 sps:$4 sm:$0xff]  }
  0x1a   :  { %v2777_v13 = vld [vmem:[%s4039_s1 + $0x24c] ss:$16 sps:$4 sm:$0xff]   ;;  %v2772_v14 = vld [vmem:[%s4039_s1 + $0x240] ss:$16 sps:$4 sm:$0xff]   ;;  %v2775_v15 = vld [vmem:[%s4039_s1 + $0x248] ss:$16 sps:$4 sm:$0xff]  }
  0x1b   :  { %838 = vmatpush1.bf16.msra.mxu0 %v2704_v26  ;;  %920 = vmatpush1.bf16.msra.mxu1 %v2705_v27  ;;  %v2780_v16 = vld [vmem:[%s4039_s1 + $0x264] ss:$16 sps:$4 sm:$0xff]   ;;  %v2783_v17 = vld [vmem:[%s4039_s1 + $0x26c] ss:$16 sps:$4 sm:$0xff]   ;;  %v2778_v18 = vld [vmem:[%s4039_s1 + $0x260] ss:$16 sps:$4 sm:$0xff]  }
  0x1c   :  { %839 = vmatprep.subr.bf16.mxu0 %v2706_v28  ;;  %921 = vmatprep.subr.bf16.mxu1 %v2708_v29  ;;  %v2781_v19 = vld [vmem:[%s4039_s1 + $0x268] ss:$16 sps:$4 sm:$0xff]   ;;  %v2786_v20 = vld [vmem:[%s4039_s1 + $0x284] ss:$16 sps:$4 sm:$0xff]   ;;  %v2789_v21 = vld [vmem:[%s4039_s1 + $0x28c] ss:$16 sps:$4 sm:$0xff]  }
  0x1d   :  { %v2784_v22 = vld [vmem:[%s4039_s1 + $0x280] ss:$16 sps:$4 sm:$0xff]   ;;  %v2787_v23 = vld [vmem:[%s4039_s1 + $0x288] ss:$16 sps:$4 sm:$0xff]   ;;  %v2792_v24 = vld [vmem:[%s4039_s1 + $0x2a4] ss:$16 sps:$4 sm:$0xff]  }
  0x1e   :  { %v2795_v25 = vld [vmem:[%s4039_s1 + $0x2ac] ss:$16 sps:$4 sm:$0xff]   ;;  %v2790_v26 = vld [vmem:[%s4039_s1 + $0x2a0] ss:$16 sps:$4 sm:$0xff]   ;;  %v2793_v27 = vld [vmem:[%s4039_s1 + $0x2a8] ss:$16 sps:$4 sm:$0xff]  }
  0x1f   :  { %840 = vmatpush1.bf16.msra.mxu0 %v2710_v30  ;;  %922 = vmatpush1.bf16.msra.mxu1 %v2711_v31  ;;  %v2798_v28 = vld [vmem:[%s4039_s1 + $0x2c4] ss:$16 sps:$4 sm:$0xff]   ;;  %v2801_v29 = vld [vmem:[%s4039_s1 + $0x2cc] ss:$16 sps:$4 sm:$0xff]   ;;  %v2796_v31 = vld [vmem:[%s4039_s1 + $0x2c0] ss:$16 sps:$4 sm:$0xff]  }
  0x20   :  { %841 = vmatprep.subr.bf16.mxu0 %v2712_v32  ;;  %923 = vmatprep.subr.bf16.mxu1 %v2714_v33  ;;  %v30_v30 = vld [vmem:[%s4040_s0 + $0x18] sm:$0xff]  ;;  %v2822_v46 = vld [vmem:[%s4039_s1 + $0x344] ss:$16 sps:$4 sm:$0xff]   ;;  %v2820_v48 = vld [vmem:[%s4039_s1 + $0x340] ss:$16 sps:$4 sm:$0xff]  }
  0x21   :  { %v2799_v32 = vld [vmem:[%s4039_s1 + $0x2c8] ss:$16 sps:$4 sm:$0xff]   ;;  %v34_v33 = vpack.c.bf16 %v30_v30, %v30_v30  ;;  %v2852_v2 = vld [vmem:[%s4039_s1 + $0x3e4] ss:$16 sps:$4 sm:$0xff]   ;;  %v2886_v30 = vld [vmem:[%s4041_s3 + $0xa0] ss:$16 sps:$4 sm:$0xff]  }
  0x23   :  { %842 = vmatpush1.bf16.msra.mxu0 %v2716_v34  ;;  %924 = vmatpush1.bf16.msra.mxu1 %v2717_v35  ;;  %v2804_v34 = vld [vmem:[%s4039_s1 + $0x2e4] ss:$16 sps:$4 sm:$0xff]   ;;  %v2807_v35 = vld [vmem:[%s4039_s1 + $0x2ec] ss:$16 sps:$4 sm:$0xff]  }
  0x24   :  { %843 = vmatprep.subr.bf16.mxu0 %v2718_v36  ;;  %925 = vmatprep.subr.bf16.mxu1 %v2720_v37  ;;  %v2802_v36 = vld [vmem:[%s4039_s1 + $0x2e0] ss:$16 sps:$4 sm:$0xff]   ;;  %v2805_v37 = vld [vmem:[%s4039_s1 + $0x2e8] ss:$16 sps:$4 sm:$0xff]  }
  0x27   :  { %844 = vmatpush1.bf16.msra.mxu0 %v2722_v38  ;;  %926 = vmatpush1.bf16.msra.mxu1 %v2723_v39  ;;  %v2810_v38 = vld [vmem:[%s4039_s1 + $0x304] ss:$16 sps:$4 sm:$0xff]   ;;  %v2813_v39 = vld [vmem:[%s4039_s1 + $0x30c] ss:$16 sps:$4 sm:$0xff]  }
  0x28   :  { %845 = vmatprep.subr.bf16.mxu0 %v2724_v40  ;;  %927 = vmatprep.subr.bf16.mxu1 %v2726_v41  ;;  %v2808_v40 = vld [vmem:[%s4039_s1 + $0x300] ss:$16 sps:$4 sm:$0xff]   ;;  %v2811_v41 = vld [vmem:[%s4039_s1 + $0x308] ss:$16 sps:$4 sm:$0xff]  }
  0x2b   :  { %846 = vmatpush1.bf16.msra.mxu0 %v2728_v42  ;;  %928 = vmatpush1.bf16.msra.mxu1 %v2729_v43  ;;  %v2816_v42 = vld [vmem:[%s4039_s1 + $0x324] ss:$16 sps:$4 sm:$0xff]   ;;  %v2819_v43 = vld [vmem:[%s4039_s1 + $0x32c] ss:$16 sps:$4 sm:$0xff]  }
  0x2c   :  { %847 = vmatprep.subr.bf16.mxu0 %v2730_v44  ;;  %929 = vmatprep.subr.bf16.mxu1 %v2732_v45  ;;  %v2814_v44 = vld [vmem:[%s4039_s1 + $0x320] ss:$16 sps:$4 sm:$0xff]   ;;  %v2817_v45 = vld [vmem:[%s4039_s1 + $0x328] ss:$16 sps:$4 sm:$0xff]  }
  0x2f   :  { %848 = vmatpush1.bf16.msra.mxu0 %v2734_v47  ;;  %930 = vmatpush1.bf16.msra.mxu1 %v2735_v49  ;;  %v2825_v47 = vld [vmem:[%s4039_s1 + $0x34c] ss:$16 sps:$4 sm:$0xff]   ;;  %v2823_v49 = vld [vmem:[%s4039_s1 + $0x348] ss:$16 sps:$4 sm:$0xff]  }
  0x30   :  { %849 = vmatprep.subr.bf16.mxu0 %v2736_v50  ;;  %931 = vmatprep.subr.bf16.mxu1 %v2738_v51  ;;  %v2828_v50 = vld [vmem:[%s4039_s1 + $0x364] ss:$16 sps:$4 sm:$0xff]   ;;  %v2831_v51 = vld [vmem:[%s4039_s1 + $0x36c] ss:$16 sps:$4 sm:$0xff]  }
  0x33   :  { %850 = vmatpush1.bf16.msra.mxu0 %v2740_v52  ;;  %932 = vmatpush1.bf16.msra.mxu1 %v2741_v53  ;;  %v2826_v52 = vld [vmem:[%s4039_s1 + $0x360] ss:$16 sps:$4 sm:$0xff]   ;;  %v2829_v53 = vld [vmem:[%s4039_s1 + $0x368] ss:$16 sps:$4 sm:$0xff]  }
  0x34   :  { %851 = vmatprep.subr.bf16.mxu0 %v2742_v54  ;;  %933 = vmatprep.subr.bf16.mxu1 %v2744_v55  ;;  %v2834_v54 = vld [vmem:[%s4039_s1 + $0x384] ss:$16 sps:$4 sm:$0xff]   ;;  %v2837_v55 = vld [vmem:[%s4039_s1 + $0x38c] ss:$16 sps:$4 sm:$0xff]  }
  0x37   :  { %852 = vmatpush1.bf16.msra.mxu0 %v2746_v56  ;;  %934 = vmatpush1.bf16.msra.mxu1 %v2747_v57  ;;  %v2832_v56 = vld [vmem:[%s4039_s1 + $0x380] ss:$16 sps:$4 sm:$0xff]   ;;  %v2835_v57 = vld [vmem:[%s4039_s1 + $0x388] ss:$16 sps:$4 sm:$0xff]  }
  0x38   :  { %853 = vmatprep.subr.bf16.mxu0 %v2748_v58  ;;  %935 = vmatprep.subr.bf16.mxu1 %v2750_v59  ;;  %v2840_v58 = vld [vmem:[%s4039_s1 + $0x3a4] ss:$16 sps:$4 sm:$0xff]   ;;  %v2843_v59 = vld [vmem:[%s4039_s1 + $0x3ac] ss:$16 sps:$4 sm:$0xff]  }
  0x3b   :  { %854 = vmatpush1.bf16.msra.mxu0 %v2752_v60  ;;  %936 = vmatpush1.bf16.msra.mxu1 %v2753_v61  ;;  %v2838_v60 = vld [vmem:[%s4039_s1 + $0x3a0] ss:$16 sps:$4 sm:$0xff]   ;;  %v2841_v61 = vld [vmem:[%s4039_s1 + $0x3a8] ss:$16 sps:$4 sm:$0xff]  }
  0x3c   :  { %855 = vmatprep.subr.bf16.mxu0 %v2754_v62  ;;  %937 = vmatprep.subr.bf16.mxu1 %v2756_v63  ;;  %v2846_v62 = vld [vmem:[%s4039_s1 + $0x3c4] ss:$16 sps:$4 sm:$0xff]   ;;  %v2849_v63 = vld [vmem:[%s4039_s1 + $0x3cc] ss:$16 sps:$4 sm:$0xff]  }
  0x3f   :  { %856 = vmatpush1.bf16.msra.mxu0 %v2758_v0  ;;  %938 = vmatpush1.bf16.msra.mxu1 %v2759_v1  ;;  %v2844_v0 = vld [vmem:[%s4039_s1 + $0x3c0] ss:$16 sps:$4 sm:$0xff]   ;;  %v2847_v1 = vld [vmem:[%s4039_s1 + $0x3c8] ss:$16 sps:$4 sm:$0xff]  }
  0x40   :  { %866 = vmatprep.subr.bf16.mxu0 %v2762_v3  ;;  %948 = vmatprep.subr.bf16.mxu1 %v2765_v4  ;;  %v2855_v3 = vld [vmem:[%s4039_s1 + $0x3ec] ss:$16 sps:$4 sm:$0xff]   ;;  %v2850_v4 = vld [vmem:[%s4039_s1 + $0x3e0] ss:$16 sps:$4 sm:$0xff]  }
  0x42   :  { %858 = vmatmul.mubr.bf16.vlgmr.msra.gmra.mrb[0].mxu0 %v31_v5  ;;  %940 = vmatmul.mubr.bf16.vlgmr.msra.gmra.mrb[0].mxu1 %v31_v5  ;;  %v2853_v5 = vld [vmem:[%s4039_s1 + $0x3e8] ss:$16 sps:$4 sm:$0xff]  }
  0x43   :  { %867 = vmatpush1.bf16.msra.mxu0 %v2760_v6  ;;  %949 = vmatpush1.bf16.msra.mxu1 %v2763_v7  ;;  %v29_v6 = vld [vmem:[%s4040_s0 + $0x10] sm:$0xff] }
  0x44   :  { %868 = vmatprep.subr.bf16.mxu0 %v2768_v8  ;;  %950 = vmatprep.subr.bf16.mxu1 %v2771_v9  ;;  %v2858_v7 = vld [vmem:[%s4041_s3 + $0x4] ss:$16 sps:$4 sm:$0xff]   ;;  %v2861_v8 = vld [vmem:[%s4041_s3 + $0xc] ss:$16 sps:$4 sm:$0xff]   ;;  %v2856_v9 = vld [vmem:[%s4041_s3] ss:$16 sps:$4 sm:$0xff]  }
  0x45   :  { %898 = vmatprep.mubr.bf16.mxu0 %v34_v33  ;;  %980 = vmatprep.mubr.bf16.mxu1 %v34_v33  ;;  %v2897_v33 = vld [vmem:[%s4041_s3 + $0xcc] ss:$16 sps:$4 sm:$0xff]  }
  0x47   :  { %869 = vmatpush1.bf16.msra.mxu0 %v2766_v10  ;;  %951 = vmatpush1.bf16.msra.mxu1 %v2769_v11  ;;  %v2859_v10 = vld [vmem:[%s4041_s3 + $0x8] ss:$16 sps:$4 sm:$0xff]   ;;  %v33_v11 = vpack.c.bf16 %v29_v6, %v29_v6  ;;  %v2946_v6 = vld [vmem:[%s4041_s3 + $0x1e0] ss:$16 sps:$4 sm:$0xff]  }
  0x48   :  { %870 = vmatprep.subr.bf16.mxu0 %v2774_v12  ;;  %952 = vmatprep.subr.bf16.mxu1 %v2777_v13  ;;  %v2864_v12 = vld [vmem:[%s4041_s3 + $0x24] ss:$16 sps:$4 sm:$0xff]   ;;  %v2867_v13 = vld [vmem:[%s4041_s3 + $0x2c] ss:$16 sps:$4 sm:$0xff]  }
  0x4b   :  { %871 = vmatpush1.bf16.msra.mxu0 %v2772_v14  ;;  %953 = vmatpush1.bf16.msra.mxu1 %v2775_v15  ;;  %v2862_v14 = vld [vmem:[%s4041_s3 + $0x20] ss:$16 sps:$4 sm:$0xff]   ;;  %v2865_v15 = vld [vmem:[%s4041_s3 + $0x28] ss:$16 sps:$4 sm:$0xff]  }
  0x4c   :  { %872 = vmatprep.subr.bf16.mxu0 %v2780_v16  ;;  %954 = vmatprep.subr.bf16.mxu1 %v2783_v17  ;;  %v2870_v16 = vld [vmem:[%s4041_s3 + $0x44] ss:$16 sps:$4 sm:$0xff]   ;;  %v2873_v17 = vld [vmem:[%s4041_s3 + $0x4c] ss:$16 sps:$4 sm:$0xff]  }
  0x4f   :  { %873 = vmatpush1.bf16.msra.mxu0 %v2778_v18  ;;  %955 = vmatpush1.bf16.msra.mxu1 %v2781_v19  ;;  %v2868_v18 = vld [vmem:[%s4041_s3 + $0x40] ss:$16 sps:$4 sm:$0xff]   ;;  %v2871_v19 = vld [vmem:[%s4041_s3 + $0x48] ss:$16 sps:$4 sm:$0xff]  }
  0x50   :  { %874 = vmatprep.subr.bf16.mxu0 %v2786_v20  ;;  %956 = vmatprep.subr.bf16.mxu1 %v2789_v21  ;;  %v2876_v20 = vld [vmem:[%s4041_s3 + $0x64] ss:$16 sps:$4 sm:$0xff]   ;;  %v2879_v21 = vld [vmem:[%s4041_s3 + $0x6c] ss:$16 sps:$4 sm:$0xff]  }
  0x53   :  { %875 = vmatpush1.bf16.msra.mxu0 %v2784_v22  ;;  %957 = vmatpush1.bf16.msra.mxu1 %v2787_v23  ;;  %v2874_v22 = vld [vmem:[%s4041_s3 + $0x60] ss:$16 sps:$4 sm:$0xff]   ;;  %v2877_v23 = vld [vmem:[%s4041_s3 + $0x68] ss:$16 sps:$4 sm:$0xff]  }
  0x54   :  { %876 = vmatprep.subr.bf16.mxu0 %v2792_v24  ;;  %958 = vmatprep.subr.bf16.mxu1 %v2795_v25  ;;  %v2882_v24 = vld [vmem:[%s4041_s3 + $0x84] ss:$16 sps:$4 sm:$0xff]   ;;  %v2885_v25 = vld [vmem:[%s4041_s3 + $0x8c] ss:$16 sps:$4 sm:$0xff]  }
  0x57   :  { %877 = vmatpush1.bf16.msra.mxu0 %v2790_v26  ;;  %959 = vmatpush1.bf16.msra.mxu1 %v2793_v27  ;;  %v2880_v26 = vld [vmem:[%s4041_s3 + $0x80] ss:$16 sps:$4 sm:$0xff]   ;;  %v2883_v27 = vld [vmem:[%s4041_s3 + $0x88] ss:$16 sps:$4 sm:$0xff]  }
  0x58   :  { %878 = vmatprep.subr.bf16.mxu0 %v2798_v28  ;;  %960 = vmatprep.subr.bf16.mxu1 %v2801_v29  ;;  %v2888_v28 = vld [vmem:[%s4041_s3 + $0xa4] ss:$16 sps:$4 sm:$0xff]   ;;  %v2891_v29 = vld [vmem:[%s4041_s3 + $0xac] ss:$16 sps:$4 sm:$0xff]  }
  0x5b   :  { %879 = vmatpush1.bf16.msra.mxu0 %v2796_v31  ;;  %961 = vmatpush1.bf16.msra.mxu1 %v2799_v32  ;;  %v2889_v31 = vld [vmem:[%s4041_s3 + $0xa8] ss:$16 sps:$4 sm:$0xff]   ;;  %v2894_v32 = vld [vmem:[%s4041_s3 + $0xc4] ss:$16 sps:$4 sm:$0xff]  }
  0x5c   :  { %880 = vmatprep.subr.bf16.mxu0 %v2804_v34  ;;  %962 = vmatprep.subr.bf16.mxu1 %v2807_v35  ;;  %v2892_v34 = vld [vmem:[%s4041_s3 + $0xc0] ss:$16 sps:$4 sm:$0xff]   ;;  %v2895_v35 = vld [vmem:[%s4041_s3 + $0xc8] ss:$16 sps:$4 sm:$0xff]  }
  0x5f   :  { %881 = vmatpush1.bf16.msra.mxu0 %v2802_v36  ;;  %963 = vmatpush1.bf16.msra.mxu1 %v2805_v37  ;;  %v2900_v36 = vld [vmem:[%s4041_s3 + $0xe4] ss:$16 sps:$4 sm:$0xff]   ;;  %v2903_v37 = vld [vmem:[%s4041_s3 + $0xec] ss:$16 sps:$4 sm:$0xff]  }
  0x60   :  { %882 = vmatprep.subr.bf16.mxu0 %v2810_v38  ;;  %964 = vmatprep.subr.bf16.mxu1 %v2813_v39  ;;  %v2898_v38 = vld [vmem:[%s4041_s3 + $0xe0] ss:$16 sps:$4 sm:$0xff]   ;;  %v2901_v39 = vld [vmem:[%s4041_s3 + $0xe8] ss:$16 sps:$4 sm:$0xff]  }
  0x63   :  { %883 = vmatpush1.bf16.msra.mxu0 %v2808_v40  ;;  %965 = vmatpush1.bf16.msra.mxu1 %v2811_v41  ;;  %v2906_v40 = vld [vmem:[%s4041_s3 + $0x104] ss:$16 sps:$4 sm:$0xff]   ;;  %v2909_v41 = vld [vmem:[%s4041_s3 + $0x10c] ss:$16 sps:$4 sm:$0xff]  }
  0x64   :  { %884 = vmatprep.subr.bf16.mxu0 %v2816_v42  ;;  %966 = vmatprep.subr.bf16.mxu1 %v2819_v43  ;;  %v2904_v42 = vld [vmem:[%s4041_s3 + $0x100] ss:$16 sps:$4 sm:$0xff]   ;;  %v2907_v43 = vld [vmem:[%s4041_s3 + $0x108] ss:$16 sps:$4 sm:$0xff]  }
  0x67   :  { %885 = vmatpush1.bf16.msra.mxu0 %v2814_v44  ;;  %967 = vmatpush1.bf16.msra.mxu1 %v2817_v45  ;;  %v2912_v44 = vld [vmem:[%s4041_s3 + $0x124] ss:$16 sps:$4 sm:$0xff]   ;;  %v2915_v45 = vld [vmem:[%s4041_s3 + $0x12c] ss:$16 sps:$4 sm:$0xff]  }
  0x68   :  { %886 = vmatprep.subr.bf16.mxu0 %v2822_v46  ;;  %968 = vmatprep.subr.bf16.mxu1 %v2825_v47  ;;  %v2910_v46 = vld [vmem:[%s4041_s3 + $0x120] ss:$16 sps:$4 sm:$0xff]   ;;  %v2913_v47 = vld [vmem:[%s4041_s3 + $0x128] ss:$16 sps:$4 sm:$0xff]  }
  0x6b   :  { %887 = vmatpush1.bf16.msra.mxu0 %v2820_v48  ;;  %969 = vmatpush1.bf16.msra.mxu1 %v2823_v49  ;;  %v2918_v48 = vld [vmem:[%s4041_s3 + $0x144] ss:$16 sps:$4 sm:$0xff]   ;;  %v2921_v49 = vld [vmem:[%s4041_s3 + $0x14c] ss:$16 sps:$4 sm:$0xff]  }
  0x6c   :  { %888 = vmatprep.subr.bf16.mxu0 %v2828_v50  ;;  %970 = vmatprep.subr.bf16.mxu1 %v2831_v51  ;;  %v2916_v50 = vld [vmem:[%s4041_s3 + $0x140] ss:$16 sps:$4 sm:$0xff]   ;;  %v2919_v51 = vld [vmem:[%s4041_s3 + $0x148] ss:$16 sps:$4 sm:$0xff]  }
  0x6f   :  { %889 = vmatpush1.bf16.msra.mxu0 %v2826_v52  ;;  %971 = vmatpush1.bf16.msra.mxu1 %v2829_v53  ;;  %v2924_v52 = vld [vmem:[%s4041_s3 + $0x164] ss:$16 sps:$4 sm:$0xff]   ;;  %v2927_v53 = vld [vmem:[%s4041_s3 + $0x16c] ss:$16 sps:$4 sm:$0xff]  }
  0x70   :  { %890 = vmatprep.subr.bf16.mxu0 %v2834_v54  ;;  %972 = vmatprep.subr.bf16.mxu1 %v2837_v55  ;;  %v2922_v54 = vld [vmem:[%s4041_s3 + $0x160] ss:$16 sps:$4 sm:$0xff]   ;;  %v2925_v55 = vld [vmem:[%s4041_s3 + $0x168] ss:$16 sps:$4 sm:$0xff]  }
  0x73   :  { %891 = vmatpush1.bf16.msra.mxu0 %v2832_v56  ;;  %973 = vmatpush1.bf16.msra.mxu1 %v2835_v57  ;;  %v2930_v56 = vld [vmem:[%s4041_s3 + $0x184] ss:$16 sps:$4 sm:$0xff]   ;;  %v2933_v57 = vld [vmem:[%s4041_s3 + $0x18c] ss:$16 sps:$4 sm:$0xff]  }
  0x74   :  { %892 = vmatprep.subr.bf16.mxu0 %v2840_v58  ;;  %974 = vmatprep.subr.bf16.mxu1 %v2843_v59  ;;  %v2928_v58 = vld [vmem:[%s4041_s3 + $0x180] ss:$16 sps:$4 sm:$0xff]   ;;  %v2931_v59 = vld [vmem:[%s4041_s3 + $0x188] ss:$16 sps:$4 sm:$0xff]  }
  0x77   :  { %893 = vmatpush1.bf16.msra.mxu0 %v2838_v60  ;;  %975 = vmatpush1.bf16.msra.mxu1 %v2841_v61  ;;  %v2936_v60 = vld [vmem:[%s4041_s3 + $0x1a4] ss:$16 sps:$4 sm:$0xff]   ;;  %v2939_v61 = vld [vmem:[%s4041_s3 + $0x1ac] ss:$16 sps:$4 sm:$0xff]  }
  0x78   :  { %894 = vmatprep.subr.bf16.mxu0 %v2846_v62  ;;  %976 = vmatprep.subr.bf16.mxu1 %v2849_v63  ;;  %v2934_v62 = vld [vmem:[%s4041_s3 + $0x1a0] ss:$16 sps:$4 sm:$0xff]   ;;  %v2937_v63 = vld [vmem:[%s4041_s3 + $0x1a8] ss:$16 sps:$4 sm:$0xff]  }
  0x7b   :  { %895 = vmatpush1.bf16.msra.mxu0 %v2844_v0  ;;  %977 = vmatpush1.bf16.msra.mxu1 %v2847_v1  ;;  %v2942_v0 = vld [vmem:[%s4041_s3 + $0x1c4] ss:$16 sps:$4 sm:$0xff]   ;;  %v2945_v1 = vld [vmem:[%s4041_s3 + $0x1cc] ss:$16 sps:$4 sm:$0xff]  }
  0x7c   :  { %896 = vmatprep.subr.bf16.mxu0 %v2852_v2  ;;  %978 = vmatprep.subr.bf16.mxu1 %v2855_v3  ;;  %v2940_v2 = vld [vmem:[%s4041_s3 + $0x1c0] ss:$16 sps:$4 sm:$0xff]   ;;  %v2943_v3 = vld [vmem:[%s4041_s3 + $0x1c8] ss:$16 sps:$4 sm:$0xff]  }
  0x7f   :  { %897 = vmatpush1.bf16.msra.mxu0 %v2850_v4  ;;  %979 = vmatpush1.bf16.msra.mxu1 %v2853_v5  ;;  %v2948_v4 = vld [vmem:[%s4041_s3 + $0x1e4] ss:$16 sps:$4 sm:$0xff]   ;;  %v2951_v5 = vld [vmem:[%s4041_s3 + $0x1ec] ss:$16 sps:$4 sm:$0xff]  }
  0x80   :  { %1787 = vmatprep.subr.bf16.mxu0 %v2858_v7  ;;  %1869 = vmatprep.subr.bf16.mxu1 %v2861_v8  ;;  %v2949_v7 = vld [vmem:[%s4041_s3 + $0x1e8] ss:$16 sps:$4 sm:$0xff]   ;;  %v2954_v8 = vld [vmem:[%s4041_s3 + $0x204] ss:$16 sps:$4 sm:$0xff]  }
  0x82   :  { %899 = vmatmul.mubr.bf16.vlgmr.msra.gmra.mrb[0].mxu0 %v33_v11  ;;  %981 = vmatmul.mubr.bf16.vlgmr.msra.gmra.mrb[0].mxu1 %v33_v11 }
  0x83   :  { %1788 = vmatpush1.bf16.msra.mxu0 %v2856_v9  ;;  %1870 = vmatpush1.bf16.msra.mxu1 %v2859_v10  ;;  %v2957_v9 = vld [vmem:[%s4041_s3 + $0x20c] ss:$16 sps:$4 sm:$0xff]   ;;  %v165_v10 = vlaneseq }
  0x84   :  { %1789 = vmatprep.subr.bf16.mxu0 %v2864_v12  ;;  %1871 = vmatprep.subr.bf16.mxu1 %v2867_v13  ;;  %v3720_v13 = vld [vmem:[%s4043_s2] sm:$0xf] }
  0x85   :  { %v3714_v11 = vshrl.u32 %v165_v10, 7  ;;  %v3014_v10 = vld [vmem:[%s4041_s3 + $0x344] ss:$16 sps:$4 sm:$0xff]  }
  0x87   :  { %1790 = vmatpush1.bf16.msra.mxu0 %v2862_v14  ;;  %1872 = vmatpush1.bf16.msra.mxu1 %v2865_v15  ;;  %v167_v12 = vsub.s32 0, %v3714_v11  ;;  %v171_v14 = vsub.s32 1, %v3714_v11  ;;  %v179_v15 = vsub.s32 3, %v3714_v11 }
  0x88   :  { %1791 = vmatprep.subr.bf16.mxu0 %v2870_v16  ;;  %1873 = vmatprep.subr.bf16.mxu1 %v2873_v17 }
  0x89   :  { %v168_v16 = vrot.slane %v3720_v13, %v167_v12  ;;  %v172_v17 = vrot.slane %v3720_v13, %v171_v14 }
  0x8b   :  { %1792 = vmatpush1.bf16.msra.mxu0 %v2868_v18  ;;  %1874 = vmatpush1.bf16.msra.mxu1 %v2871_v19  ;;  %v180_v18 = vrot.slane %v3720_v13, %v179_v15 }
  0x8c   :  { %1793 = vmatprep.subr.bf16.mxu0 %v2876_v20  ;;  %1875 = vmatprep.subr.bf16.mxu1 %v2879_v21 }
  0x8f   :  { %1794 = vmatpush1.bf16.msra.mxu0 %v2874_v22  ;;  %1876 = vmatpush1.bf16.msra.mxu1 %v2877_v23 }
  0x90   :  { %1795 = vmatprep.subr.bf16.mxu0 %v2882_v24  ;;  %1877 = vmatprep.subr.bf16.mxu1 %v2885_v25 }
  0x93   :  { %1796 = vmatpush1.bf16.msra.mxu0 %v2880_v26  ;;  %1878 = vmatpush1.bf16.msra.mxu1 %v2883_v27 }
  0x94   :  { %1797 = vmatprep.subr.bf16.mxu0 %v2888_v28  ;;  %1879 = vmatprep.subr.bf16.mxu1 %v2891_v29 }
  0x97   :  { %1798 = vmatpush1.bf16.msra.mxu0 %v2886_v30  ;;  %1880 = vmatpush1.bf16.msra.mxu1 %v2889_v31 }
  0x98   :  { %1799 = vmatprep.subr.bf16.mxu0 %v2894_v32  ;;  %1881 = vmatprep.subr.bf16.mxu1 %v2897_v33 }
  0x9b   :  { %1800 = vmatpush1.bf16.msra.mxu0 %v2892_v34  ;;  %1882 = vmatpush1.bf16.msra.mxu1 %v2895_v35  ;;  %v2952_v34 = vld [vmem:[%s4041_s3 + $0x200] ss:$16 sps:$4 sm:$0xff]   ;;  %v2955_v35 = vld [vmem:[%s4041_s3 + $0x208] ss:$16 sps:$4 sm:$0xff]  }
  0x9c   :  { %1801 = vmatprep.subr.bf16.mxu0 %v2900_v36  ;;  %1883 = vmatprep.subr.bf16.mxu1 %v2903_v37  ;;  %v2960_v37 = vld [vmem:[%s4041_s3 + $0x224] ss:$16 sps:$4 sm:$0xff]  }
  0x9f   :  { %1802 = vmatpush1.bf16.msra.mxu0 %v2898_v38  ;;  %1884 = vmatpush1.bf16.msra.mxu1 %v2901_v39  ;;  %v2963_v38 = vld [vmem:[%s4041_s3 + $0x22c] ss:$16 sps:$4 sm:$0xff]  }
  0xa0   :  { %1803 = vmatprep.subr.bf16.mxu0 %v2906_v40  ;;  %1885 = vmatprep.subr.bf16.mxu1 %v2909_v41  ;;  %v2958_v40 = vld [vmem:[%s4041_s3 + $0x220] ss:$16 sps:$4 sm:$0xff]   ;;  %v2961_v41 = vld [vmem:[%s4041_s3 + $0x228] ss:$16 sps:$4 sm:$0xff]  }
  0xa3   :  { %1804 = vmatpush1.bf16.msra.mxu0 %v2904_v42  ;;  %1886 = vmatpush1.bf16.msra.mxu1 %v2907_v43  ;;  %v2966_v42 = vld [vmem:[%s4041_s3 + $0x244] ss:$16 sps:$4 sm:$0xff]   ;;  %v2969_v43 = vld [vmem:[%s4041_s3 + $0x24c] ss:$16 sps:$4 sm:$0xff]  }
  0xa4   :  { %1805 = vmatprep.subr.bf16.mxu0 %v2912_v44  ;;  %1887 = vmatprep.subr.bf16.mxu1 %v2915_v45  ;;  %v2964_v44 = vld [vmem:[%s4041_s3 + $0x240] ss:$16 sps:$4 sm:$0xff]   ;;  %v2967_v45 = vld [vmem:[%s4041_s3 + $0x248] ss:$16 sps:$4 sm:$0xff]  }
  0xa7   :  { %1806 = vmatpush1.bf16.msra.mxu0 %v2910_v46  ;;  %1888 = vmatpush1.bf16.msra.mxu1 %v2913_v47  ;;  %v2972_v46 = vld [vmem:[%s4041_s3 + $0x264] ss:$16 sps:$4 sm:$0xff]   ;;  %v2975_v47 = vld [vmem:[%s4041_s3 + $0x26c] ss:$16 sps:$4 sm:$0xff]  }
  0xa8   :  { %1807 = vmatprep.subr.bf16.mxu0 %v2918_v48  ;;  %1889 = vmatprep.subr.bf16.mxu1 %v2921_v49  ;;  %v2970_v48 = vld [vmem:[%s4041_s3 + $0x260] ss:$16 sps:$4 sm:$0xff]   ;;  %v2973_v49 = vld [vmem:[%s4041_s3 + $0x268] ss:$16 sps:$4 sm:$0xff]  }
  0xab   :  { %1808 = vmatpush1.bf16.msra.mxu0 %v2916_v50  ;;  %1890 = vmatpush1.bf16.msra.mxu1 %v2919_v51  ;;  %v2978_v50 = vld [vmem:[%s4041_s3 + $0x284] ss:$16 sps:$4 sm:$0xff]   ;;  %v2981_v51 = vld [vmem:[%s4041_s3 + $0x28c] ss:$16 sps:$4 sm:$0xff]  }
  0xac   :  { %1809 = vmatprep.subr.bf16.mxu0 %v2924_v52  ;;  %1891 = vmatprep.subr.bf16.mxu1 %v2927_v53  ;;  %v2976_v52 = vld [vmem:[%s4041_s3 + $0x280] ss:$16 sps:$4 sm:$0xff]   ;;  %v2979_v53 = vld [vmem:[%s4041_s3 + $0x288] ss:$16 sps:$4 sm:$0xff]  }
  0xaf   :  { %1810 = vmatpush1.bf16.msra.mxu0 %v2922_v54  ;;  %1892 = vmatpush1.bf16.msra.mxu1 %v2925_v55  ;;  %v2984_v54 = vld [vmem:[%s4041_s3 + $0x2a4] ss:$16 sps:$4 sm:$0xff]   ;;  %v2987_v55 = vld [vmem:[%s4041_s3 + $0x2ac] ss:$16 sps:$4 sm:$0xff]  }
  0xb0   :  { %1811 = vmatprep.subr.bf16.mxu0 %v2930_v56  ;;  %1893 = vmatprep.subr.bf16.mxu1 %v2933_v57  ;;  %v2982_v56 = vld [vmem:[%s4041_s3 + $0x2a0] ss:$16 sps:$4 sm:$0xff]   ;;  %v2985_v57 = vld [vmem:[%s4041_s3 + $0x2a8] ss:$16 sps:$4 sm:$0xff]  }
  0xb3   :  { %1812 = vmatpush1.bf16.msra.mxu0 %v2928_v58  ;;  %1894 = vmatpush1.bf16.msra.mxu1 %v2931_v59  ;;  %v2990_v58 = vld [vmem:[%s4041_s3 + $0x2c4] ss:$16 sps:$4 sm:$0xff]   ;;  %v2993_v59 = vld [vmem:[%s4041_s3 + $0x2cc] ss:$16 sps:$4 sm:$0xff]  }
  0xb4   :  { %1813 = vmatprep.subr.bf16.mxu0 %v2936_v60  ;;  %1895 = vmatprep.subr.bf16.mxu1 %v2939_v61  ;;  %v2988_v60 = vld [vmem:[%s4041_s3 + $0x2c0] ss:$16 sps:$4 sm:$0xff]   ;;  %v2991_v61 = vld [vmem:[%s4041_s3 + $0x2c8] ss:$16 sps:$4 sm:$0xff]  }
  0xb7   :  { %1814 = vmatpush1.bf16.msra.mxu0 %v2934_v62  ;;  %1896 = vmatpush1.bf16.msra.mxu1 %v2937_v63  ;;  %v2996_v62 = vld [vmem:[%s4041_s3 + $0x2e4] ss:$16 sps:$4 sm:$0xff]   ;;  %v2999_v63 = vld [vmem:[%s4041_s3 + $0x2ec] ss:$16 sps:$4 sm:$0xff]  }
  0xb8   :  { %1815 = vmatprep.subr.bf16.mxu0 %v2942_v0  ;;  %1897 = vmatprep.subr.bf16.mxu1 %v2945_v1  ;;  %v2994_v0 = vld [vmem:[%s4041_s3 + $0x2e0] ss:$16 sps:$4 sm:$0xff]   ;;  %v2997_v1 = vld [vmem:[%s4041_s3 + $0x2e8] ss:$16 sps:$4 sm:$0xff]  }
  0xbb   :  { %1816 = vmatpush1.bf16.msra.mxu0 %v2940_v2  ;;  %1898 = vmatpush1.bf16.msra.mxu1 %v2943_v3  ;;  %v3002_v2 = vld [vmem:[%s4041_s3 + $0x304] ss:$16 sps:$4 sm:$0xff]   ;;  %v3005_v3 = vld [vmem:[%s4041_s3 + $0x30c] ss:$16 sps:$4 sm:$0xff]  }
  0xbc   :  { %1817 = vmatprep.subr.bf16.mxu0 %v2948_v4  ;;  %1899 = vmatprep.subr.bf16.mxu1 %v2951_v5  ;;  %v3000_v4 = vld [vmem:[%s4041_s3 + $0x300] ss:$16 sps:$4 sm:$0xff]   ;;  %v3003_v5 = vld [vmem:[%s4041_s3 + $0x308] ss:$16 sps:$4 sm:$0xff]  }
  0xbf   :  { %1818 = vmatpush1.bf16.msra.mxu0 %v2946_v6  ;;  %1900 = vmatpush1.bf16.msra.mxu1 %v2949_v7  ;;  %v3008_v6 = vld [vmem:[%s4041_s3 + $0x324] ss:$16 sps:$4 sm:$0xff]   ;;  %v3011_v7 = vld [vmem:[%s4041_s3 + $0x32c] ss:$16 sps:$4 sm:$0xff]  }
  0xc0   :  { %1828 = vmatprep.subr.bf16.mxu0 %v2954_v8  ;;  %1910 = vmatprep.subr.bf16.mxu1 %v2957_v9  ;;  %v3006_v8 = vld [vmem:[%s4041_s3 + $0x320] ss:$16 sps:$4 sm:$0xff]   ;;  %v3009_v9 = vld [vmem:[%s4041_s3 + $0x328] ss:$16 sps:$4 sm:$0xff]  }
 0x155   :  { %v900_v19 = vpop.f32.mrb[0].mxu0  ;;  %v3733_v20 = vpop.f32.mrb[0].mxu1 }
 0x156   :  { %v2640_v21 = vadd.f32 %v900_v19, %v168_v16  ;;  %v902_v22 = vpop.f32.mrb[1].mxu0  ;;  %v984_v23 = vpop.f32.mrb[1].mxu1  ;;  %v3017_v16 = vld [vmem:[%s4041_s3 + $0x34c] ss:$16 sps:$4 sm:$0xff]   ;;  %v3020_v19 = vld [vmem:[%s4041_s3 + $0x364] ss:$16 sps:$4 sm:$0xff]  }
 0x157   :  { %v2641_v24 = vadd.f32 %v902_v22, %v172_v17  ;;  %v2643_v25 = vadd.f32 %v984_v23, %v180_v18  ;;  %v904_v26 = vpop.f32.mrb[2].mxu0  ;;  %v986_v27 = vpop.f32.mrb[2].mxu1  ;;  %v3012_v17 = vld [vmem:[%s4041_s3 + $0x340] ss:$16 sps:$4 sm:$0xff]   ;;  %v3015_v18 = vld [vmem:[%s4041_s3 + $0x348] ss:$16 sps:$4 sm:$0xff]  }
 0x158   :  { %v989_v28 = vmax.f32 %v2640_v21, 0.0  ;;  %v905_v29 = vpop.f32.mrb[3].mxu0  ;;  %v987_v30 = vpop.f32.mrb[3].mxu1  ;;  %v3023_v21 = vld [vmem:[%s4041_s3 + $0x36c] ss:$16 sps:$4 sm:$0xff]  }
 0x159   :  { %v990_v31 = vmax.f32 %v2641_v24, 0.0  ;;  %v992_v32 = vmax.f32 %v2643_v25, 0.0  ;;  %v3018_v22 = vld [vmem:[%s4041_s3 + $0x360] ss:$16 sps:$4 sm:$0xff]   ;;  %v3021_v23 = vld [vmem:[%s4041_s3 + $0x368] ss:$16 sps:$4 sm:$0xff]  }
 0x15a   :  { %v993_v36 = vpack.c.bf16 %v989_v28, %v989_v28  ;;  %v3026_v24 = vld [vmem:[%s4041_s3 + $0x384] ss:$16 sps:$4 sm:$0xff]   ;;  %v3029_v25 = vld [vmem:[%s4041_s3 + $0x38c] ss:$16 sps:$4 sm:$0xff]   ;;  %v3024_v26 = vld [vmem:[%s4041_s3 + $0x380] ss:$16 sps:$4 sm:$0xff]  }
 0x15b   :  { %v994_v33 = vpack.c.bf16 %v990_v31, %v990_v31  ;;  %v996_v39 = vpack.c.bf16 %v992_v32, %v992_v32  ;;  %v3027_v27 = vld [vmem:[%s4041_s3 + $0x388] ss:$16 sps:$4 sm:$0xff]   ;;  %v175_v28 = vsub.s32 2, %v3714_v11  ;;  %v3032_v29 = vld [vmem:[%s4041_s3 + $0x3a4] ss:$16 sps:$4 sm:$0xff]  }
 0x15c   :  { %v3035_v30 = vld [vmem:[%s4041_s3 + $0x3ac] ss:$16 sps:$4 sm:$0xff]   ;;  %v3030_v31 = vld [vmem:[%s4041_s3 + $0x3a0] ss:$16 sps:$4 sm:$0xff]   ;;  %v3033_v32 = vld [vmem:[%s4041_s3 + $0x3a8] ss:$16 sps:$4 sm:$0xff]  }
 0x15d   :  { %1819 = vmatprep.mubr.bf16.mxu0 %v994_v33  ;;  %1901 = vmatprep.mubr.bf16.mxu1 %v994_v33  ;;  %v176_v33 = vrot.slane %v3720_v13, %v175_v28  ;;  %v3039_v13 = vld [vmem:[%s4041_s3 + $0x3c8] ss:$16 sps:$4 sm:$0xff]  }
 0x15e   :  { %1820 = vmatmul.mubr.bf16.vlgmr.msra.gmra.mrb[4].mxu0 %v993_v36  ;;  %1902 = vmatmul.mubr.bf16.vlgmr.msra.gmra.mrb[4].mxu1 %v993_v36  ;;  %v3036_v36 = vld [vmem:[%s4041_s3 + $0x3c0] ss:$16 sps:$4 sm:$0xff]  }
 0x15f   :  { %1829 = vmatpush1.bf16.msra.mxu0 %v2952_v34  ;;  %1911 = vmatpush1.bf16.msra.mxu1 %v2955_v35  ;;  %v3038_v34 = vld [vmem:[%s4041_s3 + $0x3c4] ss:$16 sps:$4 sm:$0xff]   ;;  %v3041_v35 = vld [vmem:[%s4041_s3 + $0x3cc] ss:$16 sps:$4 sm:$0xff]  }
 0x160   :  { %1860 = vmatprep.mubr.bf16.mxu0 %v996_v39  ;;  %1942 = vmatprep.mubr.bf16.mxu1 %v996_v39  ;;  %v3047_v39 = vld [vmem:[%s4041_s3 + $0x3ec] ss:$16 sps:$4 sm:$0xff]  }
 0x161   :  { %1830 = vmatprep.subr.bf16.mxu0 %v2960_v37  ;;  %1912 = vmatprep.subr.bf16.mxu1 %v2963_v38  ;;  %v2642_v37 = vadd.f32 %v3733_v20, %v176_v33  ;;  %v3044_v38 = vld [vmem:[%s4041_s3 + $0x3e4] ss:$16 sps:$4 sm:$0xff]   ;;  %v3045_v20 = vld [vmem:[%s4041_s3 + $0x3e8] ss:$16 sps:$4 sm:$0xff]  }
 0x163   :  { %1831 = vmatpush1.bf16.msra.mxu0 %v2958_v40  ;;  %1913 = vmatpush1.bf16.msra.mxu1 %v2961_v41  ;;  %v3042_v40 = vld [vmem:[%s4041_s3 + $0x3e0] ss:$16 sps:$4 sm:$0xff]   ;;  %v991_v41 = vmax.f32 %v2642_v37, 0.0 }
 0x164   :  { %1832 = vmatprep.subr.bf16.mxu0 %v2966_v42  ;;  %1914 = vmatprep.subr.bf16.mxu1 %v2969_v43  ;;  %v3048_v42 = vld [vmem:[%s4042_s5 + $0x40] sm:$0xff]  }
 0x165   :  { %v3049_v43 = vld [vmem:[%s4042_s5 + $0xc0] sm:$0xff]  }
 0x167   :  { %1833 = vmatpush1.bf16.msra.mxu0 %v2964_v44  ;;  %1915 = vmatpush1.bf16.msra.mxu1 %v2967_v45  ;;  %v3050_v44 = vld [vmem:[%s4042_s5] sm:$0xff]  }
 0x168   :  { %1834 = vmatprep.subr.bf16.mxu0 %v2972_v46  ;;  %1916 = vmatprep.subr.bf16.mxu1 %v2975_v47  ;;  %v3051_v45 = vld [vmem:[%s4042_s5 + $0x80] sm:$0xff]   ;;  %v995_v46 = vpack.c.bf16 %v991_v41, %v991_v41  ;;  %v3052_v47 = vld [vmem:[%s4042_s5 + $0x48] sm:$0xff]  }
 0x16b   :  { %1835 = vmatpush1.bf16.msra.mxu0 %v2970_v48  ;;  %1917 = vmatpush1.bf16.msra.mxu1 %v2973_v49  ;;  %v3053_v48 = vld [vmem:[%s4042_s5 + $0xc8] sm:$0xff]  }
 0x16c   :  { %1836 = vmatprep.subr.bf16.mxu0 %v2978_v50  ;;  %1918 = vmatprep.subr.bf16.mxu1 %v2981_v51  ;;  %v3054_v49 = vld [vmem:[%s4042_s5 + $0x8] sm:$0xff]   ;;  %v3056_v51 = vld [vmem:[%s4042_s5 + $0x50] sm:$0xff]  }
 0x16d   :  { %v3055_v50 = vld [vmem:[%s4042_s5 + $0x88] sm:$0xff]  }
 0x16f   :  { %1837 = vmatpush1.bf16.msra.mxu0 %v2976_v52  ;;  %1919 = vmatpush1.bf16.msra.mxu1 %v2979_v53  ;;  %v3057_v52 = vld [vmem:[%s4042_s5 + $0xd0] sm:$0xff]  }
 0x170   :  { %1838 = vmatprep.subr.bf16.mxu0 %v2984_v54  ;;  %1920 = vmatprep.subr.bf16.mxu1 %v2987_v55  ;;  %v3058_v53 = vld [vmem:[%s4042_s5 + $0x10] sm:$0xff]   ;;  %v3060_v55 = vld [vmem:[%s4042_s5 + $0x58] sm:$0xff]  }
 0x171   :  { %v3059_v54 = vld [vmem:[%s4042_s5 + $0x90] sm:$0xff]  }
 0x173   :  { %1839 = vmatpush1.bf16.msra.mxu0 %v2982_v56  ;;  %1921 = vmatpush1.bf16.msra.mxu1 %v2985_v57  ;;  %v3061_v56 = vld [vmem:[%s4042_s5 + $0xd8] sm:$0xff]  }
 0x174   :  { %1840 = vmatprep.subr.bf16.mxu0 %v2990_v58  ;;  %1922 = vmatprep.subr.bf16.mxu1 %v2993_v59  ;;  %v3062_v57 = vld [vmem:[%s4042_s5 + $0x18] sm:$0xff]   ;;  %v3064_v59 = vld [vmem:[%s4042_s5 + $0x60] sm:$0xff]  }
 0x175   :  { %v3063_v58 = vld [vmem:[%s4042_s5 + $0x98] sm:$0xff]  }
 0x177   :  { %1841 = vmatpush1.bf16.msra.mxu0 %v2988_v60  ;;  %1923 = vmatpush1.bf16.msra.mxu1 %v2991_v61  ;;  %v3065_v60 = vld [vmem:[%s4042_s5 + $0xe0] sm:$0xff]  }
 0x178   :  { %1842 = vmatprep.subr.bf16.mxu0 %v2996_v62  ;;  %1924 = vmatprep.subr.bf16.mxu1 %v2999_v63  ;;  %v3066_v61 = vld [vmem:[%s4042_s5 + $0x20] sm:$0xff]   ;;  %v3068_v63 = vld [vmem:[%s4042_s5 + $0x68] sm:$0xff]  }
 0x179   :  { %v3067_v62 = vld [vmem:[%s4042_s5 + $0xa0] sm:$0xff]  }
 0x17b   :  { %1843 = vmatpush1.bf16.msra.mxu0 %v2994_v0  ;;  %1925 = vmatpush1.bf16.msra.mxu1 %v2997_v1  ;;  %v3069_v0 = vld [vmem:[%s4042_s5 + $0xe8] sm:$0xff]  }
 0x17c   :  { %1844 = vmatprep.subr.bf16.mxu0 %v3002_v2  ;;  %1926 = vmatprep.subr.bf16.mxu1 %v3005_v3  ;;  %v3070_v1 = vld [vmem:[%s4042_s5 + $0x28] sm:$0xff]   ;;  %v3072_v3 = vld [vmem:[%s4042_s5 + $0x70] sm:$0xff]  }
 0x17d   :  { %v3071_v2 = vld [vmem:[%s4042_s5 + $0xa8] sm:$0xff]  }
 0x17f   :  { %1845 = vmatpush1.bf16.msra.mxu0 %v3000_v4  ;;  %1927 = vmatpush1.bf16.msra.mxu1 %v3003_v5  ;;  %v3073_v4 = vld [vmem:[%s4042_s5 + $0xf0] sm:$0xff]  }
 0x180   :  { %1846 = vmatprep.subr.bf16.mxu0 %v3008_v6  ;;  %1928 = vmatprep.subr.bf16.mxu1 %v3011_v7  ;;  %v3074_v5 = vld [vmem:[%s4042_s5 + $0x30] sm:$0xff]   ;;  %v3076_v7 = vld [vmem:[%s4042_s5 + $0x78] sm:$0xff]  }
 0x181   :  { %v3075_v6 = vld [vmem:[%s4042_s5 + $0xb0] sm:$0xff]  }
 0x183   :  { %1847 = vmatpush1.bf16.msra.mxu0 %v3006_v8  ;;  %1929 = vmatpush1.bf16.msra.mxu1 %v3009_v9  ;;  %v3077_v8 = vld [vmem:[%s4042_s5 + $0xf8] sm:$0xff]  }
 0x184   :  { %1848 = vmatprep.subr.bf16.mxu0 %v3014_v10  ;;  %1930 = vmatprep.subr.bf16.mxu1 %v3017_v16  ;;  %v3078_v9 = vld [vmem:[%s4042_s5 + $0x38] sm:$0xff]   ;;  %v1125_v16 = vld [vmem:[%s4044_s4] sm:$0xf] }
 0x185   :  { %v3079_v10 = vld [vmem:[%s4042_s5 + $0xb8] sm:$0xff]  }
 0x187   :  { %1849 = vmatpush1.bf16.msra.mxu0 %v3012_v17  ;;  %1931 = vmatpush1.bf16.msra.mxu1 %v3015_v18  ;;  %v1130_v17 = vrot.slane %v1125_v16, %v167_v12  ;;  %v1138_v18 = vrot.slane %v1125_v16, %v175_v28 }
 0x188   :  { %1850 = vmatprep.subr.bf16.mxu0 %v3020_v19  ;;  %1932 = vmatprep.subr.bf16.mxu1 %v3023_v21  ;;  %v1134_v19 = vrot.slane %v1125_v16, %v171_v14  ;;  %v1142_v21 = vrot.slane %v1125_v16, %v179_v15 }
 0x18b   :  { %1851 = vmatpush1.bf16.msra.mxu0 %v3018_v22  ;;  %1933 = vmatpush1.bf16.msra.mxu1 %v3021_v23 }
 0x18c   :  { %1852 = vmatprep.subr.bf16.mxu0 %v3026_v24  ;;  %1934 = vmatprep.subr.bf16.mxu1 %v3029_v25 }
 0x18f   :  { %1853 = vmatpush1.bf16.msra.mxu0 %v3024_v26  ;;  %1935 = vmatpush1.bf16.msra.mxu1 %v3027_v27 }
 0x190   :  { %1854 = vmatprep.subr.bf16.mxu0 %v3032_v29  ;;  %1936 = vmatprep.subr.bf16.mxu1 %v3035_v30 }
 0x193   :  { %1855 = vmatpush1.bf16.msra.mxu0 %v3030_v31  ;;  %1937 = vmatpush1.bf16.msra.mxu1 %v3033_v32 }
 0x194   :  { %1856 = vmatprep.subr.bf16.mxu0 %v3038_v34  ;;  %1938 = vmatprep.subr.bf16.mxu1 %v3041_v35 }
 0x197   :  { %1857 = vmatpush1.bf16.msra.mxu0 %v3036_v36  ;;  %1939 = vmatpush1.bf16.msra.mxu1 %v3039_v13 }
 0x198   :  { %1858 = vmatprep.subr.bf16.mxu0 %v3044_v38  ;;  %1940 = vmatprep.subr.bf16.mxu1 %v3047_v39  ;;  %v2563_v39 = vld [vmem:[%s4045_s6] ss:$0 sm:$0xff] }
 0x19b   :  { %1859 = vmatpush1.bf16.msra.mxu0 %v3042_v40  ;;  %1941 = vmatpush1.bf16.msra.mxu1 %v3045_v20 }
 0x19c   :  { %2596 = vmatprep.subr.bf16.mxu0 %v3048_v42  ;;  %2618 = vmatprep.subr.bf16.mxu1 %v3049_v43 }
 0x19e   :  { %1861 = vmatmul.mubr.bf16.vlgmr.msra.gmra.mrb[4].mxu0 %v995_v46  ;;  %1943 = vmatmul.mubr.bf16.vlgmr.msra.gmra.mrb[4].mxu1 %v995_v46 }
 0x19f   :  { %2597 = vmatpush3.bf16.msra.mxu0 %v3050_v44  ;;  %2619 = vmatpush3.bf16.msra.mxu1 %v3051_v45 }
 0x1a0   :  { %2598 = vmatprep.subr.bf16.mxu0 %v3052_v47  ;;  %2620 = vmatprep.subr.bf16.mxu1 %v3053_v48 }
 0x1a3   :  { %2599 = vmatpush3.bf16.msra.mxu0 %v3054_v49  ;;  %2621 = vmatpush3.bf16.msra.mxu1 %v3055_v50 }
 0x1a4   :  { %2600 = vmatprep.subr.bf16.mxu0 %v3056_v51  ;;  %2622 = vmatprep.subr.bf16.mxu1 %v3057_v52 }
 0x1a7   :  { %2601 = vmatpush3.bf16.msra.mxu0 %v3058_v53  ;;  %2623 = vmatpush3.bf16.msra.mxu1 %v3059_v54 }
 0x1a8   :  { %2602 = vmatprep.subr.bf16.mxu0 %v3060_v55  ;;  %2624 = vmatprep.subr.bf16.mxu1 %v3061_v56 }
 0x1ab   :  { %2603 = vmatpush3.bf16.msra.mxu0 %v3062_v57  ;;  %2625 = vmatpush3.bf16.msra.mxu1 %v3063_v58 }
 0x1ac   :  { %2604 = vmatprep.subr.bf16.mxu0 %v3064_v59  ;;  %2626 = vmatprep.subr.bf16.mxu1 %v3065_v60 }
 0x1af   :  { %2605 = vmatpush3.bf16.msra.mxu0 %v3066_v61  ;;  %2627 = vmatpush3.bf16.msra.mxu1 %v3067_v62 }
 0x1b0   :  { %2606 = vmatprep.subr.bf16.mxu0 %v3068_v63  ;;  %2628 = vmatprep.subr.bf16.mxu1 %v3069_v0 }
 0x1b3   :  { %2607 = vmatpush3.bf16.msra.mxu0 %v3070_v1  ;;  %2629 = vmatpush3.bf16.msra.mxu1 %v3071_v2 }
 0x1b4   :  { %2608 = vmatprep.subr.bf16.mxu0 %v3072_v3  ;;  %2630 = vmatprep.subr.bf16.mxu1 %v3073_v4 }
 0x1b7   :  { %2609 = vmatpush3.bf16.msra.mxu0 %v3074_v5  ;;  %2631 = vmatpush3.bf16.msra.mxu1 %v3075_v6 }
 0x1b8   :  { %2610 = vmatprep.subr.bf16.mxu0 %v3076_v7  ;;  %2632 = vmatprep.subr.bf16.mxu1 %v3077_v8 }
 0x1bb   :  { %2611 = vmatpush3.bf16.msra.mxu0 %v3078_v9  ;;  %2633 = vmatpush3.bf16.msra.mxu1 %v3079_v10 }
 0x271   :  { %v1862_v22 = vpop.f32.mrb[4].mxu0  ;;  %v1944_v23 = vpop.f32.mrb[4].mxu1 }
 0x272   :  { %v2644_v24 = vadd.f32 %v1862_v22, %v1130_v17  ;;  %v2646_v25 = vadd.f32 %v1944_v23, %v1138_v18  ;;  %v1864_v26 = vpop.f32.mrb[5].mxu0  ;;  %v1946_v27 = vpop.f32.mrb[5].mxu1 }
 0x273   :  { %v2645_v29 = vadd.f32 %v1864_v26, %v1134_v19  ;;  %v2647_v30 = vadd.f32 %v1946_v27, %v1142_v21  ;;  %v1866_v31 = vpop.f32.mrb[6].mxu0  ;;  %v1948_v32 = vpop.f32.mrb[6].mxu1 }
 0x274   :  { %v1951_v12 = vmax.f32 %v2644_v24, 0.0  ;;  %v1953_v33 = vmax.f32 %v2646_v25, 0.0  ;;  %v1867_v34 = vpop.f32.mrb[7].mxu0  ;;  %v1949_v28 = vpop.f32.mrb[7].mxu1 }
 0x275   :  { %v1952_v35 = vmax.f32 %v2645_v29, 0.0  ;;  %v1954_v36 = vmax.f32 %v2647_v30, 0.0 }
 0x276   :  { %v1955_v11 = vpack.c.bf16 %v1951_v12, %v1951_v12  ;;  %v1957_v15 = vpack.c.bf16 %v1953_v33, %v1953_v33 }
 0x277   :  { %v1956_v14 = vpack.c.bf16 %v1952_v35, %v1952_v35  ;;  %v1958_v13 = vpack.c.bf16 %v1954_v36, %v1954_v36 }
 0x279   :  { %2254 = vmatprep.mubr.bf16.mxu0 %v1956_v14  ;;  %2294 = vmatprep.mubr.bf16.mxu1 %v1958_v13 }
 0x27a   :  { %2255 = vmatmul.mubr.bf16.vlgmr.msra.gmra.mrb[8].mxu0 %v1955_v11  ;;  %2295 = vmatmul.mubr.bf16.vlgmr.msra.gmra.mrb[8].mxu1 %v1957_v15 }
 0x34d   :  { %v2612_v37 = vpop.f32.mrb[8].mxu0  ;;  %v2634_v38 = vpop.f32.mrb[8].mxu1 }
 0x34e   :  { %v2613_v40 = vpop.f32.mrb[9].mxu0  ;;  %v2635_v20 = vpop.f32.mrb[9].mxu1 }
 0x34f   :  { %v2614_v41 = vadd.f32 %v2613_v40, %v2612_v37  ;;  %v2636_v42 = vadd.f32 %v2635_v20, %v2634_v38  ;;  %v2615_v43 = vpop.f32.mrb[10].mxu0  ;;  %v2637_v44 = vpop.f32.mrb[10].mxu1 }
 0x350   :  { %v2616_v45 = vpop.f32.mrb[11].mxu0  ;;  %v2638_v46 = vpop.f32.mrb[11].mxu1 }
 0x351   :  { %v2257_v47 = vadd.f32 %v2614_v41, %v2563_v39 }
 0x353   :  { %v2297_v48 = vadd.f32 %v2636_v42, %v2257_v47 }
 0x355   :  { %2302 = vst [vmem:[%s4046_s7] sm:$0xff] %v2297_v48 }

</bundles_post_ra>
